<compile_context>
chip_gen: v5e
topology: v5e:2x2
jax: 0.10.0
libtpu: 0.0.40
codegen_flags: <defaults>
</compile_context>

<pallas_src>
import jax
import jax.numpy as jnp
from jax.experimental import pallas as pl
from jax.experimental.pallas import tpu as pltpu


def _svd_reg_kernel(t_ref, s_ref, out_ref):
    # Tiles: t_ref/s_ref (TILE_B, 3, N); out_ref (TILE_B, 16).
    tgt = t_ref[...]
    src = s_ref[...]
    tb = tgt.shape[0]
    n = tgt.shape[-1]

    nan_t = jnp.isnan(tgt)
    nan_s = jnp.isnan(src)
    isnan = nan_t | nan_s

    # torch.nanmean over the point axis (now the last / lane axis), per tensor.
    # cnt == 0 -> 0/0 -> NaN, matching torch.nanmean.
    src0 = jnp.where(nan_s, 0.0, src)
    tgt0 = jnp.where(nan_t, 0.0, tgt)
    cnt_s = jnp.float32(n) - jnp.sum(nan_s.astype(jnp.float32), axis=-1, keepdims=True)
    cnt_t = jnp.float32(n) - jnp.sum(nan_t.astype(jnp.float32), axis=-1, keepdims=True)
    mean_s = jnp.sum(src0, axis=-1, keepdims=True) / cnt_s          # (TB, 3, 1)
    mean_t = jnp.sum(tgt0, axis=-1, keepdims=True) / cnt_t          # (TB, 3, 1)

    # Center, then zero jointly-NaN entries (matches xyz_*[isnan] = 0 ordering).
    tc_rows, sc_rows, mt_cols, ms_cols = [], [], [], []
    for i in range(3):
        bad = isnan[:, i, :]                                        # (TB, N)
        mt_i = mean_t[:, i, :]                                      # (TB, 1)
        ms_i = mean_s[:, i, :]                                      # (TB, 1)
        tc_rows.append(jnp.where(bad, 0.0, tgt[:, i, :] - mt_i))    # (TB, N)
        sc_rows.append(jnp.where(bad, 0.0, src[:, i, :] - ms_i))    # (TB, N)
        mt_cols.append(mt_i)
        ms_cols.append(ms_i)

    # cov[b, i, j] = sum_n tc_i[b, n] * sc_j[b, n]  (VPU mul + XLU lane reduce).
    cov_cols = []
    for i in range(3):
        for j in range(3):
            cov_cols.append(
                jnp.sum(tc_rows[i] * sc_rows[j], axis=-1, keepdims=True))  # (TB,1)

    # Pack 9 cov entries + 3 mean_t + 3 mean_s (+1 pad) into one lane-packed
    # (TILE_B, 16) tile.  Built with iota/select (robust lowering; avoids a
    # minor-dim concatenate of width-1 pieces).  One store DMA per grid step.
    cols = cov_cols + mt_cols + ms_cols                             # 15 x (TB,1)
    lane = jax.lax.broadcasted_iota(jnp.int32, (tb, 16), 1)
    packed = jnp.zeros((tb, 16), dtype=jnp.float32)
    for j, col in enumerate(cols):
        packed = jnp.where(lane == j, col, packed)
    out_ref[...] = packed


def _round_up(x, m):
    return ((x + m - 1) // m) * m


@jax.jit
def svd_registration(target, source):
    """Pallas implementation of SVDRegistration.forward with weights=None."""
    # TODO(synk): the weighted path (weights is not None) is not implemented.
    assert target.shape == source.shape
    batch_shape = target.shape[:-2]
    n = int(target.shape[-2])
    d = int(target.shape[-1])
    assert d == 3
    b = 1
    for s in batch_shape:
        b *= int(s)

    # Lane-dense layout: (B, 3, N) with the point axis N on lanes.
    tgt = jnp.swapaxes(target.reshape(b, n, d).astype(jnp.float32), -1, -2)
    src = jnp.swapaxes(source.reshape(b, n, d).astype(jnp.float32), -1, -2)

    # Pick TILE_B so one input tile is <= ~2 MiB; with 2 inputs x 2 pipeline
    # buffers plus elementwise intermediates this stays inside 32 MiB scoped
    # VMEM on all of v5e/v6e/v7x.
    tile_bytes_per_batch = 3 * n * 4
    tile_b = (2 * 1024 * 1024) // tile_bytes_per_batch
    tile_b = int(min(tile_b, 512, _round_up(b, 8)))
    tile_b = max(8, (tile_b // 8) * 8)
    b_pad = _round_up(b, tile_b)
    if b_pad != b:
        pad = ((0, b_pad - b), (0, 0), (0, 0))
        tgt = jnp.pad(tgt, pad)     # zero-padded batches give cov=0; sliced off
        src = jnp.pad(src, pad)

    # TODO(synk): very large point clouds (N >~ 64K) would need an extra
    # N-tiling grid axis with accumulators; here the full N is resident per step.
    packed = pl.pallas_call(
        _svd_reg_kernel,
        out_shape=jax.ShapeDtypeStruct((b_pad, 16), jnp.float32),
        grid=(b_pad // tile_b,),
        in_specs=[
            pl.BlockSpec((tile_b, 3, n), lambda i: (i, 0, 0)),
            pl.BlockSpec((tile_b, 3, n), lambda i: (i, 0, 0)),
        ],
        out_specs=pl.BlockSpec((tile_b, 16), lambda i: (i, 0)),
        compiler_params=pltpu.CompilerParams(
            dimension_semantics=("parallel",),
            vmem_limit_bytes=32 * 1024 * 1024,
        ),
    )(tgt, src)

    packed = packed[:b]
    cov = packed[:, :9].reshape(b, 3, 3)
    mean_t = packed[:, 9:12]                                        # (B, 3)
    mean_s = packed[:, 12:15]                                       # (B, 3)

    # Small per-batch 3x3 SVD and 4x4 assembly in plain JAX (glue).
    u, _, vh = jnp.linalg.svd(cov)
    rot = u @ vh                                                    # (B, 3, 3)
    t = mean_t[..., None] - rot @ mean_s[..., None]                 # (B, 3, 1)

    transformation = jnp.zeros((b, 4, 4), dtype=target.dtype)
    transformation = transformation.at[:, :3, :3].set(rot.astype(target.dtype))
    transformation = transformation.at[:, :3, 3:].set(t.astype(target.dtype))
    transformation = transformation.at[:, 3, 3].set(jnp.asarray(1, target.dtype))
    return transformation.reshape(*batch_shape, 4, 4)


def _reference(target, source):
    """Pure-JAX reference of the PyTorch forward (weights=None)."""
    nan_t = jnp.isnan(target)
    nan_s = jnp.isnan(source)
    isnan = nan_t | nan_s
    mean_s = jnp.nanmean(source, axis=-2, keepdims=True)
    mean_t = jnp.nanmean(target, axis=-2, keepdims=True)
    xyz_tc = jnp.where(isnan, 0.0, target - mean_t)
    xyz_sc = jnp.where(isnan, 0.0, source - mean_s)
    cov = jnp.einsum("...ni,...nj->...ij", xyz_tc, xyz_sc,
                     precision=jax.lax.Precision.HIGHEST)
    u, s, vh = jnp.linalg.svd(cov)
    rot = u @ vh
    t = jnp.swapaxes(mean_t, -1, -2) - rot @ jnp.swapaxes(mean_s, -1, -2)
    shape = list(target.shape)
    shape[-2:] = [4, 4]
    out = jnp.zeros(shape, dtype=target.dtype)
    out = out.at[..., :3, :3].set(rot)
    out = out.at[..., :3, 3:].set(t)
    out = out.at[..., 3, 3].set(1.0)
    return out


def _make_case(key, B, N, nan_spots):
    k1, k2 = jax.random.split(key)
    source = jax.random.normal(k1, (B, N, 3), dtype=jnp.float32)
    angle = 0.3
    c, s = jnp.cos(angle), jnp.sin(angle)
    R_true = jnp.array([[c, -s, 0.0], [s, c, 0.0], [0.0, 0.0, 1.0]],
                       dtype=jnp.float32)
    t_true = jnp.array([0.5, -0.25, 1.0], dtype=jnp.float32)
    target = source @ R_true.T + t_true
    target = target + 0.01 * jax.random.normal(k2, (B, N, 3), dtype=jnp.float32)
    # Inject a few NaNs to exercise the NaN-handling path.
    for which, bi, ni, di in nan_spots:
        if which == "s":
            source = source.at[bi, ni, di].set(jnp.nan)
        else:
            target = target.at[bi, ni, di].set(jnp.nan)
    return target, source


if __name__ == "__main__":
    key = jax.random.PRNGKey(0)
    k1, k2 = jax.random.split(key)

    cases = [
        _make_case(k1, 2, 16, [("s", 0, 3, 1), ("t", 1, 7, 0)]),
        _make_case(k2, 5, 64, [("s", 2, 10, 2), ("t", 4, 0, 1), ("s", 0, 5, 0)]),
    ]

    for target, source in cases:
        out = jax.block_until_ready(svd_registration(target, source))
        ref = jax.block_until_ready(_reference(target, source))
        B = target.shape[0]
        assert out.shape == (B, 4, 4)
        assert bool(jnp.all(jnp.isfinite(out)))
        # Covariances are full-rank and well-conditioned here, so the SVD-based
        # rotations can be compared directly.
        assert bool(jnp.allclose(out, ref, atol=1e-4, rtol=1e-4))

    print("KERNEL_OK")
</pallas_src>

<mosaic_0001>
module attributes {stable_mosaic.version = 11 : i64} {
  func.func @_svd_reg_kernel(%arg0: i32, %arg1: memref<8x3x16xf32, #tpu.memory_space<vmem>>, %arg2: memref<8x3x16xf32, #tpu.memory_space<vmem>>, %arg3: memref<8x16xf32, #tpu.memory_space<vmem>>) attributes {dimension_semantics = [#tpu.dimension_semantics<parallel>], iteration_bounds = array<i64: 1>, scalar_prefetch = 0 : i64, scratch_operands = 0 : i64, tpu.core_type = #tpu.core_type<tc>, window_params = [{transform_indices = @transform_0, window_bounds = array<i64: 8, 3, 16>}, {transform_indices = @transform_1, window_bounds = array<i64: 8, 3, 16>}, {transform_indices = @transform_2, window_bounds = array<i64: 8, 16>}]} {
    %c0 = arith.constant 0 : index
    %c0_0 = arith.constant 0 : index
    %c0_1 = arith.constant 0 : index
    %0 = vector.load %arg1[%c0, %c0_0, %c0_1] : memref<8x3x16xf32, #tpu.memory_space<vmem>>, vector<8x3x16xf32>
    %c0_2 = arith.constant 0 : index
    %c0_3 = arith.constant 0 : index
    %c0_4 = arith.constant 0 : index
    %1 = vector.load %arg2[%c0_2, %c0_3, %c0_4] : memref<8x3x16xf32, #tpu.memory_space<vmem>>, vector<8x3x16xf32>
    %2 = arith.cmpf one, %0, %0 : vector<8x3x16xf32>
    %3 = arith.cmpf one, %1, %1 : vector<8x3x16xf32>
    %4 = arith.ori %2, %3 : vector<8x3x16xi1>
    %cst = arith.constant 0.000000e+00 : f32
    %5 = vector.broadcast %cst : f32 to vector<8x3x16xf32>
    %6 = arith.select %3, %5, %1 : vector<8x3x16xi1>, vector<8x3x16xf32>
    %cst_5 = arith.constant 0.000000e+00 : f32
    %7 = vector.broadcast %cst_5 : f32 to vector<8x3x16xf32>
    %8 = arith.select %2, %7, %0 : vector<8x3x16xi1>, vector<8x3x16xf32>
    %9 = arith.extui %3 : vector<8x3x16xi1> to vector<8x3x16xi32>
    %10 = arith.sitofp %9 : vector<8x3x16xi32> to vector<8x3x16xf32>
    %cst_6 = arith.constant dense<0.000000e+00> : vector<8x3xf32>
    %11 = vector.multi_reduction <add>, %10, %cst_6 [2] : vector<8x3x16xf32> to vector<8x3xf32>
    %12 = vector.shape_cast %11 : vector<8x3xf32> to vector<8x3x1xf32>
    %cst_7 = arith.constant 1.600000e+01 : f32
    %13 = vector.broadcast %cst_7 : f32 to vector<8x3x1xf32>
    %14 = arith.subf %13, %12 : vector<8x3x1xf32>
    %15 = arith.extui %2 : vector<8x3x16xi1> to vector<8x3x16xi32>
    %16 = arith.sitofp %15 : vector<8x3x16xi32> to vector<8x3x16xf32>
    %cst_8 = arith.constant dense<0.000000e+00> : vector<8x3xf32>
    %17 = vector.multi_reduction <add>, %16, %cst_8 [2] : vector<8x3x16xf32> to vector<8x3xf32>
    %18 = vector.shape_cast %17 : vector<8x3xf32> to vector<8x3x1xf32>
    %cst_9 = arith.constant 1.600000e+01 : f32
    %19 = vector.broadcast %cst_9 : f32 to vector<8x3x1xf32>
    %20 = arith.subf %19, %18 : vector<8x3x1xf32>
    %cst_10 = arith.constant dense<0.000000e+00> : vector<8x3xf32>
    %21 = vector.multi_reduction <add>, %6, %cst_10 [2] : vector<8x3x16xf32> to vector<8x3xf32>
    %22 = vector.shape_cast %21 : vector<8x3xf32> to vector<8x3x1xf32>
    %23 = arith.divf %22, %14 : vector<8x3x1xf32>
    %cst_11 = arith.constant dense<0.000000e+00> : vector<8x3xf32>
    %24 = vector.multi_reduction <add>, %8, %cst_11 [2] : vector<8x3x16xf32> to vector<8x3xf32>
    %25 = vector.shape_cast %24 : vector<8x3xf32> to vector<8x3x1xf32>
    %26 = arith.divf %25, %20 : vector<8x3x1xf32>
    %27 = vector.extract_strided_slice %4 {offsets = [0, 0, 0], sizes = [8, 1, 16], strides = [1, 1, 1]} : vector<8x3x16xi1> to vector<8x1x16xi1>
    %28 = vector.shape_cast %27 : vector<8x1x16xi1> to vector<8x16xi1>
    %29 = vector.extract_strided_slice %26 {offsets = [0, 0, 0], sizes = [8, 1, 1], strides = [1, 1, 1]} : vector<8x3x1xf32> to vector<8x1x1xf32>
    %30 = vector.shape_cast %29 : vector<8x1x1xf32> to vector<8x1xf32>
    %31 = vector.extract_strided_slice %23 {offsets = [0, 0, 0], sizes = [8, 1, 1], strides = [1, 1, 1]} : vector<8x3x1xf32> to vector<8x1x1xf32>
    %32 = vector.shape_cast %31 : vector<8x1x1xf32> to vector<8x1xf32>
    %33 = vector.extract_strided_slice %0 {offsets = [0, 0, 0], sizes = [8, 1, 16], strides = [1, 1, 1]} : vector<8x3x16xf32> to vector<8x1x16xf32>
    %34 = vector.shape_cast %33 : vector<8x1x16xf32> to vector<8x16xf32>
    %35 = vector.broadcast %30 : vector<8x1xf32> to vector<8x16xf32>
    %36 = arith.subf %34, %35 : vector<8x16xf32>
    %cst_12 = arith.constant 0.000000e+00 : f32
    %37 = vector.broadcast %cst_12 : f32 to vector<8x16xf32>
    %38 = arith.select %28, %37, %36 : vector<8x16xi1>, vector<8x16xf32>
    %39 = vector.extract_strided_slice %1 {offsets = [0, 0, 0], sizes = [8, 1, 16], strides = [1, 1, 1]} : vector<8x3x16xf32> to vector<8x1x16xf32>
    %40 = vector.shape_cast %39 : vector<8x1x16xf32> to vector<8x16xf32>
    %41 = vector.broadcast %32 : vector<8x1xf32> to vector<8x16xf32>
    %42 = arith.subf %40, %41 : vector<8x16xf32>
    %cst_13 = arith.constant 0.000000e+00 : f32
    %43 = vector.broadcast %cst_13 : f32 to vector<8x16xf32>
    %44 = arith.select %28, %43, %42 : vector<8x16xi1>, vector<8x16xf32>
    %45 = vector.extract_strided_slice %4 {offsets = [0, 1, 0], sizes = [8, 1, 16], strides = [1, 1, 1]} : vector<8x3x16xi1> to vector<8x1x16xi1>
    %46 = vector.shape_cast %45 : vector<8x1x16xi1> to vector<8x16xi1>
    %47 = vector.extract_strided_slice %26 {offsets = [0, 1, 0], sizes = [8, 1, 1], strides = [1, 1, 1]} : vector<8x3x1xf32> to vector<8x1x1xf32>
    %48 = vector.shape_cast %47 : vector<8x1x1xf32> to vector<8x1xf32>
    %49 = vector.extract_strided_slice %23 {offsets = [0, 1, 0], sizes = [8, 1, 1], strides = [1, 1, 1]} : vector<8x3x1xf32> to vector<8x1x1xf32>
    %50 = vector.shape_cast %49 : vector<8x1x1xf32> to vector<8x1xf32>
    %51 = vector.extract_strided_slice %0 {offsets = [0, 1, 0], sizes = [8, 1, 16], strides = [1, 1, 1]} : vector<8x3x16xf32> to vector<8x1x16xf32>
    %52 = vector.shape_cast %51 : vector<8x1x16xf32> to vector<8x16xf32>
    %53 = vector.broadcast %48 : vector<8x1xf32> to vector<8x16xf32>
    %54 = arith.subf %52, %53 : vector<8x16xf32>
    %cst_14 = arith.constant 0.000000e+00 : f32
    %55 = vector.broadcast %cst_14 : f32 to vector<8x16xf32>
    %56 = arith.select %46, %55, %54 : vector<8x16xi1>, vector<8x16xf32>
    %57 = vector.extract_strided_slice %1 {offsets = [0, 1, 0], sizes = [8, 1, 16], strides = [1, 1, 1]} : vector<8x3x16xf32> to vector<8x1x16xf32>
    %58 = vector.shape_cast %57 : vector<8x1x16xf32> to vector<8x16xf32>
    %59 = vector.broadcast %50 : vector<8x1xf32> to vector<8x16xf32>
    %60 = arith.subf %58, %59 : vector<8x16xf32>
    %cst_15 = arith.constant 0.000000e+00 : f32
    %61 = vector.broadcast %cst_15 : f32 to vector<8x16xf32>
    %62 = arith.select %46, %61, %60 : vector<8x16xi1>, vector<8x16xf32>
    %63 = vector.extract_strided_slice %4 {offsets = [0, 2, 0], sizes = [8, 1, 16], strides = [1, 1, 1]} : vector<8x3x16xi1> to vector<8x1x16xi1>
    %64 = vector.shape_cast %63 : vector<8x1x16xi1> to vector<8x16xi1>
    %65 = vector.extract_strided_slice %26 {offsets = [0, 2, 0], sizes = [8, 1, 1], strides = [1, 1, 1]} : vector<8x3x1xf32> to vector<8x1x1xf32>
    %66 = vector.shape_cast %65 : vector<8x1x1xf32> to vector<8x1xf32>
    %67 = vector.extract_strided_slice %23 {offsets = [0, 2, 0], sizes = [8, 1, 1], strides = [1, 1, 1]} : vector<8x3x1xf32> to vector<8x1x1xf32>
    %68 = vector.shape_cast %67 : vector<8x1x1xf32> to vector<8x1xf32>
    %69 = vector.extract_strided_slice %0 {offsets = [0, 2, 0], sizes = [8, 1, 16], strides = [1, 1, 1]} : vector<8x3x16xf32> to vector<8x1x16xf32>
    %70 = vector.shape_cast %69 : vector<8x1x16xf32> to vector<8x16xf32>
    %71 = vector.broadcast %66 : vector<8x1xf32> to vector<8x16xf32>
    %72 = arith.subf %70, %71 : vector<8x16xf32>
    %cst_16 = arith.constant 0.000000e+00 : f32
    %73 = vector.broadcast %cst_16 : f32 to vector<8x16xf32>
    %74 = arith.select %64, %73, %72 : vector<8x16xi1>, vector<8x16xf32>
    %75 = vector.extract_strided_slice %1 {offsets = [0, 2, 0], sizes = [8, 1, 16], strides = [1, 1, 1]} : vector<8x3x16xf32> to vector<8x1x16xf32>
    %76 = vector.shape_cast %75 : vector<8x1x16xf32> to vector<8x16xf32>
    %77 = vector.broadcast %68 : vector<8x1xf32> to vector<8x16xf32>
    %78 = arith.subf %76, %77 : vector<8x16xf32>
    %cst_17 = arith.constant 0.000000e+00 : f32
    %79 = vector.broadcast %cst_17 : f32 to vector<8x16xf32>
    %80 = arith.select %64, %79, %78 : vector<8x16xi1>, vector<8x16xf32>
    %81 = arith.mulf %38, %44 : vector<8x16xf32>
    %cst_18 = arith.constant dense<0.000000e+00> : vector<8xf32>
    %82 = vector.multi_reduction <add>, %81, %cst_18 [1] : vector<8x16xf32> to vector<8xf32>
    %83 = vector.shape_cast %82 : vector<8xf32> to vector<8x1xf32>
    %84 = arith.mulf %38, %62 : vector<8x16xf32>
    %cst_19 = arith.constant dense<0.000000e+00> : vector<8xf32>
    %85 = vector.multi_reduction <add>, %84, %cst_19 [1] : vector<8x16xf32> to vector<8xf32>
    %86 = vector.shape_cast %85 : vector<8xf32> to vector<8x1xf32>
    %87 = arith.mulf %38, %80 : vector<8x16xf32>
    %cst_20 = arith.constant dense<0.000000e+00> : vector<8xf32>
    %88 = vector.multi_reduction <add>, %87, %cst_20 [1] : vector<8x16xf32> to vector<8xf32>
    %89 = vector.shape_cast %88 : vector<8xf32> to vector<8x1xf32>
    %90 = arith.mulf %56, %44 : vector<8x16xf32>
    %cst_21 = arith.constant dense<0.000000e+00> : vector<8xf32>
    %91 = vector.multi_reduction <add>, %90, %cst_21 [1] : vector<8x16xf32> to vector<8xf32>
    %92 = vector.shape_cast %91 : vector<8xf32> to vector<8x1xf32>
    %93 = arith.mulf %56, %62 : vector<8x16xf32>
    %cst_22 = arith.constant dense<0.000000e+00> : vector<8xf32>
    %94 = vector.multi_reduction <add>, %93, %cst_22 [1] : vector<8x16xf32> to vector<8xf32>
    %95 = vector.shape_cast %94 : vector<8xf32> to vector<8x1xf32>
    %96 = arith.mulf %56, %80 : vector<8x16xf32>
    %cst_23 = arith.constant dense<0.000000e+00> : vector<8xf32>
    %97 = vector.multi_reduction <add>, %96, %cst_23 [1] : vector<8x16xf32> to vector<8xf32>
    %98 = vector.shape_cast %97 : vector<8xf32> to vector<8x1xf32>
    %99 = arith.mulf %74, %44 : vector<8x16xf32>
    %cst_24 = arith.constant dense<0.000000e+00> : vector<8xf32>
    %100 = vector.multi_reduction <add>, %99, %cst_24 [1] : vector<8x16xf32> to vector<8xf32>
    %101 = vector.shape_cast %100 : vector<8xf32> to vector<8x1xf32>
    %102 = arith.mulf %74, %62 : vector<8x16xf32>
    %cst_25 = arith.constant dense<0.000000e+00> : vector<8xf32>
    %103 = vector.multi_reduction <add>, %102, %cst_25 [1] : vector<8x16xf32> to vector<8xf32>
    %104 = vector.shape_cast %103 : vector<8xf32> to vector<8x1xf32>
    %105 = arith.mulf %74, %80 : vector<8x16xf32>
    %cst_26 = arith.constant dense<0.000000e+00> : vector<8xf32>
    %106 = vector.multi_reduction <add>, %105, %cst_26 [1] : vector<8x16xf32> to vector<8xf32>
    %107 = vector.shape_cast %106 : vector<8xf32> to vector<8x1xf32>
    %108 = tpu.iota {dimensions = array<i32: 1>} : vector<8x16xi32>
    %cst_27 = arith.constant 0.000000e+00 : f32
    %109 = vector.broadcast %cst_27 : f32 to vector<8x16xf32>
    %c0_i32 = arith.constant 0 : i32
    %110 = vector.broadcast %c0_i32 : i32 to vector<8x16xi32>
    %111 = arith.cmpi eq, %108, %110 : vector<8x16xi32>
    %112 = vector.shape_cast %83 : vector<8x1xf32> to vector<8x1xf32>
    %113 = vector.broadcast %112 : vector<8x1xf32> to vector<8x16xf32>
    %114 = arith.select %111, %113, %109 : vector<8x16xi1>, vector<8x16xf32>
    %c1_i32 = arith.constant 1 : i32
    %115 = vector.broadcast %c1_i32 : i32 to vector<8x16xi32>
    %116 = arith.cmpi eq, %108, %115 : vector<8x16xi32>
    %117 = vector.shape_cast %86 : vector<8x1xf32> to vector<8x1xf32>
    %118 = vector.broadcast %117 : vector<8x1xf32> to vector<8x16xf32>
    %119 = arith.select %116, %118, %114 : vector<8x16xi1>, vector<8x16xf32>
    %c2_i32 = arith.constant 2 : i32
    %120 = vector.broadcast %c2_i32 : i32 to vector<8x16xi32>
    %121 = arith.cmpi eq, %108, %120 : vector<8x16xi32>
    %122 = vector.shape_cast %89 : vector<8x1xf32> to vector<8x1xf32>
    %123 = vector.broadcast %122 : vector<8x1xf32> to vector<8x16xf32>
    %124 = arith.select %121, %123, %119 : vector<8x16xi1>, vector<8x16xf32>
    %c3_i32 = arith.constant 3 : i32
    %125 = vector.broadcast %c3_i32 : i32 to vector<8x16xi32>
    %126 = arith.cmpi eq, %108, %125 : vector<8x16xi32>
    %127 = vector.shape_cast %92 : vector<8x1xf32> to vector<8x1xf32>
    %128 = vector.broadcast %127 : vector<8x1xf32> to vector<8x16xf32>
    %129 = arith.select %126, %128, %124 : vector<8x16xi1>, vector<8x16xf32>
    %c4_i32 = arith.constant 4 : i32
    %130 = vector.broadcast %c4_i32 : i32 to vector<8x16xi32>
    %131 = arith.cmpi eq, %108, %130 : vector<8x16xi32>
    %132 = vector.shape_cast %95 : vector<8x1xf32> to vector<8x1xf32>
    %133 = vector.broadcast %132 : vector<8x1xf32> to vector<8x16xf32>
    %134 = arith.select %131, %133, %129 : vector<8x16xi1>, vector<8x16xf32>
    %c5_i32 = arith.constant 5 : i32
    %135 = vector.broadcast %c5_i32 : i32 to vector<8x16xi32>
    %136 = arith.cmpi eq, %108, %135 : vector<8x16xi32>
    %137 = vector.shape_cast %98 : vector<8x1xf32> to vector<8x1xf32>
    %138 = vector.broadcast %137 : vector<8x1xf32> to vector<8x16xf32>
    %139 = arith.select %136, %138, %134 : vector<8x16xi1>, vector<8x16xf32>
    %c6_i32 = arith.constant 6 : i32
    %140 = vector.broadcast %c6_i32 : i32 to vector<8x16xi32>
    %141 = arith.cmpi eq, %108, %140 : vector<8x16xi32>
    %142 = vector.shape_cast %101 : vector<8x1xf32> to vector<8x1xf32>
    %143 = vector.broadcast %142 : vector<8x1xf32> to vector<8x16xf32>
    %144 = arith.select %141, %143, %139 : vector<8x16xi1>, vector<8x16xf32>
    %c7_i32 = arith.constant 7 : i32
    %145 = vector.broadcast %c7_i32 : i32 to vector<8x16xi32>
    %146 = arith.cmpi eq, %108, %145 : vector<8x16xi32>
    %147 = vector.shape_cast %104 : vector<8x1xf32> to vector<8x1xf32>
    %148 = vector.broadcast %147 : vector<8x1xf32> to vector<8x16xf32>
    %149 = arith.select %146, %148, %144 : vector<8x16xi1>, vector<8x16xf32>
    %c8_i32 = arith.constant 8 : i32
    %150 = vector.broadcast %c8_i32 : i32 to vector<8x16xi32>
    %151 = arith.cmpi eq, %108, %150 : vector<8x16xi32>
    %152 = vector.shape_cast %107 : vector<8x1xf32> to vector<8x1xf32>
    %153 = vector.broadcast %152 : vector<8x1xf32> to vector<8x16xf32>
    %154 = arith.select %151, %153, %149 : vector<8x16xi1>, vector<8x16xf32>
    %c9_i32 = arith.constant 9 : i32
    %155 = vector.broadcast %c9_i32 : i32 to vector<8x16xi32>
    %156 = arith.cmpi eq, %108, %155 : vector<8x16xi32>
    %157 = vector.shape_cast %30 : vector<8x1xf32> to vector<8x1xf32>
    %158 = vector.broadcast %157 : vector<8x1xf32> to vector<8x16xf32>
    %159 = arith.select %156, %158, %154 : vector<8x16xi1>, vector<8x16xf32>
    %c10_i32 = arith.constant 10 : i32
    %160 = vector.broadcast %c10_i32 : i32 to vector<8x16xi32>
    %161 = arith.cmpi eq, %108, %160 : vector<8x16xi32>
    %162 = vector.shape_cast %48 : vector<8x1xf32> to vector<8x1xf32>
    %163 = vector.broadcast %162 : vector<8x1xf32> to vector<8x16xf32>
    %164 = arith.select %161, %163, %159 : vector<8x16xi1>, vector<8x16xf32>
    %c11_i32 = arith.constant 11 : i32
    %165 = vector.broadcast %c11_i32 : i32 to vector<8x16xi32>
    %166 = arith.cmpi eq, %108, %165 : vector<8x16xi32>
    %167 = vector.shape_cast %66 : vector<8x1xf32> to vector<8x1xf32>
    %168 = vector.broadcast %167 : vector<8x1xf32> to vector<8x16xf32>
    %169 = arith.select %166, %168, %164 : vector<8x16xi1>, vector<8x16xf32>
    %c12_i32 = arith.constant 12 : i32
    %170 = vector.broadcast %c12_i32 : i32 to vector<8x16xi32>
    %171 = arith.cmpi eq, %108, %170 : vector<8x16xi32>
    %172 = vector.shape_cast %32 : vector<8x1xf32> to vector<8x1xf32>
    %173 = vector.broadcast %172 : vector<8x1xf32> to vector<8x16xf32>
    %174 = arith.select %171, %173, %169 : vector<8x16xi1>, vector<8x16xf32>
    %c13_i32 = arith.constant 13 : i32
    %175 = vector.broadcast %c13_i32 : i32 to vector<8x16xi32>
    %176 = arith.cmpi eq, %108, %175 : vector<8x16xi32>
    %177 = vector.shape_cast %50 : vector<8x1xf32> to vector<8x1xf32>
    %178 = vector.broadcast %177 : vector<8x1xf32> to vector<8x16xf32>
    %179 = arith.select %176, %178, %174 : vector<8x16xi1>, vector<8x16xf32>
    %c14_i32 = arith.constant 14 : i32
    %180 = vector.broadcast %c14_i32 : i32 to vector<8x16xi32>
    %181 = arith.cmpi eq, %108, %180 : vector<8x16xi32>
    %182 = vector.shape_cast %68 : vector<8x1xf32> to vector<8x1xf32>
    %183 = vector.broadcast %182 : vector<8x1xf32> to vector<8x16xf32>
    %184 = arith.select %181, %183, %179 : vector<8x16xi1>, vector<8x16xf32>
    %c0_28 = arith.constant 0 : index
    %c0_29 = arith.constant 0 : index
    %185 = vector.load %arg3[%c0_28, %c0_29] : memref<8x16xf32, #tpu.memory_space<vmem>>, vector<8x16xf32>
    tpu.vector_store %arg3[%c0_28, %c0_29], %184 {strides = array<i32>} : memref<8x16xf32, #tpu.memory_space<vmem>>, vector<8x16xf32>,
    return
  }
  func.func @transform_0(%arg0: i32) -> (i32, i32, i32) {
    %c0_i32 = arith.constant 0 : i32
    %c0_i32_0 = arith.constant 0 : i32
    %c0_i32_1 = arith.constant 0 : i32
    return %arg0, %c0_i32, %c0_i32_0 : i32, i32, i32
  }
  func.func @transform_1(%arg0: i32) -> (i32, i32, i32) {
    %c0_i32 = arith.constant 0 : i32
    %c0_i32_0 = arith.constant 0 : i32
    %c0_i32_1 = arith.constant 0 : i32
    return %arg0, %c0_i32, %c0_i32_0 : i32, i32, i32
  }
  func.func @transform_2(%arg0: i32) -> (i32, i32) {
    %c0_i32 = arith.constant 0 : i32
    %c0_i32_0 = arith.constant 0 : i32
    return %arg0, %c0_i32 : i32, i32
  }
}

</mosaic_0001>

<bundles_post_ra>
// kernel: custom-call.57
= control target key start
LH: loop header
LB: loop body
LE: loop exit
PB: predicated region body
PF: predicated region fallthrough
CT: control target
= control target key end

     0   :  { %s724_s9 = smov 0   ;;  %s726_s10 = smov 0   ;;  %s903_s0 = inlined_call_operand.vmem [shape: f32[2,6,3], index: 0, kind: input, shape index: {}]   ;;  %s904_s1 = inlined_call_operand.vmem [shape: f32[2,6,3], index: 1, kind: output, shape index: {0}]   ;;  %s905_s2 = inlined_call_operand.vmem [shape: f32[2,3], index: 2, kind: output, shape index: {1}]  }
   0x1   :  { %s728_s11 = smov 0   ;;  %s730_s12 = smov 0  }
   0x2   :  { %s732_s13 = smov 0  }
   0x3 LB: > { %s28_s14 = sadd.s32 1, %s697_s12  ;;  %s579_s15 = sadd.s32 4294967295, %s701_s13   ;;  %s701_s13 = sphi %s732_s13, %s9_s13   ;;  %s697_s12 = sphi %s730_s12, %s914_s12   ;;  %s693_s11 = sphi %s728_s11, %s913_s11   ;;  %s689_s10 = sphi %s726_s10, %s912_s10   ;;  %s685_s9 = sphi %s724_s9, %s911_s9  }
   0x4   : > { %p30_p0 = scmp.ge.s32.totalorder %s28_s14, 2  ;;  %s33_s16 = ssub.s32 0, %s697_s12 }
   0x5   : > { %s581_s17 = smin.u32 %s697_s12, %s33_s16  ;;  %p57_p1 = scmp.ne.s32.totalorder %s689_s10, %s685_s9 }
   0x6   : > { %s916_s14 = smov (%p30_p0, %s28_s14), 0  ;;  %s35_s18 = sshrl.u32 %s581_s17, 3 }
   0x7   : > { %s39_s19 = ssub.s32 0, %s916_s14  ;;  %p58_p2 = scmp.eq.s32.totalorder %s579_s15, 1 }
   0x8   : > { %s582_s20 = smin.u32 %s39_s19, %s916_s14  ;;  %s47_s24 = sadd.s32 1, %s689_s10 }
   0x9   : > { %s41_s21 = sshrl.u32 %s582_s20, 3  ;;  %p759_p3 = por %p58_p2, %p57_p1 }
   0xa   : > { %s44_s23 = ssub.s32 %s35_s18, %s41_s21  ;;  %p584_p5 = scmp.ge.s32.totalorder %s701_s13, 2 }
   0xb   : > { %p45_p4 = scmp.eq.s32.totalorder %s44_s23, 0  ;;  %s82_s26 = sand.u32 (!%p584_p5), 1, %s701_s13  }
   0xc   : > { %80 = sbr.rel (%p584_p5) target bundleno = 19 (0x13), region = 16  ;;  %s586_s27 = sshll.u32 (!%p584_p5), %s697_s12, 3 }
   0xd   : > { %s765_s25 = scalar_select %p45_p4, %s689_s10, %s47_s24  }
   0xe   : > { %s585_s28 = sshll.u32 (!%p584_p5), %s82_s26, 3  ;;  %s88_s3 = scalar_lea.vmem (!%p584_p5), %s903_s0, %s586_s27 }
   0xf   : > { %s84_s4 = scalar_lea.vmem (!%p584_p5), [#allocation0], %s585_s28 }
  0x11   : > { %v117_v0 = vld [vmem:[%s88_s3] sm:$0xff] }
  0x12   : > { %118 = vst [vmem:[%s84_s4] sm:$0xff] %v117_v0 }
  0x13 PF: > { %p587_p6 = scmp.ge.s32.totalorder %s701_s13, 1  ;;  %p123_p7 = scmp.lt.s32.totalorder %s701_s13, 3 }
  0x15   : > { %p124_p8 = pnand %p587_p6, %p123_p7 }
  0x17   : > { %127 = sbr.rel (%p124_p8) target bundleno = 326 (0x146), region = 54 }
  0x1c   : > { %s130_s5 = sand.u32 1, %s579_s15   ;;  %s144_s6 = sand.u32 1, %s685_s9   ;;  %v707_v2 = vmov 0.0  }
  0x1d   : > { %s588_s7 = sshll.u32 %s130_s5, 3  ;;  %s776_s8 = sshll.u32 %s144_s6, 1 }
  0x1e   : > { %s153_s16 = sand.u32 7, %s693_s11   ;;  %s132_s17 = scalar_lea.vmem [#allocation0], %s588_s7 }
  0x1f   : > { %v155_v1 = vld [vmem:[%s132_s17] sm:$0xff]  ;;  %s779_s18 = scalar_lea.vmem [#allocation1], %s588_s7  ;;  %s782_s19 = scalar_lea.vmem [#allocation2], %s153_s16 }
  0x20   : > { %156 = vst [vmem:[%s779_s18] sm:$0xff] %v155_v1  ;;  %s146_s15 = scalar_lea.vmem [#allocation3], %s776_s8  ;;  %s786_s20 = smov 0  }
  0x21   : > { %157 = vst [vmem:[%s782_s19] sm:$0x1] %v707_v2 }
  0x22 LB: >> { %v165_v3 = vlaneseq  ;;  %v795_v5 = vstv %s705_s20  ;;  %s197_s9 = scalar_lea.vmem %s779_s18, %s705_s20 [#allocation1]  ;;  %s325_s21 = scalar_lea.vmem [#allocation4], %s705_s20  ;;  %s705_s20 = sphi %s786_s20, %s163_s20  }
  0x23   : >> { %s342_s23 = smov [#allocation4] }
  0x24   : >> { %v792_v4 = vshrl.u32 %v165_v3, 7 }
  0x26   : >> { %vm169_vm0 = vcmp.gt.s32.totalorder %v792_v4, %v795_v5  ;;  %vm170_vm1 = vcmp.lt.s32.totalorder %v792_v4, 6  ;;  %v293_v4 = vmov %v792_v4 }
  0x27   : >> { %v164_v6 = vld [vmem:[%s779_s18] sm:$0xff]  ;;  %vm171_vm2 = vmand %vm169_vm0, %vm170_vm1  ;;  %v807_v19 = vld [vmem:[%s197_s9] ss:$0 sm:$0xff]  ;;  %vm297_vm13 = vcmp.gt.s32.totalorder %v293_v4, %v795_v5  ;;  %vm298_vm14 = vcmp.lt.s32.totalorder %v293_v4, 6  ;;  %s290_s18 = smov %s779_s18  ;;  %v345_v4 = vmov %v792_v4 }
  0x28   : >> { %v172_v7 = vsel %vm171_vm2, %v164_v6, 0.0  ;;  %v199_v22 = vand.u32 2147483647, %v807_v19  ;;  %vm268_vm12 = vcmp.lt.f32.partialorder %v807_v19, 0.0 }
  0x29   : >> { %v173_v8 = vmul.f32 %v172_v7, %v172_v7 }
  0x2a   : >> { %v200_v26 = vmax.f32 %v199_v22, 0.0 }
  0x2b   : >> { %v174_v9 = vrot.slane %v173_v8, 4 }
  0x2d   : >> { %v175_v10 = vadd.f32 %v174_v9, %v173_v8 }
  0x2f   : >> { %v176_v11 = vrot.slane %v175_v10, 2 }
  0x31   : >> { %v177_v12 = vadd.f32 %v176_v11, %v175_v10 }
  0x33   : >> { %v178_v13 = vrot.slane %v177_v12, 1 }
  0x35   : >> { %v801_v14 = vadd.f32 %v178_v13, %v177_v12 }
  0x37   : >> { %649 = vrsqrt.f32 %v801_v14  ;;  %vm187_vm3 = vcmp.eq.f32.partialorder %v801_v14, inf  ;;  %v190_v23 = vand.u32 2147483648, %v801_v14  ;;  %vm189_vm4 = vcmp.eq.f32.partialorder %v801_v14, 0.0 }
  0x3d   : >> { %v650_v15 = vpop.eup %649 }
  0x3e   : >> { %v181_v16 = vmul.f32 %v650_v15, %v801_v14 }
  0x40   : >> { %v182_v17 = vmul.f32 %v650_v15, %v181_v16 }
  0x42   : >> { %v183_v18 = vmul.f32 0.5, %v182_v17  ;;  %v294_v17 = vld [vmem:[%s290_s18] sm:$0xff]  ;;  %s341_s18 = smov %s779_s18 }
  0x44   : >> { %v184_v20 = vsub.f32 1.5, %v183_v18 }
  0x46   : >> { %v185_v21 = vmul.f32 %v650_v15, %v184_v20 }
  0x48   : >> { %v186_v24 = vmul.f32 %v185_v21, %v801_v14  ;;  %v319_v21 = vand.u32 127, %v165_v3 }
  0x4a   : >> { %v188_v25 = vsel %vm187_vm3, %v801_v14, %v186_v24 }
  0x4b   : >> { %v191_v27 = vsel %vm189_vm4, %v190_v23, %v188_v25 }
  0x4c   : >> { %v201_v28 = vand.u32 2147483647, %v191_v27 }
  0x4e   : >> { %v202_v29 = vmax.f32 %v200_v26, %v201_v28 }
  0x50   : >> { %651 = vrcp.f32 %v202_v29  ;;  %v214_v32 = vand.u32 2147483648, %v202_v29  ;;  %vm208_vm5 = vweird.f32 %v202_v29  ;;  %v212_v34 = vand.u32 2147483647, %v202_v29 }
  0x51   : >> { %vm253_vm11 = vcmp.eq.f32.partialorder %v202_v29, 0.0 }
  0x52   : >> { %v215_v36 = vor.u32 1.1754944e-38, %v214_v32  ;;  %vm213_vm8 = vcmp.eq.f32.partialorder %v212_v34, 8.507059e+37 }
  0x56   : >> { %v652_v30 = vpop.eup %651 }
  0x57   : >> { %v204_v31 = vmul.f32 %v652_v30, %v202_v29  ;;  %vm209_vm6 = vweird.f32 %v652_v30 }
  0x58   : >> { %vm210_vm7 = vmor %vm208_vm5, %vm209_vm6 }
  0x59   : >> { %v205_v33 = vsub.f32 1.0, %v204_v31  ;;  %vm299_vm5 = vmand %vm297_vm13, %vm298_vm14 }
  0x5a   : >> { %v300_v25 = vsel %vm299_vm5, %v294_v17, 0.0 }
  0x5b   : >> { %v206_v35 = vmul.f32 %v652_v30, %v205_v33 }
  0x5d   : >> { %v207_v37 = vadd.f32 %v652_v30, %v206_v35 }
  0x5f   : >> { %v211_v38 = vsel %vm210_vm7, %v652_v30, %v207_v37  ;;  %v338_v37 = vld [vmem:[%s782_s19] ss:$0 sm:$0xff] }
  0x60   : >> { %v216_v39 = vsel %vm213_vm8, %v215_v36, %v211_v38  ;;  %v708_v36 = vmov 1.0   ;;  %v348_v38 = vld [vmem:[%s341_s18] sm:$0xff]  ;;  %s358_s18 = smov %s341_s18 }
  0x61   : >> { %v217_v40 = vmul.f32 %v216_v39, %v199_v22  ;;  %v233_v41 = vmul.f32 0.0, %v216_v39  ;;  %v250_v42 = vmul.f32 %v216_v39, %v201_v28  ;;  %s383_s24 = scalar_lea.vmem %s358_s18, %s705_s20  ;;  %s163_s20 = sadd.s32 1, %s705_s20  }
  0x62   : >> { %p160_p9 = scmp.ge.s32.totalorder %s163_s20, 3  }
  0x63   : >> { %v218_v43 = vmul.f32 %v217_v40, %v217_v40  ;;  %v234_v44 = vmul.f32 %v233_v41, %v233_v41  ;;  %v251_v45 = vmul.f32 %v250_v42, %v250_v42  ;;  %s594_s26 = sshll.u32 (%p160_p9), %s693_s11, 3 }
  0x64   : > { %s408_s29 = scalar_lea.vmem (%p160_p9), %s904_s1, %s594_s26 }
  0x65   : >> { %v235_v46 = vadd.f32 %v234_v44, %v218_v43 }
  0x67   : >> { %v252_v47 = vadd.f32 %v251_v45, %v235_v46 }
  0x69   : >> { %653 = vrsqrt.f32 %v252_v47  ;;  %vm261_vm9 = vcmp.eq.f32.partialorder %v252_v47, inf  ;;  %v264_v54 = vand.u32 2147483648, %v252_v47  ;;  %vm263_vm10 = vcmp.eq.f32.partialorder %v252_v47, 0.0 }
  0x6f   : >> { %v654_v48 = vpop.eup %653 }
  0x70   : >> { %v255_v49 = vmul.f32 %v654_v48, %v252_v47 }
  0x72   : >> { %v256_v50 = vmul.f32 %v654_v48, %v255_v49 }
  0x74   : >> { %v257_v51 = vmul.f32 0.5, %v256_v50 }
  0x76   : >> { %v258_v52 = vsub.f32 1.5, %v257_v51  ;;  %v369_v51 = vld [vmem:[%s358_s18] sm:$0xff] }
  0x78   : >> { %v259_v53 = vmul.f32 %v654_v48, %v258_v52 }
  0x7a   : >> { %v260_v55 = vmul.f32 %v259_v53, %v252_v47 }
  0x7c   : >> { %v262_v56 = vsel %vm261_vm9, %v252_v47, %v260_v55  ;;  %vm840_vm9 = vcmp.eq.s32.totalorder %v319_v21, %v795_v5 }
  0x7d   : >> { %v265_v57 = vsel %vm263_vm10, %v264_v54, %v262_v56  ;;  %vm350_vm10 = vcmp.lt.s32.totalorder %v345_v4, 6  ;;  %v362_v4 = vmov %v792_v4 }
  0x7e   : >> { %v266_v58 = vmul.f32 %v265_v57, %v202_v29 }
  0x80   : >> { %v267_v59 = vsel %vm253_vm11, 0.0, %v266_v58  ;;  %vm371_vm11 = vcmp.gt.s32.totalorder %v319_v21, %v795_v5 }
  0x81   : >> { %v269_v60 = vxor.u32 2147483648, %v267_v59 }
  0x83   : >> { %v270_v61 = vsel %vm268_vm12, %v267_v59, %v269_v60 }
  0x84   : >> { %v821_v62 = vsel %vm189_vm4, %v807_v19, %v270_v61  ;;  %655 = vrcp.f32 %v270_v61  ;;  %vm277_vm15 = vweird.f32 %v270_v61  ;;  %v281_v10 = vand.u32 2147483647, %v270_v61 }
  0x85   : >> { %v289_v63 = vsub.f32 %v807_v19, %v821_v62  ;;  %v283_v11 = vand.u32 2147483648, %v270_v61  ;;  %v271_v27 = vsub.f32 %v270_v61, %v807_v19 }
  0x86   : >> { %vm282_vm8 = vcmp.eq.f32.partialorder %v281_v10, 8.507059e+37 }
  0x87   : >> { %657 = vrcp.f32 %v289_v63  ;;  %v312_v8 = vand.u32 2147483648, %v289_v63  ;;  %vm306_vm1 = vweird.f32 %v289_v63  ;;  %v310_v13 = vand.u32 2147483647, %v289_v63 }
  0x88   : >> { %v284_v22 = vor.u32 1.1754944e-38, %v283_v11 }
  0x89   : >> { %v313_v20 = vor.u32 1.1754944e-38, %v312_v8  ;;  %vm311_vm7 = vcmp.eq.f32.partialorder %v310_v13, 8.507059e+37 }
  0x8a   : >> { %v656_v0 = vpop.eup %655 }
  0x8b   : >> { %v273_v1 = vmul.f32 %v656_v0, %v270_v61  ;;  %vm278_vm0 = vweird.f32 %v656_v0 }
  0x8c   : >> { %vm828_vm3 = vmor %vm277_vm15, %vm278_vm0 }
  0x8d   : >> { %v658_v2 = vpop.eup %657  ;;  %v274_v6 = vsub.f32 1.0, %v273_v1 }
  0x8e   : >> { %v302_v7 = vmul.f32 %v658_v2, %v289_v63  ;;  %vm307_vm2 = vweird.f32 %v658_v2 }
  0x8f   : >> { %v275_v9 = vmul.f32 %v656_v0, %v274_v6  ;;  %vm308_vm6 = vmor %vm306_vm1, %vm307_vm2 }
  0x90   : >> { %v303_v12 = vsub.f32 1.0, %v302_v7 }
  0x91   : >> { %v276_v15 = vadd.f32 %v656_v0, %v275_v9 }
  0x92   : >> { %v304_v18 = vmul.f32 %v658_v2, %v303_v12 }
  0x93   : >> { %v280_v24 = vsel %vm828_vm3, %v656_v0, %v276_v15 }
  0x94   : >> { %v305_v23 = vadd.f32 %v658_v2, %v304_v18  ;;  %v285_v29 = vsel %vm282_vm8, %v284_v22, %v280_v24 }
  0x95   : >> { %v286_v32 = vmul.f32 %v285_v29, %v271_v27 }
  0x96   : >> { %v309_v26 = vsel %vm308_vm6, %v658_v2, %v305_v23 }
  0x97   : >> { %v314_v28 = vsel %vm311_vm7, %v313_v20, %v309_v26  ;;  %v288_v19 = vsel %vm189_vm4, 0.0, %v286_v32 }
  0x98   : >> { %v315_v30 = vmul.f32 %v314_v28, %v300_v25  ;;  %v331_v34 = vsel %vm840_vm9, %v288_v19, 0.0 }
  0x9a   : >> { %v316_v31 = vsel %vm189_vm4, 0.0, %v315_v30  ;;  %vm379_vm4 = vcmp.ge.s32.totalorder %v362_v4, %v795_v5 }
  0x9b   : >> { %v321_v33 = vsel %vm840_vm9, %v316_v31, 0.0  ;;  %vm380_vm12 = vmand %vm840_vm9, %vm379_vm4 }
  0x9c   : >> { %322 = vadd.xlane.f32.xlu0 %v321_v33 }
  0xa4   : >> { %332 = vadd.xlane.f32.xlu0 %v331_v34 }
 0x10f   : >> { %v323_v35 = vpop.xlane.xlu0 %322 }
 0x110   : >> { %324 = vst [vmem:[#allocation4] sm:$0xff] %v323_v35 }
 0x111   : >> { %326 = vst [vmem:[%s325_s21] sm:$0x1] %v708_v36 }
 0x117   : >> { %v333_v39 = vpop.xlane.xlu0 %332 }
 0x118   : >> { %v347_v40 = vld [vmem:[%s342_s23] sm:$0xff]  ;;  %v339_v14 = vsel %vm840_vm9, %v333_v39, %v338_v37  ;;  %s359_s23 = smov %s342_s23 }
 0x119   : >> { %v349_v41 = vmul.f32 %v348_v38, %v347_v40  ;;  %340 = vst [vmem:[%s782_s19] sm:$0x1] %v339_v14  ;;  %v367_v50 = vld [vmem:[%s359_s23] sm:$0xff] }
 0x11b   : >> { %v351_v42 = vsel %vm350_vm10, %v349_v41, 0.0 }
 0x11c   : >> { %v352_v43 = vrot.slane %v351_v42, 4 }
 0x11e   : >> { %v353_v44 = vadd.f32 %v352_v43, %v351_v42 }
 0x120   : >> { %v354_v45 = vrot.slane %v353_v44, 2  ;;  %v393_v4 = vld [vmem:[#allocation2] sm:$0x3] (%p160_p9) }
 0x121   : > { %396 = vst [vmem:[%s146_s15] sm:$0x3] (%p160_p9), %v393_v4 }
 0x122   : >> { %v355_v46 = vadd.f32 %v354_v45, %v353_v44 }
 0x124   : >> { %v356_v47 = vrot.slane %v355_v46, 1 }
 0x126   : >> { %v357_v48 = vadd.f32 %v356_v47, %v355_v46 }
 0x128   : >> { %v363_v49 = vmul.f32 %v357_v48, %v333_v39 }
 0x12a   : >> { %v368_v52 = vmul.f32 %v367_v50, %v363_v49 }
 0x12c   : >> { %v372_v53 = vsub.f32 %v369_v51, %v368_v52 }
 0x12e   : >> { %v373_v54 = vsel %vm371_vm11, %v372_v53, %v369_v51 }
 0x12f   : >> { %v381_v55 = vsel %vm380_vm12, %v367_v50, %v373_v54 }
 0x130   : >> { %382 = vst [vmem:[%s358_s18] sm:$0xff] %v381_v55 }
 0x135   : > { %162 = sbr.rel (!%p160_p9) target bundleno = 34 (0x22), region = 175 }
 0x137   : >> { %v384_v56 = vld [vmem:[%s383_s24] ss:$0 sm:$0xff] }
 0x138   : >> { %v389_v57 = vsel %vm840_vm9, %v821_v62, %v384_v56 }
 0x139   : >> { %390 = vst [vmem:[%s383_s24] sm:$0x1] %v389_v57 }
 0x13a   : > { %p445_p10 = scmp.lt.s32.totalorder (%p759_p3), %s693_s11, 0  ;;  %s446_s30 = ssub.s32 (%p759_p3), 0, %s693_s11  ;;  %v469_v58 = vld [vmem:[%s146_s15] sm:$0x3] (%p759_p3) }
 0x13b   : > { %s595_s3 = smin.u32 (%p759_p3), %s693_s11, %s446_s30 }
 0x13c   : > { %s448_s4 = sshrl.u32 (%p759_p3), %s595_s3, 3 }
 0x13d   : > { %444 = sbr.rel (!%p759_p3) target bundleno = 326 (0x146), region = 99  ;;  %s449_s5 = ssub.s32 (%p759_p3), 0, %s448_s4 }
 0x140   : > { %v437_v5 = vld [vmem:[%s779_s18] sm:$0xff] }
 0x141   : > { %438 = vst [vmem:[%s408_s29] sm:$0xff] %v437_v5 }
 0x142   : > { %s918_s5 = smov (!%p445_p10, %s449_s5), %s448_s4 }
 0x143   : > { %s596_s6 = sshll.u32 %s918_s5, 1 }
 0x144   : > { %s452_s17 = scalar_lea.vmem %s905_s2, %s596_s6 }
 0x145   : > { %470 = vst [vmem:[%s452_s17] sm:$0x3] %v469_v58 }
 0x146 PF: > { %s9_s13 = sadd.s32 1, %s701_s13   ;;  %s911_s9 = smov %s689_s10 }
 0x147   : > { %p6_p11 = scmp.ge.s32.totalorder %s9_s13, 4   ;;  %s912_s10 = smov %s765_s25 }
 0x148   : > { %s913_s11 = smov %s697_s12  ;;  %s914_s12 = smov %s916_s14 }
 0x149   :  { %8 = sbr.rel (!%p6_p11) target bundleno = 3 (0x3), region = 186 }

// kernel: custom-call.58
= control target key start
LH: loop header
LB: loop body
LE: loop exit
PB: predicated region body
PF: predicated region fallthrough
CT: control target
= control target key end

     0   :  { %s240_s6 = smov 0   ;;  %s267_s0 = inlined_call_operand.vmem [shape: f32[2,3,3], index: 0, kind: input, shape index: {}]   ;;  %s268_s1 = inlined_call_operand.vmem [shape: f32[2,3,3], index: 1, kind: output, shape index: {}]  }
   0x1 LB: > { %s202_s7 = sadd.s32 4294967295, %s228_s6   ;;  %p204_p0 = scmp.ge.s32.totalorder %s228_s6, 2  ;;  %s228_s6 = sphi %s240_s6, %s7_s6  }
   0x2   : > { %s23_s8 = sand.u32 (!%p204_p0), 1, %s228_s6   ;;  %s206_s9 = sshll.u32 (!%p204_p0), %s228_s6, 2 }
   0x3   : > { %21 = sbr.rel (%p204_p0) target bundleno = 10 (0xa), region = 16  ;;  %s205_s10 = sshll.u32 (!%p204_p0), %s23_s8, 2 }
   0x4   : > { %s27_s13 = scalar_lea.vmem (!%p204_p0), %s267_s0, %s206_s9  ;;  %s25_s14 = scalar_lea.vmem (!%p204_p0), [#allocation1], %s205_s10 }
   0x8   : > { %v44_v0 = vld [vmem:[%s27_s13] sm:$0xf] }
   0x9   : > { %45 = vst [vmem:[%s25_s14] sm:$0xf] %v44_v0 }
   0xa PF: > { %p207_p1 = scmp.ge.s32.totalorder %s228_s6, 1  ;;  %p62_p2 = scmp.lt.s32.totalorder %s228_s6, 3 }
   0xc   : > { %p63_p3 = pnand %p207_p1, %p62_p2 }
   0xd   : > { %s256_s15 = sand.u32 (!%p63_p3), 1, %s202_s7   ;;  %s211_s19 = sshll.u32 (!%p63_p3), %s202_s7, 2 }
   0xe   : > { %66 = sbr.rel (%p63_p3) target bundleno = 285 (0x11d), region = 50  ;;  %s208_s16 = sshll.u32 (!%p63_p3), %s256_s15, 2 }
   0xf   : > { %s75_s17 = scalar_lea.vmem (!%p63_p3), [#allocation1], %s208_s16  ;;  %s79_s18 = scalar_lea.vmem (!%p63_p3), [#allocation3], %s208_s16 }
  0x10   : > { %s130_s22 = scalar_lea.vmem (!%p63_p3), %s268_s1, %s211_s19 }
  0x13   : > { %v84_v1 = vlaneseq  ;;  %v82_v2 = vld [vmem:[%s75_s17] sm:$0xf]  ;;  %vm98_vm1 = vcmask 23552  }
  0x14   : > { %83 = vst [vmem:[#allocation0] sm:$0xf] %v82_v2 }
  0x15   : > { %v85_v3 = vand.u32 127, %v84_v1  ;;  %v87_v4 = vshrl.u32 %v84_v1, 7 }
  0x17   : > { %vm93_vm0 = vcmp.eq.s32.totalorder %v85_v3, 0  ;;  %vm89_vm2 = vcmp.eq.s32.totalorder %v85_v3, %v87_v4  ;;  %vm102_vm3 = vcmp.eq.s32.totalorder %v85_v3, 1  ;;  %vm113_vm4 = vcmp.eq.s32.totalorder %v85_v3, 2 }
  0x1b   : > { %v90_v5 = vld [vmem:[#allocation0] sm:$0xff] }
  0x1c   : > { %v97_v6 = vld [vmem:[#allocation0 + $0x1] ss:$0 sm:$0xff]  ;;  %v94_v7 = vsel %vm93_vm0, %v90_v5, 1.0  ;;  %v108_v11 = vld [vmem:[#allocation0 + $0x2] ss:$0 sm:$0xff] }
  0x1d   : > { %v99_v8 = vsel %vm98_vm1, %v97_v6, 0.0  ;;  %v95_v9 = vsel %vm89_vm2, %v94_v7, 0.0  ;;  %v110_v12 = vsel %vm98_vm1, %v108_v11, 0.0 }
  0x1e   : > { %v103_v10 = vmul.f32 %v99_v8, %v95_v9 }
  0x20   : > { %104 = vadd.xlane.f32.xlu0 %v103_v10 }
  0x93   : > { %v105_v13 = vpop.xlane.xlu0 %104 }
  0x94   : > { %v106_v14 = vsel %vm102_vm3, %v105_v13, %v95_v9 }
  0x95   : > { %v114_v15 = vmul.f32 %v110_v12, %v106_v14 }
  0x97   : > { %115 = vadd.xlane.f32.xlu0 %v114_v15 }
 0x10a   : > { %v116_v16 = vpop.xlane.xlu0 %115 }
 0x10b   : > { %v117_v17 = vsel %vm113_vm4, %v116_v16, %v106_v14 }
 0x10c   : > { %118 = vst [vmem:[#allocation2] sm:$0xff] %v117_v17 }
 0x113   : > { %v121_v18 = vld [vmem:[#allocation2] sm:$0xf] }
 0x114   : > { %124 = vst [vmem:[%s79_s18] sm:$0xf] %v121_v18 }
 0x11b   : > { %v147_v19 = vld [vmem:[%s79_s18] sm:$0xf] }
 0x11c   : > { %148 = vst [vmem:[%s130_s22] sm:$0xf] %v147_v19 }
 0x11d PF: > { %s7_s6 = sadd.s32 1, %s228_s6  }
 0x11e   : > { %p4_p4 = scmp.ge.s32.totalorder %s7_s6, 4  }
 0x120   :  { %6 = sbr.rel (!%p4_p4) target bundleno = 1 (0x1), region = 112 }

// kernel: custom-call.50
= control target key start
LH: loop header
LB: loop body
LE: loop exit
PB: predicated region body
PF: predicated region fallthrough
CT: control target
= control target key end

     0   :  { %s6_s0 = inlined_call_operand.hbm [shape: pred[2], index: 0, kind: output, shape index: {}]  }

// kernel: custom-call.55
= control target key start
LH: loop header
LB: loop body
LE: loop exit
PB: predicated region body
PF: predicated region fallthrough
CT: control target
= control target key end

     0   :  { %s374_s6 = smov 0   ;;  %s376_s7 = smov 0   ;;  %s426_s0 = inlined_call_operand.vmem [shape: f32[2,3,3], index: 0, kind: input, shape index: {}]   ;;  %s427_s1 = inlined_call_operand.vmem [shape: f32[2,3,3], index: 1, kind: output, shape index: {}]  }
   0x1   :  { %s378_s8 = smov 0  }
   0x2 LB: > { %s296_s9 = sadd.s32 4294967295, %s361_s8   ;;  %s26_s10 = sadd.s32 1, %s357_s7  ;;  %s361_s8 = sphi %s378_s8, %s7_s8   ;;  %s357_s7 = sphi %s376_s7, %s429_s7   ;;  %s353_s6 = sphi %s374_s6, %s428_s6  }
   0x3   : > { %p28_p0 = scmp.ge.s32.totalorder %s26_s10, 2  ;;  %p298_p1 = scmp.ge.s32.totalorder %s361_s8, 2 }
   0x4   : > { %s42_s11 = sand.u32 (!%p298_p1), 1, %s361_s8   ;;  %s300_s12 = sshll.u32 (!%p298_p1), %s357_s7, 2 }
   0x5   : > { %s431_s10 = smov (%p28_p0, %s26_s10), 0  ;;  %40 = sbr.rel (%p298_p1) target bundleno = 12 (0xc), region = 16 }
   0x6   : > { %s299_s13 = sshll.u32 (!%p298_p1), %s42_s11, 2  ;;  %s48_s16 = scalar_lea.vmem (!%p298_p1), %s426_s0, %s300_s12 }
   0x7   : > { %s44_s17 = scalar_lea.vmem (!%p298_p1), [#allocation1], %s299_s13 }
   0xa   : > { %v65_v0 = vld [vmem:[%s48_s16] sm:$0xf] }
   0xb   : > { %66 = vst [vmem:[%s44_s17] sm:$0xf] %v65_v0 }
   0xc PF: > { %p301_p2 = scmp.ge.s32.totalorder %s361_s8, 1  ;;  %p83_p3 = scmp.lt.s32.totalorder %s361_s8, 3 }
   0xe   : > { %p84_p4 = pnand %p301_p2, %p83_p3 }
   0xf   : > { %s401_s18 = sand.u32 (!%p84_p4), 1, %s296_s9   ;;  %s305_s22 = sshll.u32 (!%p84_p4), %s353_s6, 2 }
  0x10   : > { %87 = sbr.rel (%p84_p4) target bundleno = 490 (0x1ea), region = 50  ;;  %s302_s19 = sshll.u32 (!%p84_p4), %s401_s18, 2 }
  0x11   : > { %s96_s20 = scalar_lea.vmem (!%p84_p4), [#allocation1], %s302_s19  ;;  %s100_s21 = scalar_lea.vmem (!%p84_p4), [#allocation3], %s302_s19 }
  0x12   : > { %s208_s25 = scalar_lea.vmem (!%p84_p4), %s427_s1, %s305_s22 }
  0x15   : > { %v363_v1 = vmov 0.0   ;;  %v103_v5 = vld [vmem:[%s96_s20] sm:$0xf]  ;;  %vm106_vm3 = vcmask 7168   ;;  %vm133_vm5 = vcmask 15368   ;;  %vm159_vm6 = vcmask 1047553  }
  0x16   : > { %105 = vst [vmem:[#allocation2] sm:$0xff] %v363_v1  ;;  %vm160_vm9 = vmand %vm133_vm5, %vm159_vm6  ;;  %vm164_vm11 = vcmask 23568   ;;  %vm190_vm12 = vcmask 1047554  }
  0x17   : > { %104 = vst [vmem:[#allocation0] sm:$0xf] %v103_v5  ;;  %vm191_vm15 = vmand %vm164_vm11, %vm190_vm12 }
  0x1d   : > { %v107_v2 = vld [vmem:[#allocation2] ss:$0 sm:$0xff] }
  0x1e   : > { %v109_v3 = vmul.f32 %v107_v2, %v107_v2  ;;  %v125_v4 = vmul.f32 0.0, %v107_v2  ;;  %v108_v6 = vld [vmem:[#allocation0] ss:$0 sm:$0xff]  ;;  %v137_v24 = vld [vmem:[#allocation0 + $0x1] ss:$0 sm:$0xff] }
  0x1f   : > { %v406_v14 = vld [vmem:[#allocation0] sm:$0xff] }
  0x20   : > { %110 = vadd.xlane.f32.xlu0 %v109_v3  ;;  %v168_v42 = vld [vmem:[#allocation0 + $0x2] ss:$0 sm:$0xff] }
  0x28   : > { %126 = vadd.xlane.f32.xlu0 %v125_v4 }
  0x93   : > { %v111_v7 = vpop.xlane.xlu0 %110 }
  0x94   : > { %v112_v8 = vsub.f32 %v108_v6, %v111_v7 }
  0x96   : > { %333 = vrsqrt.f32 %v112_v8  ;;  %vm119_vm1 = vweird.f32 %v112_v8 }
  0x9b   : > { %v127_v13 = vpop.xlane.xlu0 %126 }
  0x9c   : > { %v334_v9 = vpop.eup %333  ;;  %v128_v16 = vsub.f32 %v406_v14, %v127_v13 }
  0x9d   : > { %v114_v10 = vmul.f32 %v334_v9, %v112_v8  ;;  %vm120_vm0 = vweird.f32 %v334_v9 }
  0x9e   : > { %vm121_vm2 = vmor %vm119_vm1, %vm120_vm0 }
  0x9f   : > { %v115_v11 = vmul.f32 %v334_v9, %v114_v10 }
  0xa1   : > { %v116_v12 = vmul.f32 0.5, %v115_v11 }
  0xa3   : > { %v117_v15 = vsub.f32 1.5, %v116_v12 }
  0xa5   : > { %v118_v17 = vmul.f32 %v334_v9, %v117_v15 }
  0xa7   : > { %v122_v18 = vsel %vm121_vm2, %v334_v9, %v118_v17 }
  0xa8   : > { %v129_v19 = vmul.f32 %v128_v16, %v122_v18 }
  0xaa   : > { %v130_v20 = vsel %vm106_vm3, %v129_v19, 0.0 }
  0xab   : > { %132 = vst [vmem:[#allocation2] sm:$0xff] %v130_v20 }
  0xb2   : > { %v135_v21 = vld [vmem:[#allocation2 + $0x1] ss:$0 sm:$0xff] }
  0xb3   : > { %v138_v22 = vmul.f32 %v135_v21, %v135_v21  ;;  %v154_v23 = vmul.f32 %v135_v21, %v130_v20 }
  0xb5   : > { %139 = vadd.xlane.f32.xlu1 %v138_v22 }
  0xbd   : > { %155 = vadd.xlane.f32.xlu1 %v154_v23 }
 0x128   : > { %v140_v25 = vpop.xlane.xlu1 %139 }
 0x129   : > { %v141_v26 = vsub.f32 %v137_v24, %v140_v25 }
 0x12b   : > { %335 = vrsqrt.f32 %v141_v26  ;;  %vm148_vm7 = vweird.f32 %v141_v26 }
 0x130   : > { %v156_v32 = vpop.xlane.xlu1 %155 }
 0x131   : > { %v336_v27 = vpop.eup %335  ;;  %v157_v34 = vsub.f32 %v406_v14, %v156_v32 }
 0x132   : > { %v143_v28 = vmul.f32 %v336_v27, %v141_v26  ;;  %vm149_vm4 = vweird.f32 %v336_v27 }
 0x133   : > { %vm150_vm8 = vmor %vm148_vm7, %vm149_vm4 }
 0x134   : > { %v144_v29 = vmul.f32 %v336_v27, %v143_v28 }
 0x136   : > { %v145_v30 = vmul.f32 0.5, %v144_v29 }
 0x138   : > { %v146_v31 = vsub.f32 1.5, %v145_v30 }
 0x13a   : > { %v147_v33 = vmul.f32 %v336_v27, %v146_v31 }
 0x13c   : > { %v151_v35 = vsel %vm150_vm8, %v336_v27, %v147_v33 }
 0x13d   : > { %v158_v36 = vmul.f32 %v157_v34, %v151_v35 }
 0x13f   : > { %v161_v37 = vsel %vm160_vm9, %v158_v36, 0.0 }
 0x140   : > { %v162_v38 = vadd.f32 %v161_v37, %v130_v20 }
 0x142   : > { %163 = vst [vmem:[#allocation2] sm:$0xff] %v162_v38 }
 0x149   : > { %v166_v39 = vld [vmem:[#allocation2 + $0x2] ss:$0 sm:$0xff] }
 0x14a   : > { %v169_v40 = vmul.f32 %v166_v39, %v166_v39  ;;  %v185_v41 = vmul.f32 %v166_v39, %v162_v38 }
 0x14c   : > { %170 = vadd.xlane.f32.xlu2 %v169_v40 }
 0x154   : > { %186 = vadd.xlane.f32.xlu2 %v185_v41 }
 0x1bf   : > { %v171_v43 = vpop.xlane.xlu2 %170 }
 0x1c0   : > { %v172_v44 = vsub.f32 %v168_v42, %v171_v43 }
 0x1c2   : > { %337 = vrsqrt.f32 %v172_v44  ;;  %vm179_vm13 = vweird.f32 %v172_v44 }
 0x1c7   : > { %v187_v50 = vpop.xlane.xlu2 %186 }
 0x1c8   : > { %v338_v45 = vpop.eup %337  ;;  %v188_v52 = vsub.f32 %v406_v14, %v187_v50 }
 0x1c9   : > { %v174_v46 = vmul.f32 %v338_v45, %v172_v44  ;;  %vm180_vm10 = vweird.f32 %v338_v45 }
 0x1ca   : > { %vm181_vm14 = vmor %vm179_vm13, %vm180_vm10 }
 0x1cb   : > { %v175_v47 = vmul.f32 %v338_v45, %v174_v46 }
 0x1cd   : > { %v176_v48 = vmul.f32 0.5, %v175_v47 }
 0x1cf   : > { %v177_v49 = vsub.f32 1.5, %v176_v48 }
 0x1d1   : > { %v178_v51 = vmul.f32 %v338_v45, %v177_v49 }
 0x1d3   : > { %v182_v53 = vsel %vm181_vm14, %v338_v45, %v178_v51 }
 0x1d4   : > { %v189_v54 = vmul.f32 %v188_v52, %v182_v53 }
 0x1d6   : > { %v192_v55 = vsel %vm191_vm15, %v189_v54, 0.0 }
 0x1d7   : > { %v193_v56 = vadd.f32 %v192_v55, %v162_v38 }
 0x1d9   : > { %194 = vst [vmem:[#allocation2] sm:$0xff] %v193_v56 }
 0x1e0   : > { %v197_v57 = vld [vmem:[#allocation2] sm:$0xf] }
 0x1e1   : > { %200 = vst [vmem:[%s100_s21] sm:$0xf] %v197_v57 }
 0x1e8   : > { %v225_v58 = vld [vmem:[%s100_s21] sm:$0xf] }
 0x1e9   : > { %226 = vst [vmem:[%s208_s25] sm:$0xf] %v225_v58 }
 0x1ea PF: > { %s7_s8 = sadd.s32 1, %s361_s8   ;;  %s428_s6 = smov %s357_s7 }
 0x1eb   : > { %p4_p5 = scmp.ge.s32.totalorder %s7_s8, 4   ;;  %s429_s7 = smov %s431_s10 }
 0x1ed   :  { %6 = sbr.rel (!%p4_p5) target bundleno = 2 (0x2), region = 114 }

// kernel: custom-call.56
= control target key start
LH: loop header
LB: loop body
LE: loop exit
PB: predicated region body
PF: predicated region fallthrough
CT: control target
= control target key end

     0   :  { %s373_s6 = smov 0   ;;  %s375_s7 = smov 0   ;;  %s422_s0 = inlined_call_operand.vmem [shape: f32[2,1,3,3], index: 0, kind: input, shape index: {}]   ;;  %s423_s1 = inlined_call_operand.vmem [shape: f32[2,1,3,3], index: 1, kind: output, shape index: {}]  }
   0x1   :  { %s377_s8 = smov 0  }
   0x2 LB: > { %s299_s9 = sadd.s32 4294967295, %s360_s8   ;;  %s33_s10 = sadd.s32 1, %s356_s7  ;;  %s360_s8 = sphi %s377_s8, %s7_s8   ;;  %s356_s7 = sphi %s375_s7, %s425_s7   ;;  %s352_s6 = sphi %s373_s6, %s424_s6  }
   0x3   : > { %p35_p0 = scmp.ge.s32.totalorder %s33_s10, 2  ;;  %p301_p1 = scmp.ge.s32.totalorder %s360_s8, 2 }
   0x4   : > { %s49_s11 = sand.u32 (!%p301_p1), 1, %s360_s8   ;;  %s303_s12 = sshll.u32 (!%p301_p1), %s356_s7, 2 }
   0x5   : > { %s427_s10 = smov (%p35_p0, %s33_s10), 0  ;;  %47 = sbr.rel (%p301_p1) target bundleno = 12 (0xc), region = 16 }
   0x6   : > { %s302_s13 = sshll.u32 (!%p301_p1), %s49_s11, 2  ;;  %s56_s16 = scalar_lea.vmem (!%p301_p1), %s422_s0, %s303_s12 }
   0x7   : > { %s51_s17 = scalar_lea.vmem (!%p301_p1), [#allocation1], %s302_s13 }
   0xa   : > { %v73_v0 = vld [vmem:[%s56_s16] sm:$0xf] }
   0xb   : > { %74 = vst [vmem:[%s51_s17] sm:$0xf] %v73_v0 }
   0xc PF: > { %p304_p2 = scmp.ge.s32.totalorder %s360_s8, 1  ;;  %p91_p3 = scmp.lt.s32.totalorder %s360_s8, 3 }
   0xe   : > { %p92_p4 = pnand %p304_p2, %p91_p3 }
  0x10   : > { %95 = sbr.rel (%p92_p4) target bundleno = 437 (0x1b5), region = 50 }
  0x15   : > { %s400_s18 = sand.u32 1, %s299_s9   ;;  %v113_v1 = vlaneseq  ;;  %v362_v20 = vmov -1.0   ;;  %s308_s22 = sshll.u32 %s352_s6, 2 }
  0x16   : > { %s305_s19 = sshll.u32 %s400_s18, 2  ;;  %s206_s25 = scalar_lea.vmem %s423_s1, %s308_s22 }
  0x17   : > { %s104_s20 = scalar_lea.vmem [#allocation1], %s305_s19  ;;  %v114_v3 = vand.u32 127, %v113_v1  ;;  %v117_v4 = vshrl.u32 %v113_v1, 7  ;;  %s108_s21 = scalar_lea.vmem [#allocation3], %s305_s19 }
  0x18   : > { %v111_v2 = vld [vmem:[%s104_s20] sm:$0xf] }
  0x19   : > { %112 = vst [vmem:[#allocation0] sm:$0xf] %v111_v2  ;;  %vm119_vm0 = vcmp.eq.s32.totalorder %v117_v4, %v114_v3  ;;  %vm115_vm1 = vcmp.lt.s32.totalorder %v114_v3, 3  ;;  %vm124_vm2 = vcmp.ge.s32.totalorder %v117_v4, %v114_v3  ;;  %vm151_vm8 = vcmp.eq.s32.totalorder %v114_v3, 0 }
  0x1a   : > { %vm125_vm3 = vmand %vm124_vm2, %vm115_vm1  ;;  %vm148_vm9 = vcmp.eq.s32.totalorder %v114_v3, %v117_v4  ;;  %v152_v21 = vsel %vm151_vm8, 1.0, %v362_v20  ;;  %vm159_vm10 = vcmp.eq.s32.totalorder %v114_v3, 1  ;;  %vm169_vm11 = vcmp.eq.s32.totalorder %v114_v3, 2 }
  0x1b   : > { %v153_v22 = vsel %vm148_vm9, %v152_v21, 0.0 }
  0x20   : > { %v120_v5 = vld [vmem:[#allocation0] sm:$0xff] }
  0x21   : > { %v121_v6 = vsel %vm119_vm0, %v120_v5, 0.0  ;;  %v126_v15 = vsel %vm125_vm3, %v120_v5, 0.0 }
  0x22   : > { %122 = vadd.xlane.f32.xlu0 %v121_v6 }
  0x95   : > { %v123_v7 = vpop.xlane.xlu0 %122 }
  0x96   : > { %336 = vrcp.f32 %v123_v7  ;;  %v138_v11 = vand.u32 2147483648, %v123_v7  ;;  %v136_v13 = vand.u32 2147483647, %v123_v7  ;;  %vm132_vm5 = vweird.f32 %v123_v7 }
  0x98   : > { %v139_v16 = vor.u32 1.1754944e-38, %v138_v11  ;;  %vm137_vm7 = vcmp.eq.f32.partialorder %v136_v13, 8.507059e+37 }
  0x9c   : > { %v337_v8 = vpop.eup %336 }
  0x9d   : > { %v128_v9 = vmul.f32 %v337_v8, %v123_v7  ;;  %vm133_vm4 = vweird.f32 %v337_v8 }
  0x9e   : > { %vm134_vm6 = vmor %vm132_vm5, %vm133_vm4 }
  0x9f   : > { %v129_v10 = vsub.f32 1.0, %v128_v9 }
  0xa1   : > { %v130_v12 = vmul.f32 %v337_v8, %v129_v10 }
  0xa3   : > { %v131_v14 = vadd.f32 %v337_v8, %v130_v12 }
  0xa5   : > { %v135_v17 = vsel %vm134_vm6, %v337_v8, %v131_v14 }
  0xa6   : > { %v140_v18 = vsel %vm137_vm7, %v139_v16, %v135_v17 }
  0xa7   : > { %v141_v19 = vmul.f32 %v140_v18, %v126_v15 }
  0xa9   : > { %142 = vst [vmem:[#allocation4] sm:$0xff] %v141_v19 }
  0xb0   : > { %v155_v23 = vld [vmem:[#allocation4 + $0x1] ss:$0 sm:$0xff]  ;;  %v165_v26 = vld [vmem:[#allocation4 + $0x2] ss:$0 sm:$0xff] }
  0xb1   : > { %v156_v24 = vxor.u32 2147483648, %v155_v23  ;;  %v166_v28 = vxor.u32 2147483648, %v165_v26 }
  0xb3   : > { %v160_v25 = vmul.f32 %v156_v24, %v153_v22 }
  0xb5   : > { %161 = vadd.xlane.f32.xlu0 %v160_v25 }
 0x128   : > { %v162_v27 = vpop.xlane.xlu0 %161 }
 0x129   : > { %v163_v29 = vsel %vm159_vm10, %v162_v27, %v153_v22 }
 0x12a   : > { %v170_v30 = vmul.f32 %v166_v28, %v163_v29 }
 0x12c   : > { %171 = vadd.xlane.f32.xlu1 %v170_v30 }
 0x19f   : > { %v172_v31 = vpop.xlane.xlu1 %171 }
 0x1a0   : > { %v173_v32 = vsel %vm169_vm11, %v172_v31, %v163_v29 }
 0x1a1   : > { %v188_v33 = vmul.f32 %v173_v32, %v140_v18 }
 0x1a3   : > { %v190_v34 = vsel %vm132_vm5, %v173_v32, %v188_v33 }
 0x1a4   : > { %191 = vst [vmem:[#allocation2] sm:$0xff] %v190_v34 }
 0x1ab   : > { %v194_v35 = vld [vmem:[#allocation2] sm:$0xf] }
 0x1ac   : > { %197 = vst [vmem:[%s108_s21] sm:$0xf] %v194_v35 }
 0x1b3   : > { %v223_v36 = vld [vmem:[%s108_s21] sm:$0xf] }
 0x1b4   : > { %224 = vst [vmem:[%s206_s25] sm:$0xf] %v223_v36 }
 0x1b5 PF: > { %s7_s8 = sadd.s32 1, %s360_s8   ;;  %s424_s6 = smov %s356_s7 }
 0x1b6   : > { %p4_p5 = scmp.ge.s32.totalorder %s7_s8, 4   ;;  %s425_s7 = smov %s427_s10 }
 0x1b8   :  { %6 = sbr.rel (!%p4_p5) target bundleno = 2 (0x2), region = 112 }

// kernel: svd_registration.1
= control target key start
LH: loop header
LB: loop body
LE: loop exit
PB: predicated region body
PF: predicated region fallthrough
CT: control target
= control target key end

     0   :  { %vm83_vm0 = vcmask 124928   ;;  %v1018_v6 = vmov 0.0   ;;  %v2331_v35 = vmov 0  ;;  %v2333_v36 = vmov 0  ;;  %s2289_s1 = inlined_call_operand.vmem [shape: f32[8,3,16], index: 1, kind: input, shape index: {}]   ;;  %s2290_s0 = inlined_call_operand.vmem [shape: f32[8,3,16], index: 0, kind: input, shape index: {}]   ;;  %s2291_s2 = inlined_call_operand.vmem [shape: f32[8,16], index: 2, kind: output, shape index: {}]  }
   0x1   :  { %v1037_v0 = vld [vmem:[%s2289_s1 + $0xc] sm:$0x7]  ;;  %v1042_v1 = vld [vmem:[%s2289_s1 + $0x4] sm:$0x7]  ;;  %v1058_v3 = vld [vmem:[%s2289_s1 + $0x8] sm:$0x7] }
   0x2   :  { %v1047_v2 = vld [vmem:[%s2290_s0 + $0x4] sm:$0x7]  ;;  %vm2295_vm1 = vcmp.ne.f32.partialorder %v1037_v0, %v1037_v0  ;;  %vm2296_vm2 = vcmp.ne.f32.partialorder %v1042_v1, %v1042_v1  ;;  %v1063_v4 = vld [vmem:[%s2290_s0 + $0x8] sm:$0x7]  ;;  %v1068_v5 = vld [vmem:[%s2289_s1] sm:$0x7]  ;;  %vm2297_vm5 = vcmp.ne.f32.partialorder %v1058_v3, %v1058_v3 }
   0x3   :  { %vm2294_vm3 = vcmp.ne.f32.partialorder %v1047_v2, %v1047_v2  ;;  %v970_v7 = vsel %vm2295_vm1, 1.0, %v1018_v6  ;;  %v968_v8 = vsel %vm2296_vm2, 1.0, %v1018_v6  ;;  %v1100_v14 = vld [vmem:[%s2290_s0 + $0xc] sm:$0x7]  ;;  %vm2292_vm6 = vcmp.ne.f32.partialorder %v1063_v4, %v1063_v4  ;;  %v1109_v15 = vld [vmem:[%s2290_s0] sm:$0x7] }
   0x4   :  { %v976_v9 = vsel %vm2294_vm3, 1.0, %v1018_v6  ;;  %vm1088_vm4 = vmor %vm2294_vm3, %vm2296_vm2  ;;  %v93_v11 = vsel %vm83_vm0, %v970_v7, 0.0  ;;  %v87_v12 = vsel %vm83_vm0, %v968_v8, 0.0  ;;  %vm2293_vm7 = vcmp.ne.f32.partialorder %v1068_v5, %v1068_v5  ;;  %v1124_v17 = vld [vmem:[%s2289_s1 + $0x10] sm:$0x7] }
   0x5   :  { %v135_v13 = vsel %vm83_vm0, %v976_v9, 0.0  ;;  %94 = vadd.xlane.f32.xlu2 %v93_v11  ;;  %88 = vadd.xlane.f32.xlu0 %v87_v12  ;;  %vm1117_vm8 = vmor %vm2292_vm6, %vm2297_vm5  ;;  %vm2302_vm9 = vcmp.ne.f32.partialorder %v1100_v14, %v1100_v14  ;;  %v969_v18 = vsel %vm2297_vm5, 1.0, %v1018_v6  ;;  %v977_v19 = vsel %vm2292_vm6, 1.0, %v1018_v6  ;;  %v1149_v21 = vld [vmem:[%s2290_s0 + $0x10] sm:$0x7] }
   0x6   :  { %136 = vadd.xlane.f32.xlu1 %v135_v13  ;;  %vm1142_vm10 = vmor %vm2302_vm9, %vm2295_vm1  ;;  %v967_v22 = vsel %vm2293_vm7, 1.0, %v1018_v6  ;;  %vm27_vm11 = vcmp.ne.f32.partialorder %v1109_v15, %v1109_v15  ;;  %v1160_v23 = vld [vmem:[%s2289_s1 + $0x14] sm:$0x7]  ;;  %vm2301_vm12 = vcmp.ne.f32.partialorder %v1124_v17, %v1124_v17  ;;  %v1182_v26 = vld [vmem:[%s2289_s1 + $0x18] sm:$0x7]  ;;  %vm2299_vm14 = vcmp.ne.f32.partialorder %v1149_v21, %v1149_v21 }
   0x7   :  { %v1165_v24 = vld [vmem:[%s2290_s0 + $0x14] sm:$0x7]  ;;  %vm1175_vm13 = vmor %vm27_vm11, %vm2293_vm7  ;;  %v1189_v27 = vld [vmem:[%s2290_s0 + $0x18] sm:$0x7]  ;;  %v90_v28 = vsel %vm83_vm0, %v969_v18, 0.0  ;;  %v138_v29 = vsel %vm83_vm0, %v977_v19, 0.0  ;;  %vm2300_vm6 = vcmp.ne.f32.partialorder %v1160_v23, %v1160_v23  ;;  %vm41_vm3 = vcmp.ne.f32.partialorder %v1182_v26, %v1182_v26 }
   0x8   :  { %2323 = vst [vmem:[#allocation2_spill] sm:$0xff] %v1165_v24  ;;  %vm1199_vm15 = vmor %vm2299_vm14, %vm2301_vm12  ;;  %v1206_v31 = vld [vmem:[%s2289_s1 + $0x1c] sm:$0x7]  ;;  %v84_v33 = vsel %vm83_vm0, %v967_v22, 0.0  ;;  %vm2298_vm7 = vcmp.ne.f32.partialorder %v1165_v24, %v1165_v24  ;;  %vm33_vm2 = vcmp.ne.f32.partialorder %v1189_v27, %v1189_v27  ;;  %v971_v37 = vsel %vm2301_vm12, 1.0, %v1018_v6 }
   0x9   :  { %2328 = vst [vmem:[#allocation3_spill] sm:$0xff] %v1206_v31  ;;  %v1211_v32 = vld [vmem:[%s2290_s0 + $0x1c] sm:$0x7]  ;;  %vm1226_vm1 = vmor %vm2298_vm7, %vm2300_vm6  ;;  %vm42_vm7 = vcmp.ne.f32.partialorder %v1206_v31, %v1206_v31  ;;  %v978_v38 = vsel %vm2302_vm9, 1.0, %v1018_v6  ;;  %v975_v39 = vsel %vm27_vm11, 1.0, %v1018_v6  ;;  %v96_v40 = vsel %vm83_vm0, %v971_v37, 0.0 }
   0xa   :  { %vm1238_vm5 = vmor %vm33_vm2, %vm41_vm3  ;;  %vm2303_vm14 = vcmp.ne.f32.partialorder %v1211_v32, %v1211_v32  ;;  %v141_v41 = vsel %vm83_vm0, %v978_v38, 0.0  ;;  %v132_v42 = vsel %vm83_vm0, %v975_v39, 0.0  ;;  %vm2336_vm12 = vcmp.ne.f32.partialorder %v1160_v23, %v1160_v23 }
   0xb   :  { %v2332_v35 = vsel %vm1238_vm5, 4294967295, %v2331_v35  ;;  %vm1252_vm6 = vmor %vm2303_vm14, %vm42_vm7  ;;  %v972_v43 = vsel %vm2336_vm12, 1.0, %v1018_v6  ;;  %v973_v44 = vsel %vm41_vm3, 1.0, %v1018_v6  ;;  %vm2337_vm9 = vcmp.ne.f32.partialorder %v1149_v21, %v1149_v21 }
   0xc   :  { %v2334_v36 = vsel %vm1252_vm6, 4294967295, %v2333_v36  ;;  %v979_v45 = vsel %vm2337_vm9, 1.0, %v1018_v6  ;;  %v99_v46 = vsel %vm83_vm0, %v972_v43, 0.0  ;;  %v102_v47 = vsel %vm83_vm0, %v973_v44, 0.0 }
   0xd   :  { %91 = vadd.xlane.f32.xlu0 %v90_v28  ;;  %139 = vadd.xlane.f32.xlu2 %v138_v29  ;;  %2335 = vst [vmem:[#allocation4_spill] sm:$0xff] %v2334_v36  ;;  %v144_v48 = vsel %vm83_vm0, %v979_v45, 0.0  ;;  %vm2338_vm12 = vcmp.ne.f32.partialorder %v1165_v24, %v1165_v24  ;;  %v981_v50 = vsel %vm33_vm2, 1.0, %v1018_v6  ;;  %v974_v51 = vsel %vm42_vm7, 1.0, %v1018_v6 }
   0xe   :  { %85 = vadd.xlane.f32.xlu1 %v84_v33  ;;  %v980_v49 = vsel %vm2338_vm12, 1.0, %v1018_v6  ;;  %v150_v53 = vsel %vm83_vm0, %v981_v50, 0.0  ;;  %v105_v54 = vsel %vm83_vm0, %v974_v51, 0.0  ;;  %v982_v55 = vsel %vm2303_vm14, 1.0, %v1018_v6 }
   0xf   :  { %v147_v52 = vsel %vm83_vm0, %v980_v49, 0.0  ;;  %vm2339_vm9 = vcmp.ne.f32.partialorder %v1058_v3, %v1058_v3  ;;  %vm2340_vm12 = vcmp.ne.f32.partialorder %v1042_v1, %v1042_v1  ;;  %v153_v58 = vsel %vm83_vm0, %v982_v55, 0.0 }
  0x10   :  { %v53_v56 = vsel %vm2339_vm9, 0.0, %v1058_v3  ;;  %v52_v57 = vsel %vm2340_vm12, 0.0, %v1042_v1  ;;  %vm2341_vm14 = vcmp.ne.f32.partialorder %v1037_v0, %v1037_v0  ;;  %vm2342_vm9 = vcmp.ne.f32.partialorder %v1047_v2, %v1047_v2 }
  0x11   :  { %v170_v59 = vsel %vm83_vm0, %v53_v56, 0.0  ;;  %v167_v60 = vsel %vm83_vm0, %v52_v57, 0.0  ;;  %v54_v61 = vsel %vm2341_vm14, 0.0, %v1037_v0  ;;  %v60_v62 = vsel %vm2342_vm9, 0.0, %v1047_v2 }
  0x12   :  { %vm2343_vm12 = vcmp.ne.f32.partialorder %v1068_v5, %v1068_v5  ;;  %v173_v6 = vsel %vm83_vm0, %v54_v61, 0.0  ;;  %v311_v7 = vsel %vm83_vm0, %v60_v62, 0.0  ;;  %vm2344_vm14 = vcmp.ne.f32.partialorder %v1063_v4, %v1063_v4 }
  0x13   :  { %v51_v63 = vsel %vm2343_vm12, 0.0, %v1068_v5  ;;  %v61_v9 = vsel %vm2344_vm14, 0.0, %v1063_v4  ;;  %v59_v11 = vsel %vm27_vm11, 0.0, %v1109_v15  ;;  %vm2345_vm9 = vcmp.ne.f32.partialorder %v1124_v17, %v1124_v17 }
  0x14   :  { %v164_v8 = vsel %vm83_vm0, %v51_v63, 0.0  ;;  %v55_v12 = vsel %vm2345_vm9, 0.0, %v1124_v17  ;;  %v314_v13 = vsel %vm83_vm0, %v61_v9, 0.0  ;;  %v308_v18 = vsel %vm83_vm0, %v59_v11, 0.0 }
  0x15   :  { %97 = vadd.xlane.f32.xlu0 %v96_v40  ;;  %142 = vadd.xlane.f32.xlu2 %v141_v41  ;;  %v176_v19 = vsel %vm83_vm0, %v55_v12, 0.0  ;;  %vm2346_vm12 = vcmp.ne.f32.partialorder %v1100_v14, %v1100_v14  ;;  %vm2347_vm11 = vcmp.ne.f32.partialorder %v1149_v21, %v1149_v21  ;;  %vm2348_vm14 = vcmp.ne.f32.partialorder %v1160_v23, %v1160_v23 }
  0x16   :  { %133 = vadd.xlane.f32.xlu1 %v132_v42  ;;  %v62_v22 = vsel %vm2346_vm12, 0.0, %v1100_v14  ;;  %v63_v28 = vsel %vm2347_vm11, 0.0, %v1149_v21  ;;  %v56_v29 = vsel %vm2348_vm14, 0.0, %v1160_v23  ;;  %v57_v39 = vsel %vm41_vm3, 0.0, %v1182_v26 }
  0x17   :  { %v317_v33 = vsel %vm83_vm0, %v62_v22, 0.0  ;;  %v320_v37 = vsel %vm83_vm0, %v63_v28, 0.0  ;;  %v179_v38 = vsel %vm83_vm0, %v56_v29, 0.0  ;;  %v58_v40 = vsel %vm42_vm7, 0.0, %v1206_v31 }
  0x18   :  { %vm2349_vm9 = vcmp.ne.f32.partialorder %v1165_v24, %v1165_v24  ;;  %v182_v42 = vsel %vm83_vm0, %v57_v39, 0.0  ;;  %v185_v43 = vsel %vm83_vm0, %v58_v40, 0.0  ;;  %v65_v45 = vsel %vm33_vm2, 0.0, %v1189_v27 }
  0x19   :  { %v64_v41 = vsel %vm2349_vm9, 0.0, %v1165_v24  ;;  %vm2350_vm3 = vcmp.ne.f32.partialorder %v1211_v32, %v1211_v32 }
  0x1a   :  { %v323_v44 = vsel %vm83_vm0, %v64_v41, 0.0 }
  0x1d   :  { %100 = vadd.xlane.f32.xlu0 %v99_v46  ;;  %103 = vadd.xlane.f32.xlu2 %v102_v47  ;;  %v66_v46 = vsel %vm2350_vm3, 0.0, %v1211_v32  ;;  %v326_v47 = vsel %vm83_vm0, %v65_v45, 0.0 }
  0x1e   :  { %145 = vadd.xlane.f32.xlu1 %v144_v48  ;;  %v329_v48 = vsel %vm83_vm0, %v66_v46, 0.0 }
  0x25   :  { %148 = vadd.xlane.f32.xlu0 %v147_v52  ;;  %151 = vadd.xlane.f32.xlu2 %v150_v53 }
  0x26   :  { %106 = vadd.xlane.f32.xlu1 %v105_v54 }
  0x2d   :  { %154 = vadd.xlane.f32.xlu0 %v153_v58  ;;  %171 = vadd.xlane.f32.xlu2 %v170_v59 }
  0x2e   :  { %168 = vadd.xlane.f32.xlu1 %v167_v60 }
  0x35   :  { %174 = vadd.xlane.f32.xlu2 %v173_v6  ;;  %312 = vadd.xlane.f32.xlu0 %v311_v7 }
  0x36   :  { %165 = vadd.xlane.f32.xlu1 %v164_v8 }
  0x3d   :  { %315 = vadd.xlane.f32.xlu0 %v314_v13  ;;  %309 = vadd.xlane.f32.xlu2 %v308_v18 }
  0x3e   :  { %177 = vadd.xlane.f32.xlu1 %v176_v19 }
  0x45   :  { %318 = vadd.xlane.f32.xlu0 %v317_v33  ;;  %321 = vadd.xlane.f32.xlu2 %v320_v37 }
  0x46   :  { %180 = vadd.xlane.f32.xlu1 %v179_v38 }
  0x4d   :  { %183 = vadd.xlane.f32.xlu0 %v182_v42  ;;  %186 = vadd.xlane.f32.xlu2 %v185_v43 }
  0x4e   :  { %324 = vadd.xlane.f32.xlu1 %v323_v44 }
  0x55   :  { %327 = vadd.xlane.f32.xlu0 %v326_v47 }
  0x56   :  { %330 = vadd.xlane.f32.xlu1 %v329_v48 }
  0x78   :  { %v95_v49 = vpop.xlane.xlu2 %94  ;;  %v89_v50 = vpop.xlane.xlu0 %88 }
  0x79   :  { %v1386_v51 = vsub.f32 16.0, %v95_v49  ;;  %v1388_v52 = vsub.f32 16.0, %v89_v50  ;;  %v137_v53 = vpop.xlane.xlu1 %136 }
  0x7a   :  { %v1390_v54 = vsub.f32 16.0, %v137_v53 }
  0x7b   :  { %984 = vrcp.f32 %v1386_v51  ;;  %v214_v61 = vand.u32 2147483648, %v1388_v52  ;;  %v244_v6 = vand.u32 2147483648, %v1386_v51  ;;  %v212_v11 = vand.u32 2147483647, %v1388_v52 }
  0x7c   :  { %986 = vrcp.f32 %v1388_v52  ;;  %v358_v9 = vand.u32 2147483648, %v1390_v54  ;;  %v242_v12 = vand.u32 2147483647, %v1386_v51  ;;  %vm238_vm2 = vweird.f32 %v1386_v51 }
  0x7d   :  { %988 = vrcp.f32 %v1390_v54  ;;  %v1423_v22 = vor.u32 1.1754944e-38, %v214_v61  ;;  %v1427_v29 = vor.u32 1.1754944e-38, %v244_v6  ;;  %v356_v37 = vand.u32 2147483647, %v1390_v54 }
  0x7e   :  { %v1434_v41 = vor.u32 1.1754944e-38, %v358_v9  ;;  %vm1442_vm9 = vcmp.eq.f32.partialorder %v212_v11, 8.507059e+37  ;;  %vm1446_vm3 = vcmp.eq.f32.partialorder %v242_v12, 8.507059e+37  ;;  %vm2368_vm0 = vweird.f32 %v1390_v54 }
  0x7f   :  { %vm1465_vm7 = vcmp.eq.f32.partialorder %v356_v37, 8.507059e+37 }
  0x80   :  { %v92_v27 = vpop.xlane.xlu0 %91  ;;  %v140_v32 = vpop.xlane.xlu2 %139 }
  0x81   :  { %v1395_v55 = vpop.eup %984  ;;  %v1397_v56 = vsub.f32 16.0, %v92_v27  ;;  %v1399_v57 = vsub.f32 16.0, %v140_v32  ;;  %v86_v58 = vpop.xlane.xlu1 %85 }
  0x82   :  { %v1401_v59 = vpop.eup %986  ;;  %v1403_v60 = vsub.f32 16.0, %v86_v58  ;;  %v234_v62 = vmul.f32 %v1395_v55, %v1386_v51  ;;  %vm239_vm11 = vweird.f32 %v1395_v55 }
  0x83   :  { %v1408_v63 = vpop.eup %988  ;;  %990 = vrcp.f32 %v1397_v56  ;;  %v204_v7 = vmul.f32 %v1401_v59, %v1388_v52  ;;  %v229_v18 = vand.u32 2147483648, %v1397_v56  ;;  %v227_v45 = vand.u32 2147483647, %v1397_v56  ;;  %vm1482_vm14 = vmor %vm238_vm2, %vm239_vm11 }
  0x84   :  { %992 = vrcp.f32 %v1399_v57  ;;  %v235_v8 = vsub.f32 1.0, %v234_v62  ;;  %v348_v13 = vmul.f32 %v1408_v63, %v1390_v54  ;;  %v197_v6 = vand.u32 2147483647, %v1403_v60 }
  0x85   :  { %994 = vrcp.f32 %v1403_v60  ;;  %v205_v19 = vsub.f32 1.0, %v204_v7  ;;  %v1457_v27 = vor.u32 1.1754944e-38, %v229_v18  ;;  %v199_v9 = vand.u32 2147483648, %v1403_v60 }
  0x86   :  { %v236_v28 = vmul.f32 %v1395_v55, %v235_v8  ;;  %v349_v33 = vsub.f32 1.0, %v348_v13  ;;  %vm1474_vm12 = vcmp.eq.f32.partialorder %v227_v45, 8.507059e+37  ;;  %vm2361_vm6 = vweird.f32 %v1401_v59 }
  0x87   :  { %v206_v40 = vmul.f32 %v1401_v59, %v205_v19  ;;  %v371_v19 = vand.u32 2147483647, %v1399_v57  ;;  %vm2362_vm2 = vweird.f32 %v1388_v52  ;;  %v373_v37 = vand.u32 2147483648, %v1399_v57 }
  0x88   :  { %v98_v38 = vpop.xlane.xlu0 %97  ;;  %v143_v39 = vpop.xlane.xlu2 %142  ;;  %v350_v48 = vmul.f32 %v1408_v63, %v349_v33  ;;  %v237_v61 = vadd.f32 %v1395_v55, %v236_v28  ;;  %vm1497_vm11 = vmor %vm2362_vm2, %vm2361_vm6  ;;  %vm1511_vm6 = vcmp.eq.f32.partialorder %v197_v6, 8.507059e+37  ;;  %vm2367_vm2 = vweird.f32 %v1408_v63 }
  0x89   :  { %v1436_v42 = vpop.eup %990  ;;  %v1438_v43 = vsub.f32 16.0, %v98_v38  ;;  %v134_v44 = vpop.xlane.xlu1 %133  ;;  %v207_v58 = vadd.f32 %v1401_v59, %v206_v40  ;;  %v1470_v7 = vsub.f32 16.0, %v143_v39 }
  0x8a   :  { %v1451_v49 = vpop.eup %992  ;;  %v1453_v50 = vsub.f32 16.0, %v134_v44  ;;  %v219_v53 = vmul.f32 %v1436_v42, %v1397_v56  ;;  %v351_v13 = vadd.f32 %v1408_v63, %v350_v48  ;;  %v241_v39 = vsel %vm1482_vm14, %v1395_v55, %v237_v61 }
  0x8b   :  { %v1460_v32 = vpop.eup %994  ;;  %996 = vrcp.f32 %v1438_v43  ;;  %v363_v33 = vmul.f32 %v1451_v49, %v1399_v57  ;;  %v211_v38 = vsel %vm1497_vm11, %v1401_v59, %v207_v58  ;;  %vm1521_vm11 = vmor %vm2368_vm0, %vm2367_vm2  ;;  %v200_v55 = vor.u32 1.1754944e-38, %v199_v9 }
  0x8c   :  { %v220_v8 = vsub.f32 1.0, %v219_v53  ;;  %v189_v18 = vmul.f32 %v1460_v32, %v1403_v60  ;;  %998 = vrcp.f32 %v1453_v50  ;;  %vm194_vm14 = vweird.f32 %v1460_v32 }
  0x8d   :  { %1000 = vrcp.f32 %v1470_v7  ;;  %v364_v53 = vsub.f32 1.0, %v363_v33  ;;  %vm2371_vm0 = vweird.f32 %v1436_v42  ;;  %vm2372_vm2 = vweird.f32 %v1397_v56 }
  0x8e   :  { %v221_v28 = vmul.f32 %v1436_v42, %v220_v8  ;;  %v190_v52 = vsub.f32 1.0, %v189_v18  ;;  %v355_v8 = vsel %vm1521_vm11, %v1408_v63, %v351_v13  ;;  %vm1540_vm5 = vmor %vm2372_vm2, %vm2371_vm0  ;;  %v1547_v18 = vsel %vm1442_vm9, %v1423_v22, %v211_v38 }
  0x8f   :  { %v1552_v63 = vsel %vm1446_vm3, %v1427_v29, %v241_v39  ;;  %v365_v13 = vmul.f32 %v1451_v49, %v364_v53  ;;  %vm368_vm11 = vweird.f32 %v1451_v49  ;;  %v1569_v29 = vsel %vm1465_vm7, %v1434_v41, %v355_v8 }
  0x90   :  { %v101_v44 = vpop.xlane.xlu0 %100  ;;  %v104_v45 = vpop.xlane.xlu2 %103  ;;  %v222_v48 = vadd.f32 %v1436_v42, %v221_v28  ;;  %v191_v12 = vmul.f32 %v1460_v32, %v190_v52  ;;  %vm2375_vm9 = vweird.f32 %v1403_v60  ;;  %v374_v41 = vor.u32 1.1754944e-38, %v373_v37 }
  0x91   :  { %v1525_v58 = vpop.eup %996  ;;  %v1527_v61 = vsub.f32 16.0, %v101_v44  ;;  %v146_v6 = vpop.xlane.xlu1 %145  ;;  %v1534_v54 = vsub.f32 16.0, %v104_v45  ;;  %vm1573_vm3 = vmor %vm2375_vm9, %vm194_vm14  ;;  %v366_v47 = vadd.f32 %v1451_v49, %v365_v13  ;;  %vm2380_vm7 = vweird.f32 %v1399_v57 }
  0x92   :  { %v226_v56 = vsel %vm1540_vm5, %v1436_v42, %v222_v48  ;;  %v192_v28 = vadd.f32 %v1460_v32, %v191_v12  ;;  %v249_v46 = vmul.f32 %v1525_v58, %v1438_v43  ;;  %v1562_v22 = vpop.eup %998  ;;  %v1564_v51 = vsub.f32 16.0, %v146_v6  ;;  %vm1596_vm14 = vmor %vm2380_vm7, %vm368_vm11 }
  0x93   :  { %vm1578_vm5 = vcmp.eq.f32.partialorder %v371_v19, 8.507059e+37  ;;  %1002 = vrcp.f32 %v1527_v61  ;;  %v1586_v39 = vpop.eup %1000  ;;  %v231_v60 = vsel %vm1474_vm12, %v1457_v27, %v226_v56  ;;  %vm253_vm0 = vweird.f32 %v1438_v43 }
  0x94   :  { %v196_v62 = vsel %vm1573_vm3, %v1460_v32, %v192_v28  ;;  %v250_v38 = vsub.f32 1.0, %v249_v46  ;;  %1004 = vrcp.f32 %v1534_v54  ;;  %v257_v32 = vand.u32 2147483647, %v1438_v43 }
  0x95   :  { %v370_v37 = vsel %vm1596_vm14, %v1451_v49, %v366_v47  ;;  %v259_v27 = vand.u32 2147483648, %v1438_v43  ;;  %v333_v11 = vmul.f32 %v1562_v22, %v1453_v50  ;;  %1006 = vrcp.f32 %v1564_v51 }
  0x96   :  { %v251_v52 = vmul.f32 %v1525_v58, %v250_v38  ;;  %v1612_v45 = vsel %vm1511_vm6, %v200_v55, %v196_v62  ;;  %vm254_vm12 = vweird.f32 %v1525_v58  ;;  %v341_v48 = vand.u32 2147483647, %v1453_v50 }
  0x97   :  { %v334_v6 = vsub.f32 1.0, %v333_v11  ;;  %v343_v8 = vand.u32 2147483648, %v1453_v50  ;;  %v1624_v9 = vsel %vm1578_vm5, %v374_v41, %v370_v37  ;;  %vm1626_vm6 = vcmp.eq.f32.partialorder %v257_v32, 8.507059e+37  ;;  %vm1636_vm2 = vmor %vm253_vm0, %vm254_vm12 }
  0x98   :  { %v149_v57 = vpop.xlane.xlu0 %148  ;;  %v152_v44 = vpop.xlane.xlu2 %151  ;;  %v252_v53 = vadd.f32 %v1525_v58, %v251_v52  ;;  %v378_v55 = vmul.f32 %v1586_v39, %v1470_v7  ;;  %v260_v28 = vor.u32 1.1754944e-38, %v259_v27  ;;  %vm337_vm11 = vweird.f32 %v1453_v50 }
  0x99   :  { %v1616_v49 = vsub.f32 16.0, %v149_v57  ;;  %v107_v59 = vpop.xlane.xlu1 %106  ;;  %v1620_v12 = vsub.f32 16.0, %v152_v44  ;;  %v1632_v13 = vpop.eup %1002  ;;  %v335_v46 = vmul.f32 %v1562_v22, %v334_v6  ;;  %vm338_vm9 = vweird.f32 %v1562_v22 }
  0x9a   :  { %v1643_v42 = vpop.eup %1004  ;;  %v1645_v47 = vsub.f32 16.0, %v107_v59  ;;  %v256_v33 = vsel %vm1636_vm2, %v1525_v58, %v252_v53  ;;  %vm1650_vm3 = vcmp.eq.f32.partialorder %v341_v48, 8.507059e+37  ;;  %v379_v62 = vsub.f32 1.0, %v378_v55  ;;  %vm1672_vm7 = vmor %vm337_vm11, %vm338_vm9 }
  0x9b   :  { %1008 = vrcp.f32 %v1616_v49  ;;  %v336_v41 = vadd.f32 %v1562_v22, %v335_v46  ;;  %v344_v38 = vor.u32 1.1754944e-38, %v343_v8  ;;  %vm382_vm5 = vweird.f32 %v1470_v7  ;;  %v1657_v19 = vpop.eup %1006 }
  0x9c   :  { %1010 = vrcp.f32 %v1620_v12  ;;  %v380_v32 = vmul.f32 %v1586_v39, %v379_v62  ;;  %v386_v58 = vand.u32 2147483647, %v1470_v7  ;;  %v264_v37 = vmul.f32 %v1632_v13, %v1527_v61 }
  0x9d   :  { %v1666_v52 = vsel %vm1626_vm6, %v260_v28, %v256_v33  ;;  %vm383_vm14 = vweird.f32 %v1586_v39  ;;  %v388_v11 = vand.u32 2147483648, %v1470_v7  ;;  %v272_v57 = vand.u32 2147483647, %v1527_v61 }
  0x9e   :  { %v340_v59 = vsel %vm1672_vm7, %v1562_v22, %v336_v41  ;;  %v381_v53 = vadd.f32 %v1586_v39, %v380_v32  ;;  %v265_v6 = vsub.f32 1.0, %v264_v37  ;;  %v274_v50 = vand.u32 2147483648, %v1527_v61  ;;  %vm1711_vm9 = vmor %vm382_vm5, %vm383_vm14 }
  0x9f   :  { %1012 = vrcp.f32 %v1645_v47  ;;  %vm268_vm0 = vweird.f32 %v1527_v61  ;;  %vm501_vm12 = vcmask 1041409   ;;  %vm1693_vm6 = vcmp.eq.f32.partialorder %v386_v58, 8.507059e+37 }
  0xa0   :  { %v155_v44 = vpop.xlane.xlu0 %154  ;;  %v172_v48 = vpop.xlane.xlu2 %171  ;;  %v266_v28 = vmul.f32 %v1632_v13, %v265_v6  ;;  %vm269_vm2 = vweird.f32 %v1632_v13  ;;  %vm504_vm11 = vcmask 1042434   ;;  %v1705_v33 = vsel %vm1650_vm3, %v344_v38, %v340_v59 }
  0xa1   :  { %v1685_v8 = vsub.f32 16.0, %v155_v44  ;;  %v1687_v40 = vmul.f32 %v231_v60, %v172_v48  ;;  %v169_v55 = vpop.xlane.xlu1 %168  ;;  %v1699_v46 = vpop.eup %1008  ;;  %v389_v62 = vor.u32 1.1754944e-38, %v388_v11  ;;  %vm1715_vm7 = vcmp.eq.f32.partialorder %v272_v57, 8.507059e+37  ;;  %vm270_vm5 = vmor %vm268_vm0, %vm269_vm2 }
  0xa2   :  { %v1691_v56 = vmul.f32 %v1547_v18, %v169_v55  ;;  %v1719_v32 = vpop.eup %1010  ;;  %v385_v7 = vsel %vm1711_vm9, %v1586_v39, %v381_v53  ;;  %v275_v43 = vor.u32 1.1754944e-38, %v274_v50  ;;  %vm507_vm3 = vcmask 1043459  }
  0xa3   :  { %v470_v60 = vsub.f32 %v1058_v3, %v1687_v40  ;;  %1014 = vrcp.f32 %v1685_v8  ;;  %v914_v58 = vrot.slane %v1687_v40, 6  ;;  %v267_v37 = vadd.f32 %v1632_v13, %v266_v28 }
  0xa4   :  { %v469_v3 = vsub.f32 %v1042_v1, %v1691_v56  ;;  %v393_v27 = vmul.f32 %v1657_v19, %v1564_v51  ;;  %v931_v11 = vrot.slane %v1687_v40, 7  ;;  %v912_v39 = vrot.slane %v1691_v56, 7 }
  0xa5   :  { %v1729_v38 = vsel %vm1117_vm8, 0.0, %v470_v60  ;;  %v947_v57 = vrot.slane %v1691_v56, 1  ;;  %v1742_v44 = vpop.eup %1012  ;;  %v1749_v6 = vsel %vm1693_vm6, %v389_v62, %v385_v7  ;;  %v271_v60 = vsel %vm270_vm5, %v1632_v13, %v267_v37 }
  0xa6   :  { %v1738_v1 = vsel %vm1088_vm4, 0.0, %v469_v3  ;;  %v394_v18 = vsub.f32 1.0, %v393_v27  ;;  %v403_v3 = vand.u32 2147483648, %v1564_v51  ;;  %v1769_v13 = vsel %vm1715_vm7, %v275_v43, %v271_v60 }
  0xa7   :  { %2397 = vst [vmem:[#allocation5_spill] sm:$0xff] %v1738_v1  ;;  %v535_v53 = vrot.slane %v1738_v1, 1  ;;  %v585_v50 = vrot.slane %v1738_v1, 2  ;;  %v401_v37 = vand.u32 2147483647, %v1564_v51  ;;  %v1774_v27 = vmul.f32 %v1643_v42, %v1534_v54 }
  0xa8   :  { %v175_v55 = vpop.xlane.xlu2 %174  ;;  %v313_v28 = vpop.xlane.xlu0 %312  ;;  %vm510_vm14 = vcmask 1044484   ;;  %vm398_vm0 = vweird.f32 %v1657_v19  ;;  %vm397_vm6 = vweird.f32 %v1564_v51  ;;  %vm283_vm2 = vweird.f32 %v1534_v54 }
  0xa9   :  { %v247_v62 = vmul.f32 %v1552_v63, %v175_v55  ;;  %v1762_v7 = vmul.f32 %v1569_v29, %v313_v28  ;;  %v166_v61 = vpop.xlane.xlu1 %165  ;;  %v1764_v59 = vpop.eup %1014  ;;  %v1778_v29 = vmul.f32 %v1657_v19, %v394_v18  ;;  %v1780_v28 = vor.u32 1.1754944e-38, %v403_v3 }
  0xaa   :  { %v202_v36 = vmul.f32 %v1612_v45, %v166_v61  ;;  %vm284_vm9 = vweird.f32 %v1643_v42  ;;  %v287_v51 = vand.u32 2147483647, %v1534_v54  ;;  %vm516_vm7 = vcmask 1046534  }
  0xab   :  { %v471_v63 = vsub.f32 %v1037_v0, %v247_v62  ;;  %v916_v55 = vrot.slane %v247_v62, 5  ;;  %v933_v45 = vrot.slane %v247_v62, 6  ;;  %v950_v61 = vrot.slane %v247_v62, 7 }
  0xac   :  { %v453_v41 = vsub.f32 %v1047_v2, %v1762_v7  ;;  %v468_v43 = vsub.f32 %v1068_v5, %v202_v36  ;;  %v913_v0 = vsel %vm501_vm12, %v912_v39, %v202_v36  ;;  %v929_v48 = vrot.slane %v202_v36, 1 }
  0xad   :  { %v1787_v60 = vsel %vm1142_vm10, 0.0, %v471_v63  ;;  %v946_v22 = vrot.slane %v202_v36, 2  ;;  %v846_v3 = vrot.slane %v1762_v7, 7  ;;  %v915_v2 = vsel %vm504_vm11, %v914_v58, %v913_v0 }
  0xae   :  { %2398 = vst [vmem:[#allocation6_spill] sm:$0xff] %v1787_v60  ;;  %v1792_v18 = vsel %vm1088_vm4, 0.0, %v453_v41  ;;  %v1797_v62 = vsel %vm1175_vm13, 0.0, %v468_v43  ;;  %v888_v10 = vrot.slane %v1762_v7, 1  ;;  %v917_v58 = vsel %vm507_vm3, %v916_v55, %v915_v2 }
  0xaf   :  { %2399 = vst [vmem:[#allocation7_spill] sm:$0xff] %v1792_v18  ;;  %v1803_v63 = vmul.f32 %v1738_v1, %v1792_v18  ;;  %v1806_v36 = vmul.f32 %v535_v53, %v1792_v18  ;;  %v1810_v39 = vmul.f32 %v585_v50, %v1792_v18  ;;  %v534_v41 = vrot.slane %v1797_v62, 1 }
  0xb0   :  { %v584_v43 = vrot.slane %v1797_v62, 2  ;;  %v316_v0 = vpop.xlane.xlu0 %315  ;;  %v310_v5 = vpop.xlane.xlu2 %309  ;;  %v930_v1 = vsel %vm501_vm12, %v1691_v56, %v929_v48  ;;  %v948_v53 = vsel %vm501_vm12, %v947_v57, %v946_v22  ;;  %v717_v2 = vrot.slane %v1797_v62, 6 }
  0xb1   :  { %2400 = vst [vmem:[#allocation8_spill] sm:$0xff] %v1803_v63  ;;  %v376_v63 = vmul.f32 %v1624_v9, %v316_v0  ;;  %v932_v50 = vsel %vm504_vm11, %v931_v11, %v930_v1  ;;  %v949_v18 = vsel %vm504_vm11, %v1687_v40, %v948_v53  ;;  %v346_v55 = vmul.f32 %v1705_v33, %v310_v5 }
  0xb2   :  { %2401 = vst [vmem:[#allocation9_spill] sm:$0xff] %v1806_v36  ;;  %v178_v36 = vpop.xlane.xlu1 %177  ;;  %v934_v56 = vsel %vm507_vm3, %v933_v45, %v932_v50  ;;  %vm513_vm4 = vcmask 1045509   ;;  %v951_v9 = vsel %vm507_vm3, %v950_v61, %v949_v18  ;;  %v616_v48 = vrot.slane %v1810_v39, 7 }
  0xb3   :  { %v262_v60 = vmul.f32 %v1666_v52, %v178_v36  ;;  %v454_v31 = vsub.f32 %v1063_v4, %v376_v63  ;;  %v848_v24 = vrot.slane %v376_v63, 6  ;;  %v452_v57 = vsub.f32 %v1109_v15, %v346_v55 }
  0xb4   :  { %v847_v4 = vsel %vm501_vm12, %v846_v3, %v346_v55  ;;  %v872_v22 = vrot.slane %v376_v63, 7  ;;  %v870_v15 = vrot.slane %v346_v55, 1  ;;  %v2404_v18 = vrot.slane %v1729_v38, 2 }
  0xb5   :  { %v472_v11 = vsub.f32 %v1124_v17, %v262_v60  ;;  %v918_v1 = vrot.slane %v262_v60, 4  ;;  %v935_v40 = vrot.slane %v262_v60, 5  ;;  %v1833_v52 = vsel %vm1117_vm8, 0.0, %v454_v31 }
  0xb6   :  { %v952_v33 = vrot.slane %v262_v60, 6  ;;  %v1844_v16 = vsel %vm1175_vm13, 0.0, %v452_v57  ;;  %v849_v31 = vsel %vm504_vm11, %v848_v24, %v847_v4  ;;  %vm1847_vm8 = vcmp.eq.f32.partialorder %v401_v37, 8.507059e+37  ;;  %vm399_vm13 = vmor %vm397_vm6, %vm398_vm0 }
  0xb7   :  { %v919_v45 = vsel %vm510_vm14, %v918_v1, %v917_v58  ;;  %v936_v17 = vsel %vm510_vm14, %v935_v40, %v934_v56  ;;  %v1854_v3 = vmul.f32 %v2404_v18, %v1833_v52  ;;  %v1858_v5 = vsel %vm1199_vm15, 0.0, %v472_v11  ;;  %vm285_vm0 = vmor %vm283_vm2, %vm284_vm9 }
  0xb8   :  { %v953_v61 = vsel %vm510_vm14, %v952_v33, %v951_v9  ;;  %v1862_v25 = vmul.f32 %v1797_v62, %v1844_v16  ;;  %v887_v36 = vrot.slane %v346_v55, 2  ;;  %v319_v24 = vpop.xlane.xlu0 %318  ;;  %v1865_v37 = vmul.f32 %v534_v41, %v1844_v16 }
  0xb9   :  { %v871_v58 = vsel %vm501_vm12, %v1762_v7, %v870_v15  ;;  %v391_v0 = vmul.f32 %v1749_v6, %v319_v24  ;;  %v396_v50 = vadd.f32 %v1657_v19, %v1778_v29  ;;  %v280_v55 = vsub.f32 1.0, %v1774_v27 }
  0xba   :  { %v181_v53 = vpop.xlane.xlu1 %180  ;;  %v889_v56 = vsel %vm501_vm12, %v888_v10, %v887_v36  ;;  %v873_v9 = vsel %vm504_vm11, %v872_v22, %v871_v58  ;;  %v1879_v6 = vmul.f32 %v584_v43, %v1844_v16  ;;  %v289_v18 = vand.u32 2147483648, %v1534_v54 }
  0xbb   :  { %v277_v11 = vmul.f32 %v1769_v13, %v181_v53  ;;  %v455_v41 = vsub.f32 %v1100_v14, %v391_v0  ;;  %v850_v1 = vrot.slane %v391_v0, 5  ;;  %v874_v40 = vrot.slane %v391_v0, 6 }
  0xbc   :  { %v890_v7 = vsel %vm504_vm11, %v376_v63, %v889_v56  ;;  %v891_v33 = vrot.slane %v391_v0, 7  ;;  %v322_v63 = vpop.xlane.xlu2 %321  ;;  %vm412_vm5 = vweird.f32 %v1616_v49  ;;  %v290_v56 = vor.u32 1.1754944e-38, %v289_v18 }
  0xbd   :  { %v920_v57 = vrot.slane %v277_v11, 3  ;;  %v937_v29 = vrot.slane %v277_v11, 4  ;;  %v851_v10 = vsel %vm507_vm3, %v850_v1, %v849_v31  ;;  %v875_v4 = vsel %vm507_vm3, %v874_v40, %v873_v9 }
  0xbe   :  { %v473_v13 = vsub.f32 %v1160_v23, %v277_v11  ;;  %v954_v22 = vrot.slane %v277_v11, 5  ;;  %v892_v27 = vsel %vm507_vm3, %v891_v33, %v890_v7  ;;  %v1894_v43 = vsel %vm1142_vm10, 0.0, %v455_v41 }
  0xbf   :  { %v921_v14 = vsel %vm513_vm4, %v920_v57, %v919_v45  ;;  %v938_v15 = vsel %vm513_vm4, %v937_v29, %v936_v17  ;;  %v400_v31 = vsel %vm399_vm13, %v1657_v19, %v396_v50  ;;  %v281_v45 = vmul.f32 %v1643_v42, %v280_v55 }
  0xc0   :  { %v955_v23 = vsel %vm513_vm4, %v954_v22, %v953_v61  ;;  %v405_v17 = vsel %vm1847_vm8, %v1780_v28, %v400_v31  ;;  %v1907_v20 = vsel %vm1226_vm1, 0.0, %v473_v13  ;;  %v408_v19 = vmul.f32 %v1699_v46, %v1616_v49  ;;  %v184_v9 = vpop.xlane.xlu0 %183 }
  0xc1   :  { %v406_v36 = vmul.f32 %v405_v17, %v322_v63  ;;  %v282_v61 = vadd.f32 %v1643_v42, %v281_v45  ;;  %vm1912_vm10 = vcmp.eq.f32.partialorder %v287_v51, 8.507059e+37  ;;  %v416_v28 = vand.u32 2147483647, %v1616_v49 }
  0xc2   :  { %v409_v11 = vsub.f32 1.0, %v408_v19  ;;  %v418_v55 = vand.u32 2147483648, %v1616_v49  ;;  %vm413_vm6 = vweird.f32 %v1699_v46  ;;  %v294_v7 = vmul.f32 %v1742_v44, %v1645_v47  ;;  %v325_v17 = vpop.xlane.xlu1 %324 }
  0xc3   :  { %v456_v60 = vsub.f32 %v1149_v21, %v406_v36  ;;  %v852_v58 = vrot.slane %v406_v36, 4  ;;  %v876_v0 = vrot.slane %v406_v36, 5  ;;  %v893_v53 = vrot.slane %v406_v36, 6 }
  0xc4   :  { %v286_v50 = vsel %vm285_vm0, %v1643_v42, %v282_v61  ;;  %v410_v54 = vmul.f32 %v1699_v46, %v409_v11  ;;  %vm1932_vm8 = vcmp.eq.f32.partialorder %v416_v28, 8.507059e+37  ;;  %v419_v29 = vor.u32 1.1754944e-38, %v418_v55  ;;  %v187_v11 = vpop.xlane.xlu2 %186 }
  0xc5   :  { %v853_v41 = vsel %vm510_vm14, %v852_v58, %v851_v10  ;;  %v877_v1 = vsel %vm510_vm14, %v876_v0, %v875_v4  ;;  %v894_v21 = vsel %vm510_vm14, %v893_v53, %v892_v27  ;;  %v291_v40 = vsel %vm1912_vm10, %v290_v56, %v286_v50  ;;  %v2412_v53 = vld [vmem:[#allocation2_spill] sm:$0xff] }
  0xc6   :  { %v1940_v33 = vsel %vm1199_vm15, 0.0, %v456_v60  ;;  %v292_v57 = vmul.f32 %v291_v40, %v184_v9  ;;  %v302_v10 = vand.u32 2147483647, %v1645_v47  ;;  %v411_v4 = vadd.f32 %v1699_v46, %v410_v54  ;;  %vm414_vm15 = vmor %vm412_vm5, %vm413_vm6 }
  0xc7   :  { %v295_v13 = vsub.f32 1.0, %v294_v7  ;;  %vm298_vm13 = vweird.f32 %v1645_v47  ;;  %v304_v22 = vand.u32 2147483648, %v1645_v47  ;;  %vm299_vm2 = vweird.f32 %v1742_v44 }
  0xc8   :  { %v474_v27 = vsub.f32 %v1182_v26, %v292_v57  ;;  %v922_v63 = vrot.slane %v292_v57, 2  ;;  %v939_v31 = vrot.slane %v292_v57, 3  ;;  %v956_v45 = vrot.slane %v292_v57, 4  ;;  %vm300_vm0 = vmor %vm298_vm13, %vm299_vm2 }
  0xc9   :  { %v415_v30 = vsel %vm414_vm15, %v1699_v46, %v411_v4  ;;  %v296_v51 = vmul.f32 %v1742_v44, %v295_v13  ;;  %vm1954_vm9 = vcmp.eq.f32.partialorder %v302_v10, 8.507059e+37  ;;  %v305_v19 = vor.u32 1.1754944e-38, %v304_v22 }
  0xca   :  { %v923_v26 = vsel %vm516_vm7, %v922_v63, %v921_v14  ;;  %v940_v36 = vsel %vm516_vm7, %v939_v31, %v938_v15  ;;  %v957_v61 = vsel %vm516_vm7, %v956_v45, %v955_v23  ;;  %vm519_vm10 = vcmask 1047559  }
  0xcb   :  { %vm2411_vm5 = vnez %v2332_v35  ;;  %v420_v46 = vsel %vm1932_vm8, %v419_v29, %v415_v30  ;;  %v297_v24 = vadd.f32 %v1742_v44, %v296_v51  ;;  %v423_v28 = vmul.f32 %v1719_v32, %v1620_v12 }
  0xcc   :  { %v1963_v49 = vsel %vm2411_vm5, 0.0, %v474_v27  ;;  %v421_v60 = vmul.f32 %v420_v46, %v325_v17  ;;  %vm427_vm6 = vweird.f32 %v1620_v12  ;;  %v431_v14 = vand.u32 2147483647, %v1620_v12  ;;  %v328_v17 = vpop.xlane.xlu0 %327  ;;  %v2419_v46 = vld [vmem:[#allocation4_spill] sm:$0xff] }
  0xcd   :  { %v433_v15 = vand.u32 2147483648, %v1620_v12  ;;  %v301_v23 = vsel %vm300_vm0, %v1742_v44, %v297_v24  ;;  %v424_v58 = vsub.f32 1.0, %v423_v28  ;;  %vm428_vm8 = vweird.f32 %v1719_v32 }
  0xce   :  { %v438_v0 = vmul.f32 %v1764_v59, %v1685_v8  ;;  %v457_v50 = vsub.f32 %v2412_v53, %v421_v60  ;;  %v854_v56 = vrot.slane %v421_v60, 3  ;;  %v878_v9 = vrot.slane %v421_v60, 4 }
  0xcf   :  { %v895_v47 = vrot.slane %v421_v60, 5  ;;  %v306_v55 = vsel %vm1954_vm9, %v305_v19, %v301_v23  ;;  %v425_v40 = vmul.f32 %v1719_v32, %v424_v58  ;;  %vm1983_vm13 = vcmp.eq.f32.partialorder %v431_v14, 8.507059e+37 }
  0xd0   :  { %vm442_vm15 = vweird.f32 %v1685_v8  ;;  %v855_v44 = vsel %vm513_vm4, %v854_v56, %v853_v41  ;;  %v879_v42 = vsel %vm513_vm4, %v878_v9, %v877_v1  ;;  %v434_v57 = vor.u32 1.1754944e-38, %v433_v15  ;;  %v2415_v41 = vld [vmem:[#allocation6_spill] sm:$0xff]  ;;  %v2416_v1 = vld [vmem:[#allocation3_spill] sm:$0xff]  ;;  %v2422_v9 = vld [vmem:[#allocation9_spill] sm:$0xff] }
  0xd1   :  { %v896_v7 = vsel %vm513_vm4, %v895_v47, %v894_v21  ;;  %v1993_v29 = vsel %vm1226_vm1, 0.0, %v457_v50  ;;  %v307_v10 = vmul.f32 %v306_v55, %v187_v11  ;;  %v426_v4 = vadd.f32 %v1719_v32, %v425_v40  ;;  %vm429_vm1 = vmor %vm427_vm6, %vm428_vm8 }
  0xd2   :  { %v439_v13 = vsub.f32 1.0, %v438_v0  ;;  %vm443_vm2 = vweird.f32 %v1764_v59  ;;  %v446_v22 = vand.u32 2147483647, %v1685_v8  ;;  %v448_v27 = vand.u32 2147483648, %v1685_v8  ;;  %v1016_v8 = vld [vmem:[%s2290_s0 + $0x18] sm:$0x7] }
  0xd3   :  { %v537_v63 = vrot.slane %v2415_v41, 1  ;;  %v475_v31 = vsub.f32 %v2416_v1, %v307_v10  ;;  %v924_v21 = vrot.slane %v307_v10, 1  ;;  %v941_v45 = vrot.slane %v307_v10, 2  ;;  %vm444_vm6 = vmor %vm442_vm15, %vm443_vm2 }
  0xd4   :  { %v958_v30 = vrot.slane %v307_v10, 3  ;;  %v430_v34 = vsel %vm429_vm1, %v1719_v32, %v426_v4  ;;  %v440_v51 = vmul.f32 %v1764_v59, %v439_v13  ;;  %vm2007_vm9 = vcmp.eq.f32.partialorder %v446_v22, 8.507059e+37 }
  0xd5   :  { %v449_v19 = vor.u32 1.1754944e-38, %v448_v27  ;;  %vm2420_vm0 = vnez %v2419_v46  ;;  %v2016_v28 = vsel %vm519_vm10, %v924_v21, %v923_v26  ;;  %v2019_v12 = vsel %vm519_vm10, %v941_v45, %v940_v36 }
  0xd6   :  { %v2013_v24 = vsel %vm2420_vm0, 0.0, %v475_v31  ;;  %v2022_v32 = vsel %vm519_vm10, %v958_v30, %v957_v61  ;;  %v435_v60 = vsel %vm1983_vm13, %v434_v57, %v430_v34  ;;  %v441_v14 = vadd.f32 %v1764_v59, %v440_v51  ;;  %v331_v57 = vpop.xlane.xlu1 %330 }
  0xd7   :  { %v641_v15 = vrot.slane %v2013_v24, 7  ;;  %v541_v23 = vrot.slane %v2013_v24, 1  ;;  %v436_v58 = vmul.f32 %v435_v60, %v328_v17  ;;  %v538_v26 = vrot.slane %v1858_v5, 1 }
  0xd8   :  { %v539_v36 = vrot.slane %v1907_v20, 1  ;;  %v540_v61 = vrot.slane %v1963_v49, 1  ;;  %v445_v0 = vsel %vm444_vm6, %v1764_v59, %v441_v14  ;;  %v2421_v53 = vrot.slane %v1729_v38, 1 }
  0xd9   :  { %v2043_v56 = vmul.f32 %v537_v63, %v1894_v43  ;;  %v566_v47 = vrot.slane %v2422_v9, 7  ;;  %v458_v11 = vsub.f32 %v1016_v8, %v436_v58  ;;  %v856_v55 = vrot.slane %v436_v58, 2 }
  0xda   :  { %v2040_v50 = vmul.f32 %v2421_v53, %v1833_v52  ;;  %v880_v40 = vrot.slane %v436_v58, 3  ;;  %v897_v54 = vrot.slane %v436_v58, 4  ;;  %v450_v59 = vsel %vm2007_vm9, %v449_v19, %v445_v0 }
  0xdb   :  { %vm685_vm8 = vcmask 122880   ;;  %v2052_v10 = vmul.f32 %v538_v26, %v1940_v33  ;;  %v2055_v4 = vmul.f32 %v539_v36, %v1993_v29  ;;  %v2060_v22 = vsel %vm2411_vm5, 0.0, %v458_v11 }
  0xdc   :  { %v568_v13 = vrot.slane %v2040_v50, 6  ;;  %v857_v27 = vsel %vm516_vm7, %v856_v55, %v855_v44  ;;  %v881_v63 = vsel %vm516_vm7, %v880_v40, %v879_v42  ;;  %v898_v1 = vsel %vm516_vm7, %v897_v54, %v896_v7  ;;  %v1017_v42 = vld [vmem:[%s2290_s0 + $0x1c] sm:$0x7]  ;;  %v2423_v40 = vld [vmem:[#allocation8_spill] sm:$0xff] }
  0xdd   :  { %v451_v31 = vmul.f32 %v450_v59, %v331_v57  ;;  %v2066_v21 = vmul.f32 %v540_v61, %v2060_v22  ;;  %v570_v45 = vrot.slane %v2043_v56, 5  ;;  %v572_v30 = vrot.slane %v2052_v10, 4 }
  0xde   :  { %v574_v34 = vrot.slane %v2055_v4, 3  ;;  %vm681_vm13 = vcmask 130049   ;;  %v703_v35 = vsel %vm504_vm11, %v566_v47, %v1865_v37  ;;  %v486_v44 = vmul.f32 %v1729_v38, %v1833_v52 }
  0xdf   :  { %v459_v7 = vsub.f32 %v1017_v42, %v451_v31  ;;  %v858_v17 = vrot.slane %v451_v31, 1  ;;  %v882_v51 = vrot.slane %v451_v31, 2  ;;  %v899_v18 = vrot.slane %v451_v31, 3 }
  0xe0   :  { %v576_v19 = vrot.slane %v2066_v21, 2  ;;  %v704_v60 = vsel %vm507_vm3, %v568_v13, %v703_v35  ;;  %v487_v14 = vmul.f32 %v2415_v41, %v1894_v43  ;;  %v488_v58 = vmul.f32 %v1858_v5, %v1940_v33 }
  0xe1   :  { %v2087_v26 = vsel %vm519_vm10, %v858_v17, %v857_v27  ;;  %v2090_v36 = vsel %vm519_vm10, %v882_v51, %v881_v63  ;;  %v2093_v61 = vsel %vm519_vm10, %v899_v18, %v898_v1  ;;  %v2097_v0 = vsel %vm2420_vm0, 0.0, %v459_v7 }
  0xe2   :  { %v2100_v53 = vmul.f32 %v641_v15, %v2097_v0  ;;  %v557_v50 = vmul.f32 %v541_v23, %v2097_v0  ;;  %v491_v56 = vmul.f32 %v2013_v24, %v2097_v0  ;;  %v705_v8 = vsel %vm510_vm14, %v570_v45, %v704_v60 }
  0xe3   :  { %v706_v11 = vsel %vm513_vm4, %v572_v30, %v705_v8  ;;  %v489_v55 = vmul.f32 %v1907_v20, %v1993_v29  ;;  %v490_v46 = vmul.f32 %v1963_v49, %v2060_v22  ;;  %v2112_v54 = vrot.slane %v2423_v40, 7 }
  0xe4   :  { %v678_v15 = vrot.slane %v2100_v53, 1  ;;  %v578_v57 = vrot.slane %v557_v50, 1  ;;  %v2115_v23 = vrot.slane %v491_v56, 1  ;;  %v707_v59 = vsel %vm516_vm7, %v574_v34, %v706_v11 }
  0xe5   :  { %v708_v10 = vsel %vm519_vm10, %v576_v19, %v707_v59  ;;  %v2121_v27 = vrot.slane %v486_v44, 6  ;;  %v2123_v63 = vrot.slane %v487_v14, 5  ;;  %v2125_v1 = vrot.slane %v488_v58, 4 }
  0xe6   :  { %v686_v31 = vsel %vm685_vm8, %v678_v15, 0.0  ;;  %v714_v21 = vsel %vm685_vm8, %v578_v57, 0.0  ;;  %v700_v35 = vsel %vm685_vm8, %v2115_v23, 0.0  ;;  %v711_v42 = vsel %vm681_vm13, %v708_v10, 0.0 }
  0xe7   :  { %687 = vadd.xlane.f32.xlu0 %v686_v31  ;;  %715 = vadd.xlane.f32.xlu1 %v714_v21  ;;  %v2134_v7 = vrot.slane %v489_v55, 3  ;;  %v2136_v44 = vrot.slane %v490_v46, 2  ;;  %v689_v17 = vsel %vm504_vm11, %v2112_v54, %v1862_v25  ;;  %v502_v51 = vsel %vm501_vm12, %v2112_v54, %v1862_v25 }
  0xe8   :  { %701 = vadd.xlane.f32.xlu2 %v700_v35  ;;  %v690_v18 = vsel %vm507_vm3, %v2121_v27, %v689_v17  ;;  %v505_v60 = vsel %vm504_vm11, %v2121_v27, %v502_v51  ;;  %vm522_vm5 = vcmask 130048   ;;  %v567_v14 = vsel %vm501_vm12, %v566_v47, %v1865_v37 }
  0xe9   :  { %v691_v58 = vsel %vm510_vm14, %v2123_v63, %v690_v18  ;;  %v508_v50 = vsel %vm507_vm3, %v2123_v63, %v505_v60  ;;  %v569_v56 = vsel %vm504_vm11, %v568_v13, %v567_v14  ;;  %v588_v8 = vrot.slane %v1858_v5, 2 }
  0xea   :  { %v692_v11 = vsel %vm513_vm4, %v2125_v1, %v691_v58  ;;  %v511_v55 = vsel %vm510_vm14, %v2125_v1, %v508_v50  ;;  %v571_v9 = vsel %vm507_vm3, %v570_v45, %v569_v56  ;;  %v589_v37 = vrot.slane %v1907_v20, 2 }
  0xeb   :  { %v693_v47 = vsel %vm516_vm7, %v2134_v7, %v692_v11  ;;  %v514_v46 = vsel %vm513_vm4, %v2134_v7, %v511_v55  ;;  %v573_v13 = vsel %vm510_vm14, %v572_v30, %v571_v9  ;;  %v590_v40 = vrot.slane %v1963_v49, 2 }
  0xec   :  { %v694_v59 = vsel %vm519_vm10, %v2136_v44, %v693_v47  ;;  %v517_v10 = vsel %vm516_vm7, %v2136_v44, %v514_v46  ;;  %v575_v45 = vsel %vm513_vm4, %v574_v34, %v573_v13  ;;  %v591_v31 = vrot.slane %v2013_v24, 2  ;;  %v2426_v13 = vld [vmem:[#allocation5_spill] sm:$0xff] }
  0xed   :  { %v697_v21 = vsel %vm681_vm13, %v694_v59, 0.0  ;;  %v520_v35 = vsel %vm519_vm10, %v2115_v23, %v517_v10  ;;  %v577_v30 = vsel %vm516_vm7, %v576_v19, %v575_v45  ;;  %v2424_v17 = vrot.slane %v2415_v41, 2 }
  0xee   :  { %v523_v18 = vsel %vm522_vm5, %v520_v35, 0.0  ;;  %v579_v60 = vsel %vm519_vm10, %v578_v57, %v577_v30  ;;  %v604_v4 = vmul.f32 %v588_v8, %v1940_v33  ;;  %v605_v34 = vmul.f32 %v589_v37, %v1993_v29 }
  0xef   :  { %v603_v51 = vmul.f32 %v2424_v17, %v1894_v43  ;;  %712 = vadd.xlane.f32.xlu0 %v711_v42  ;;  %698 = vadd.xlane.f32.xlu1 %v697_v21  ;;  %v581_v14 = vsel %vm522_vm5, %v579_v60, 0.0  ;;  %v606_v58 = vmul.f32 %v590_v40, %v2060_v22  ;;  %v607_v19 = vmul.f32 %v591_v31, %v2097_v0 }
  0xf0   :  { %v617_v50 = vsel %vm501_vm12, %v616_v48, %v1879_v6  ;;  %524 = vadd.xlane.f32.xlu2 %v523_v18  ;;  %v618_v57 = vrot.slane %v1854_v3, 6  ;;  %v622_v8 = vrot.slane %v604_v4, 4  ;;  %v624_v11 = vrot.slane %v605_v34, 3  ;;  %v2425_v6 = vld [vmem:[#allocation7_spill] sm:$0xff] }
  0xf1   :  { %v620_v56 = vrot.slane %v603_v51, 5  ;;  %v626_v55 = vrot.slane %v606_v58, 2  ;;  %v628_v42 = vrot.slane %v607_v19, 1  ;;  %v719_v9 = vrot.slane %v1729_v38, 6 }
  0xf2   :  { %v720_v37 = vrot.slane %v2415_v41, 6  ;;  %v619_v47 = vsel %vm504_vm11, %v618_v57, %v617_v50  ;;  %v721_v46 = vrot.slane %v1858_v5, 6  ;;  %v722_v39 = vrot.slane %v1907_v20, 6 }
  0xf3   :  { %v733_v48 = vmul.f32 %v717_v2, %v1844_v16  ;;  %v621_v3 = vsel %vm507_vm3, %v620_v56, %v619_v47  ;;  %v2427_v40 = vrot.slane %v2426_v13, 6  ;;  %v735_v10 = vmul.f32 %v719_v9, %v1833_v52 }
  0xf4   :  { %v736_v45 = vmul.f32 %v720_v37, %v1894_v43  ;;  %v623_v31 = vsel %vm510_vm14, %v622_v8, %v621_v3  ;;  %v737_v21 = vmul.f32 %v721_v46, %v1940_v33  ;;  %v738_v35 = vmul.f32 %v722_v39, %v1993_v29 }
  0xf5   :  { %v734_v59 = vmul.f32 %v2427_v40, %v2425_v6  ;;  %vm764_vm15 = vcmask 130050   ;;  %v625_v30 = vsel %vm513_vm4, %v624_v11, %v623_v31  ;;  %v751_v17 = vrot.slane %v735_v10, 6 }
  0xf6   :  { %v753_v51 = vrot.slane %v736_v45, 5  ;;  %v627_v18 = vsel %vm516_vm7, %v626_v55, %v625_v30  ;;  %v755_v60 = vrot.slane %v737_v21, 4  ;;  %v757_v4 = vrot.slane %v738_v35, 3 }
  0xf7   :  { %v749_v2 = vrot.slane %v734_v59, 7  ;;  %v723_v34 = vrot.slane %v1963_v49, 6  ;;  %582 = vadd.xlane.f32.xlu0 %v581_v14  ;;  %v629_v58 = vsel %vm519_vm10, %v628_v42, %v627_v18  ;;  %v724_v50 = vrot.slane %v2013_v24, 6 }
  0xf8   :  { %vm768_vm2 = vcmask 123904   ;;  %v631_v57 = vsel %vm522_vm5, %v629_v58, 0.0  ;;  %v636_v11 = vrot.slane %v1729_v38, 7  ;;  %v637_v42 = vrot.slane %v2415_v41, 7 }
  0xf9   :  { %v750_v19 = vsel %vm507_vm3, %v749_v2, %v733_v48  ;;  %v739_v8 = vmul.f32 %v723_v34, %v2060_v22  ;;  %632 = vadd.xlane.f32.xlu1 %v631_v57  ;;  %v740_v14 = vmul.f32 %v724_v50, %v2097_v0  ;;  %v638_v9 = vrot.slane %v1858_v5, 7 }
  0xfa   :  { %v752_v56 = vsel %vm510_vm14, %v751_v17, %v750_v19  ;;  %v639_v47 = vrot.slane %v1907_v20, 7  ;;  %v2428_v46 = vrot.slane %v1797_v62, 7  ;;  %v2429_v3 = vrot.slane %v2426_v13, 7 }
  0xfb   :  { %v754_v55 = vsel %vm513_vm4, %v753_v51, %v752_v56  ;;  %v759_v37 = vrot.slane %v739_v8, 2  ;;  %v760_v48 = vrot.slane %v740_v14, 1  ;;  %v652_v41 = vmul.f32 %v636_v11, %v1833_v52 }
  0xfc   :  { %v756_v24 = vsel %vm516_vm7, %v755_v60, %v754_v55  ;;  %v650_v39 = vmul.f32 %v2428_v46, %v1844_v16  ;;  %v651_v0 = vmul.f32 %v2429_v3, %v2425_v6  ;;  %v653_v40 = vmul.f32 %v637_v42, %v1894_v43 }
  0xfd   :  { %v758_v38 = vsel %vm519_vm10, %v757_v4, %v756_v24  ;;  %v654_v59 = vmul.f32 %v638_v9, %v1940_v33  ;;  %v655_v20 = vmul.f32 %v639_v47, %v1993_v29  ;;  %v761_v62 = vsel %vm501_vm12, %v760_v48, %v759_v37 }
  0xfe   :  { %v765_v5 = vsel %vm764_vm15, %v758_v38, 0.0  ;;  %v666_v16 = vrot.slane %v651_v0, 7  ;;  %v668_v10 = vrot.slane %v652_v41, 6  ;;  %v640_v45 = vrot.slane %v1963_v49, 7 }
  0xff   :  { %766 = vadd.xlane.f32.xlu2 %v765_v5  ;;  %v769_v13 = vsel %vm768_vm2, %v761_v62, 0.0  ;;  %v670_v6 = vrot.slane %v653_v40, 5  ;;  %v672_v31 = vrot.slane %v654_v59, 4  ;;  %v674_v52 = vrot.slane %v655_v20, 3 }
 0x100   :  { %770 = vadd.xlane.f32.xlu0 %v769_v13  ;;  %v772_v21 = vsel %vm507_vm3, %v666_v16, %v650_v39  ;;  %v656_v43 = vmul.f32 %v640_v45, %v2060_v22  ;;  %v667_v33 = vsel %vm504_vm11, %v666_v16, %v650_v39  ;;  %v786_v29 = vsel %vm507_vm3, %v2112_v54, %v1862_v25 }
 0x101   :  { %v773_v35 = vsel %vm510_vm14, %v668_v10, %v772_v21  ;;  %v669_v49 = vsel %vm507_vm3, %v668_v10, %v667_v33  ;;  %v787_v30 = vsel %vm510_vm14, %v2121_v27, %v786_v29  ;;  %v791_v2 = vsel %vm501_vm12, %v2115_v23, %v2136_v44 }
 0x102   :  { %v774_v17 = vsel %vm513_vm4, %v670_v6, %v773_v35  ;;  %v671_v22 = vsel %vm510_vm14, %v670_v6, %v669_v49  ;;  %v676_v51 = vrot.slane %v656_v43, 2  ;;  %v788_v18 = vsel %vm513_vm4, %v2123_v63, %v787_v30 }
 0x103   :  { %v775_v25 = vsel %vm516_vm7, %v672_v31, %v774_v17  ;;  %v673_v54 = vsel %vm513_vm4, %v672_v31, %v671_v22  ;;  %v789_v60 = vsel %vm516_vm7, %v2125_v1, %v788_v18  ;;  %v797_v19 = vsel %vm768_vm2, %v791_v2, 0.0 }
 0x104   :  { %v776_v27 = vsel %vm519_vm10, %v674_v52, %v775_v25  ;;  %v675_v4 = vsel %vm516_vm7, %v674_v52, %v673_v54  ;;  %v790_v23 = vsel %vm519_vm10, %v2134_v7, %v789_v60  ;;  %v777_v44 = vsel %vm501_vm12, %v678_v15, %v676_v51 }
 0x105   :  { %v780_v63 = vsel %vm764_vm15, %v776_v27, 0.0  ;;  %v677_v34 = vsel %vm519_vm10, %v676_v51, %v675_v4  ;;  %v794_v1 = vsel %vm764_vm15, %v790_v23, 0.0  ;;  %v783_v7 = vsel %vm768_vm2, %v777_v44, 0.0 }
 0x106   :  { %781 = vadd.xlane.f32.xlu1 %v780_v63  ;;  %v682_v58 = vsel %vm681_vm13, %v677_v34, 0.0  ;;  %v800_v57 = vlaneseq  ;;  %vm823_vm1 = vcmask 1040384   ;;  %vm863_vm6 = vcmask 1045504  }
 0x107   :  { %683 = vadd.xlane.f32.xlu2 %v682_v58 }
 0x108   :  { %795 = vadd.xlane.f32.xlu0 %v794_v1  ;;  %v801_v11 = vand.u32 127, %v800_v57 }
 0x10a   :  { %vm802_vm12 = vcmp.eq.s32.totalorder %v801_v11, 0  ;;  %vm804_vm11 = vcmp.eq.s32.totalorder %v801_v11, 1  ;;  %vm806_vm3 = vcmp.eq.s32.totalorder %v801_v11, 2  ;;  %vm808_vm14 = vcmp.eq.s32.totalorder %v801_v11, 3 }
 0x10b   :  { %vm814_vm4 = vcmp.eq.s32.totalorder %v801_v11, 4  ;;  %vm817_vm7 = vcmp.eq.s32.totalorder %v801_v11, 5  ;;  %vm820_vm10 = vcmp.eq.s32.totalorder %v801_v11, 6  ;;  %vm831_vm9 = vcmp.eq.s32.totalorder %v801_v11, 7 }
 0x10c   :  { %vm834_vm0 = vcmp.eq.s32.totalorder %v801_v11, 8  ;;  %vm837_vm8 = vcmp.eq.s32.totalorder %v801_v11, 9  ;;  %vm869_vm13 = vcmp.eq.s32.totalorder %v801_v11, 10  ;;  %vm886_vm15 = vcmp.eq.s32.totalorder %v801_v11, 11 }
 0x10d   :  { %vm903_vm2 = vcmp.eq.s32.totalorder %v801_v11, 12 }
 0x10e   :  { %798 = vadd.xlane.f32.xlu1 %v797_v19 }
 0x10f   :  { %784 = vadd.xlane.f32.xlu2 %v783_v7 }
 0x15a   :  { %v688_v53 = vpop.xlane.xlu0 %687  ;;  %v716_v50 = vpop.xlane.xlu1 %715 }
 0x15b   :  { %v702_v15 = vpop.xlane.xlu2 %701 }
 0x162   :  { %v713_v56 = vpop.xlane.xlu0 %712  ;;  %v699_v8 = vpop.xlane.xlu1 %698 }
 0x163   :  { %v525_v55 = vpop.xlane.xlu2 %524 }
 0x164   :  { %v803_v14 = vsel %vm802_vm12, %v525_v55, 0.0  ;;  %vm928_vm12 = vcmp.eq.s32.totalorder %v801_v11, 13 }
 0x16a   :  { %v583_v42 = vpop.xlane.xlu0 %582 }
 0x16b   :  { %v805_v9 = vsel %vm804_vm11, %v583_v42, %v803_v14  ;;  %vm945_vm11 = vcmp.eq.s32.totalorder %v801_v11, 14 }
 0x16c   :  { %v633_v24 = vpop.xlane.xlu1 %632 }
 0x16d   :  { %v807_v37 = vsel %vm806_vm3, %v633_v24, %v805_v9 }
 0x16e   :  { %v810_v47 = vrot.slane %v807_v37, 7 }
 0x170   :  { %v813_v38 = vsel %vm808_vm14, %v688_v53, %v810_v47 }
 0x171   :  { %v816_v48 = vsel %vm814_vm4, %v702_v15, %v813_v38 }
 0x172   :  { %v767_v46 = vpop.xlane.xlu2 %766  ;;  %v819_v41 = vsel %vm817_vm7, %v716_v50, %v816_v48 }
 0x173   :  { %v771_v39 = vpop.xlane.xlu0 %770  ;;  %v825_v62 = vrot.slane %v819_v41, 7 }
 0x179   :  { %v782_v3 = vpop.xlane.xlu1 %781 }
 0x17a   :  { %v684_v0 = vpop.xlane.xlu2 %683 }
 0x17b   :  { %v812_v5 = vsel %vm808_vm14, %v684_v0, %v810_v47  ;;  %v796_v16 = vpop.xlane.xlu0 %795 }
 0x17c   :  { %v815_v40 = vsel %vm814_vm4, %v699_v8, %v812_v5 }
 0x17d   :  { %v818_v59 = vsel %vm817_vm7, %v713_v56, %v815_v40 }
 0x17e   :  { %v824_v20 = vrot.slane %v818_v59, 7 }
 0x180   :  { %v829_v10 = vsel %vm820_vm10, %v767_v46, %v824_v20  ;;  %v826_v45 = vsel %vm823_vm1, %v824_v20, %v825_v62 }
 0x181   :  { %v832_v13 = vsel %vm831_vm9, %v782_v3, %v829_v10  ;;  %v799_v6 = vpop.xlane.xlu1 %798  ;;  %v830_v31 = vsel %vm820_vm10, %v771_v39, %v826_v45 }
 0x182   :  { %v835_v52 = vsel %vm834_vm0, %v796_v16, %v832_v13  ;;  %v785_v21 = vpop.xlane.xlu2 %784 }
 0x183   :  { %v864_v43 = vrot.slane %v835_v52, 2  ;;  %v833_v33 = vsel %vm831_vm9, %v785_v21, %v830_v31 }
 0x184   :  { %v836_v29 = vsel %vm834_vm0, %v799_v6, %v833_v33 }
 0x185   :  { %v865_v35 = vrot.slane %v836_v29, 2 }
 0x187   :  { %v866_v49 = vsel %vm863_vm6, %v864_v43, %v865_v35 }
 0x188   :  { %v868_v30 = vsel %vm837_vm8, %v2087_v26, %v866_v49 }
 0x189   :  { %v885_v2 = vsel %vm869_vm13, %v2090_v36, %v868_v30 }
 0x18a   :  { %v902_v17 = vsel %vm886_vm15, %v2093_v61, %v885_v2 }
 0x18b   :  { %v927_v22 = vsel %vm903_vm2, %v2016_v28, %v902_v17 }
 0x18c   :  { %v944_v51 = vsel %vm928_vm12, %v2019_v12, %v927_v22 }
 0x18d   :  { %v961_v18 = vsel %vm945_vm11, %v2022_v32, %v944_v51 }
 0x18e   :  { %962 = vst.msk [vmem:[%s2291_s2] sm:$0xff] %vm522_vm5, %v961_v18 }

// kernel: custom-call.22
= control target key start
LH: loop header
LB: loop body
LE: loop exit
PB: predicated region body
PF: predicated region fallthrough
CT: control target
= control target key end

     0   :  { %s1764_s30 = smov 0   ;;  %s1766_s10 = smov 0   ;;  %s2097_s0 = inlined_call_operand.vmem [shape: f32[2,2,2], index: 0, kind: input, shape index: {}]   ;;  %s2098_s1 = inlined_call_operand.vmem [shape: f32[2,2,2], index: 1, kind: input, shape index: {}]   ;;  %s2099_s2 = inlined_call_operand.vmem [shape: f32[2,2,2], index: 2, kind: input, shape index: {}]   ;;  %s2100_s3 = inlined_call_operand.vmem [shape: f32[2,2,2], index: 3, kind: input, shape index: {}]   ;;  %s2101_s4 = inlined_call_operand.vmem [shape: f32[2,2], index: 4, kind: output, shape index: {0}]   ;;  %s2102_s5 = inlined_call_operand.vmem [shape: f32[2,2], index: 5, kind: output, shape index: {1}]   ;;  %s2103_s6 = inlined_call_operand.vmem [shape: f32[2,2,2], index: 6, kind: output, shape index: {2}]   ;;  %s2104_s7 = inlined_call_operand.vmem [shape: f32[2,2,2], index: 7, kind: output, shape index: {3}]   ;;  %s2105_s8 = inlined_call_operand.vmem [shape: f32[2,2,2], index: 8, kind: output, shape index: {4}]   ;;  %s2106_s9 = inlined_call_operand.vmem [shape: f32[2,2,2], index: 9, kind: output, shape index: {5}]  }
   0x1   :  { %s1768_s11 = smov 0  }
   0x2 LB: > { %s1780_s12 = sadd.s32 4294967295, %s1701_s11   ;;  %s1783_s13 = sadd.s32 1, %s1701_s11   ;;  %s1701_s11 = sphi %s1768_s11, %s2123_s11   ;;  %s1697_s10 = sphi %s1766_s10, %s2122_s10   ;;  %s1693_s30 = sphi %s1764_s30, %s2121_s30  }
   0x3   : > { %s20_s14 = sshrl.u32 %s1701_s11, 3  ;;  %s21_s15 = sshrl.u32 %s1783_s13, 3 }
   0x4   : > { %s22_s16 = ssub.s32 %s20_s14, %s21_s15  ;;  %s25_s17 = sadd.s32 1, %s1697_s10 }
   0x5   : > { %p23_p0 = scmp.eq.s32.totalorder %s22_s16, 0  ;;  %p35_p1 = scmp.ne.s32.totalorder %s1697_s10, %s1693_s30 }
   0x6   : > { %p36_p2 = scmp.eq.s32.totalorder %s1780_s12, 1  ;;  %p1562_p4 = scmp.ge.s32.totalorder %s1701_s11, 2 }
   0x7   : > { %s1792_s18 = scalar_select %p23_p0, %s1697_s10, %s25_s17  }
   0x8   : > { %p1794_p3 = por %p36_p2, %p35_p1  ;;  %86 = sbr.rel (%p1562_p4) target bundleno = 18 (0x12), region = 16 }
   0x9   : > { %2107 = sst [smem:[#allocation33_spill]] %s1792_s18  ;;  %s88_s20 = sand.u32 (!%p1562_p4), 1, %s1701_s11  }
   0xa   : > { %s1564_s21 = sshll.u32 (!%p1562_p4), %s1701_s11, 1  ;;  %s1563_s22 = sshll.u32 (!%p1562_p4), %s88_s20, 1 }
   0xb   : > { %s92_s25 = scalar_lea.vmem (!%p1562_p4), %s2097_s0, %s1564_s21  ;;  %s90_s26 = scalar_lea.vmem (!%p1562_p4), [#allocation1], %s1563_s22 }
   0xc   : > { %s131_s29 = scalar_lea.vmem (!%p1562_p4), %s2098_s1, %s1564_s21  ;;  %s170_s16 = scalar_lea.vmem (!%p1562_p4), %s2099_s2, %s1564_s21 }
   0xd   : > { %v109_v0 = vld [vmem:[%s92_s25] sm:$0x3]  ;;  %s129_s17 = scalar_lea.vmem [#allocation3], %s1563_s22  ;;  %s209_s23 = scalar_lea.vmem %s2100_s3, %s1564_s21 }
   0xe   : > { %110 = vst [vmem:[%s90_s26] sm:$0x3] %v109_v0  ;;  %v148_v1 = vld [vmem:[%s131_s29] sm:$0x3]  ;;  %s168_s24 = scalar_lea.vmem [#allocation5], %s1563_s22  ;;  %s207_s25 = scalar_lea.vmem [#allocation7], %s1563_s22 }
   0xf   : > { %149 = vst [vmem:[%s129_s17] sm:$0x3] %v148_v1  ;;  %v187_v2 = vld [vmem:[%s170_s16] sm:$0x3] }
  0x10   : > { %188 = vst [vmem:[%s168_s24] sm:$0x3] %v187_v2  ;;  %v226_v3 = vld [vmem:[%s209_s23] sm:$0x3] }
  0x11   : > { %227 = vst [vmem:[%s207_s25] sm:$0x3] %v226_v3 }
  0x12 PF: > { %p1571_p5 = scmp.ge.s32.totalorder %s1701_s11, 1  ;;  %p244_p6 = scmp.lt.s32.totalorder %s1701_s11, 3 }
  0x14   : > { %p245_p7 = pnand %p1571_p5, %p244_p6 }
  0x16   : > { %248 = sbr.rel (%p245_p7) target bundleno = 952 (0x3b8), region = 140 }
  0x1b   : > { %s267_s26 = sand.u32 1, %s1780_s12   ;;  %s285_s27 = sand.u32 1, %s1693_s30   ;;  %v345_v4 = vlaneseq  ;;  %v1711_v5 = vmov 0.0  }
  0x1c   : > { %s1817_s28 = sshll.u32 %s267_s26, 1  ;;  %s1819_s18 = sshll.u32 %s285_s27, 1  ;;  %340 = vst [vmem:[#allocation12] sm:$0xff] %v1711_v5 }
  0x1d   : > { %341 = vst [vmem:[#allocation14] sm:$0xff] %v1711_v5  ;;  %v1821_v6 = vand.u32 127, %v345_v4  ;;  %v1823_v7 = vshrl.u32 %v345_v4, 7  ;;  %s269_s11 = scalar_lea.vmem [#allocation1], %s1817_s28  ;;  %s273_s21 = scalar_lea.vmem [#allocation3], %s1817_s28 }
  0x1e   : > { %v312_v8 = vld [vmem:[%s269_s11] sm:$0x3]  ;;  %v316_v9 = vld [vmem:[%s273_s21] sm:$0x3]  ;;  %s277_s30 = scalar_lea.vmem [#allocation5], %s1817_s28  ;;  %s281_s22 = scalar_lea.vmem [#allocation7], %s1817_s28 }
  0x1f   : > { %313 = vst [vmem:[#allocation0] sm:$0x3] %v312_v8  ;;  %v320_v10 = vld [vmem:[%s277_s30] sm:$0x3]  ;;  %v324_v11 = vld [vmem:[%s281_s22] sm:$0x3]  ;;  %v347_v6 = vmov %v1821_v6  ;;  %v350_v7 = vmov %v1823_v7 }
  0x20   : > { %317 = vst [vmem:[#allocation2] sm:$0x3] %v316_v9  ;;  %s328_s29 = smov [#allocation20]  ;;  %s344_s14 = smov [#allocation12]  ;;  %vm354_vm0 = vcmp.eq.s32.totalorder %v350_v7, %v347_v6  ;;  %v360_v6 = vmov %v1821_v6  ;;  %v363_v7 = vmov %v1823_v7  ;;  %vm1451_vm2 = vcmp.lt.s32.totalorder %v1821_v6, 2 }
  0x21   : > { %321 = vst [vmem:[#allocation4] sm:$0x3] %v320_v10  ;;  %s331_s15 = smov [#allocation21]  ;;  %s334_s16 = smov [#allocation22]  ;;  %vm367_vm1 = vcmp.eq.s32.totalorder %v363_v7, %v360_v6  ;;  %v1443_v6 = vmov %v1821_v6  ;;  %v1446_v7 = vmov %v1823_v7 }
  0x22   : > { %325 = vst [vmem:[#allocation6] sm:$0x3] %v324_v11  ;;  %s337_s17 = smov [#allocation23]  ;;  %s357_s20 = smov [#allocation18]  ;;  %v1460_v6 = vmov %v1821_v6  ;;  %v1463_v7 = vmov %v1823_v7  ;;  %vm1456_vm3 = vcmp.eq.s32.totalorder %v1446_v7, %v1443_v6 }
  0x23   : > { %342 = vst [vmem:[#allocation16] sm:$0xff] %v1711_v5  ;;  %v351_v12 = vld [vmem:[%s344_s14] sm:$0x3]  ;;  %s297_s25 = scalar_lea.vmem [#allocation13], %s1817_s28  ;;  %s1447_s21 = smov [#allocation20]  ;;  %v1477_v6 = vmov %v1821_v6  ;;  %v1480_v7 = vmov %v1823_v7 }
  0x24   : > { %343 = vst [vmem:[#allocation18] sm:$0xff] %v1711_v5  ;;  %v355_v16 = vsel %vm354_vm0, 1.0, %v351_v12  ;;  %s1464_s30 = smov [#allocation21]  ;;  %s1481_s22 = smov [#allocation22]  ;;  %v1494_v6 = vmov %v1821_v6  ;;  %v1497_v7 = vmov %v1823_v7 }
  0x25   : > { %356 = vst [vmem:[%s344_s14] sm:$0x3] %v355_v16  ;;  %vm1507_vm4 = vcmp.eq.s32.totalorder %v1497_v7, %v1494_v6 }
  0x26   : > { %v329_v13 = vld [vmem:[#allocation0] sm:$0xff] }
  0x27   : > { %330 = vst [vmem:[%s328_s29] sm:$0xff] %v329_v13  ;;  %v332_v14 = vld [vmem:[#allocation2] sm:$0xff]  ;;  %s1498_s29 = smov [#allocation23] }
  0x28   : > { %333 = vst [vmem:[%s331_s15] sm:$0xff] %v332_v14  ;;  %v335_v15 = vld [vmem:[#allocation4] sm:$0xff] }
  0x29   : > { %336 = vst [vmem:[%s334_s16] sm:$0xff] %v335_v15  ;;  %v338_v17 = vld [vmem:[#allocation6] sm:$0xff] }
  0x2a   : > { %339 = vst [vmem:[%s337_s17] sm:$0xff] %v338_v17 }
  0x2b   : > { %v364_v18 = vld [vmem:[%s357_s20] sm:$0x3] }
  0x2c   : > { %v368_v19 = vsel %vm367_vm1, 1.0, %v364_v18 }
  0x2d   : > { %369 = vst [vmem:[%s357_s20] sm:$0x3] %v368_v19 }
  0x2e   : > { %v1453_v20 = vld [vmem:[%s1447_s21] sm:$0x3] }
  0x2f   : > { %v1470_v21 = vld [vmem:[%s1464_s30] sm:$0x3]  ;;  %v1454_v22 = vsel %vm1451_vm2, %v1453_v20, 0.0 }
  0x30   : > { %v1471_v23 = vsel %vm1451_vm2, %v1470_v21, 0.0  ;;  %v1487_v24 = vld [vmem:[%s1481_s22] sm:$0x3]  ;;  %v1455_v26 = vmul.f32 %v1454_v22, %v1454_v22 }
  0x31   : > { %v1504_v25 = vld [vmem:[%s1498_s29] sm:$0x3]  ;;  %v1472_v27 = vmul.f32 %v1471_v23, %v1471_v23  ;;  %v1488_v28 = vsel %vm1451_vm2, %v1487_v24, 0.0 }
  0x32   : > { %v1505_v29 = vsel %vm1451_vm2, %v1504_v25, 0.0  ;;  %v1489_v30 = vmul.f32 %v1488_v28, %v1488_v28  ;;  %v1457_v33 = vsel %vm1456_vm3, 0.0, %v1455_v26 }
  0x33   : > { %v1474_v31 = vadd.f32 %v1472_v27, %v1455_v26  ;;  %v1506_v32 = vmul.f32 %v1505_v29, %v1505_v29  ;;  %v1473_v35 = vadd.f32 %v1472_v27, %v1457_v33 }
  0x35   : > { %v1491_v34 = vadd.f32 %v1489_v30, %v1474_v31  ;;  %v1490_v37 = vadd.f32 %v1489_v30, %v1473_v35  ;;  %v1508_v38 = vsel %vm1507_vm4, 0.0, %v1506_v32 }
  0x37   : > { %v1510_v36 = vadd.f32 %v1506_v32, %v1491_v34  ;;  %v1509_v39 = vadd.f32 %v1508_v38, %v1490_v37 }
  0x39   : > { %1511 = vadd.xlane.f32.xlu0 %v1510_v36 }
  0x41   : > { %1519 = vadd.xlane.f32.xlu0 %v1509_v39 }
  0xac   : > { %v1512_v40 = vpop.xlane.xlu0 %1511 }
  0xad   : > { %v1513_v41 = vrot.slane %v1512_v40, 4 }
  0xaf   : > { %v1514_v42 = vadd.f32 %v1513_v41, %v1512_v40 }
  0xb1   : > { %v1515_v43 = vrot.slane %v1514_v42, 2 }
  0xb3   : > { %v1516_v47 = vadd.f32 %v1515_v43, %v1514_v42 }
  0xb4   : > { %v1520_v44 = vpop.xlane.xlu0 %1519 }
  0xb5   : > { %v1521_v45 = vrot.slane %v1520_v44, 4  ;;  %v1517_v50 = vrot.slane %v1516_v47, 1 }
  0xb7   : > { %v1522_v46 = vadd.f32 %v1521_v45, %v1520_v44  ;;  %v1518_v53 = vadd.f32 %v1517_v50, %v1516_v47 }
  0xb9   : > { %v1523_v48 = vrot.slane %v1522_v46, 2 }
  0xbb   : > { %v1524_v49 = vadd.f32 %v1523_v48, %v1522_v46 }
  0xbd   : > { %v1525_v51 = vrot.slane %v1524_v49, 1 }
  0xbf   : > { %v1526_v52 = vadd.f32 %v1525_v51, %v1524_v49 }
  0xc1   : > { %1612 = vpush %v1526_v52 }
  0xc2   : > { %1614 = vpush %v1518_v53 }
  0xf2   : > { %s1613_s14 = spop %1612 }
  0xf3   : > { %s1615_s15 = spop %1614 }
  0xf4   : > { %s1529_s16 = smul.f32 1e-10, %s1615_s15 }
  0xf6   : > { %p1530_p8 = scmp.le.f32.partialorder %s1613_s14, %s1529_s16 }
  0xf7   : > { %s1856_s17 = smov (!%p1530_p8), 0  }
  0xf8   : > { %1533 = sbr.rel (%p1530_p8) target bundleno = 906 (0x38a), region = 467 }
  0xfd LB: >> { %s1861_s20 = smov 0   ;;  %s1705_s17 = sphi %s1856_s17, %s2109_s17  }
  0xfe LB: >>> { %s474_s21 = smov [#allocation20]  ;;  %v478_v6 = vmov %v1821_v6  ;;  %v481_v7 = vmov %v1823_v7  ;;  %s494_s30 = smov [#allocation21]  ;;  %s1709_s20 = sphi %s1861_s20, %s473_s20  }
  0xff   : >>> { %v498_v6 = vmov %v1821_v6  ;;  %v501_v7 = vmov %v1823_v7  ;;  %v482_v54 = vld [vmem:[%s474_s21] sm:$0x3]  ;;  %vm485_vm5 = vcmp.eq.s32.totalorder %v481_v7, %v478_v6  ;;  %s514_s22 = smov [#allocation23]  ;;  %s475_s29 = smov [#allocation24] }
 0x100   : >>> { %vm505_vm6 = vcmp.eq.s32.totalorder %v501_v7, %v498_v6  ;;  %v518_v6 = vmov %v1821_v6  ;;  %v521_v7 = vmov %v1823_v7  ;;  %v486_v55 = vsel %vm485_vm5, %v482_v54, 0.0  ;;  %v502_v56 = vld [vmem:[%s494_s30] sm:$0x3]  ;;  %s495_s14 = smov [#allocation25]  ;;  %s515_s15 = smov [#allocation26] }
 0x101   : >>> { %vm525_vm7 = vcmp.eq.s32.totalorder %v521_v7, %v518_v6  ;;  %v487_v57 = vrot.slane %v486_v55, 4  ;;  %v506_v58 = vsel %vm505_vm6, %v502_v56, 0.0  ;;  %v522_v59 = vld [vmem:[%s514_s22] sm:$0x3]  ;;  %s538_s16 = smov [#allocation25]  ;;  %s536_s21 = smov [#allocation24]  ;;  %v627_v6 = vmov %v1821_v6 }
 0x102   : >>> { %v507_v60 = vrot.slane %v506_v58, 4  ;;  %v526_v61 = vsel %vm525_vm7, %v522_v59, 0.0  ;;  %s540_s30 = smov [#allocation26]  ;;  %s615_s22 = smov [#allocation27]  ;;  %v630_v7 = vmov %v1823_v7 }
 0x103   : >>> { %v488_v62 = vadd.f32 %v487_v57, %v486_v55  ;;  %v527_v63 = vrot.slane %v526_v61, 4  ;;  %s1887_s24 = smov [#allocation12]  ;;  %s1889_s23 = smov [#allocation14] }
 0x104   : >>> { %v508_v0 = vadd.f32 %v507_v60, %v506_v58  ;;  %s1894_s11 = smov [#allocation16]  ;;  %s879_s27 = smov [#allocation32] }
 0x105   : >>> { %v489_v1 = vrot.slane %v488_v62, 2  ;;  %v528_v2 = vadd.f32 %v527_v63, %v526_v61  ;;  %s1897_s26 = smov [#allocation18]  ;;  %s473_s20 = sadd.s32 1, %s1709_s20  }
 0x106   : >>> { %v509_v3 = vrot.slane %v508_v0, 2  ;;  %p470_p9 = scmp.ge.s32.totalorder %s473_s20, 3  }
 0x107   : >>> { %v490_v4 = vadd.f32 %v489_v1, %v488_v62  ;;  %v529_v5 = vrot.slane %v528_v2, 2 }
 0x108   : >>> { %v510_v8 = vadd.f32 %v509_v3, %v508_v0 }
 0x109   : >>> { %v491_v9 = vrot.slane %v490_v4, 1  ;;  %v530_v10 = vadd.f32 %v529_v5, %v528_v2 }
 0x10a   : >>> { %v511_v11 = vrot.slane %v510_v8, 1 }
 0x10b   : >>> { %v492_v12 = vadd.f32 %v491_v9, %v490_v4  ;;  %v531_v13 = vrot.slane %v530_v10, 1 }
 0x10c   : >>> { %v512_v14 = vadd.f32 %v511_v11, %v510_v8 }
 0x10d   : >>> { %493 = vst [vmem:[%s475_s29] sm:$0x1] %v492_v12  ;;  %v532_v15 = vadd.f32 %v531_v13, %v530_v10  ;;  %s617_s29 = smov [#allocation28] }
 0x10e   : >>> { %513 = vst [vmem:[%s495_s14] sm:$0x1] %v512_v14  ;;  %s534_s14 = smov [#allocation29] }
 0x10f   : >>> { %533 = vst [vmem:[%s515_s15] sm:$0x1] %v532_v15  ;;  %s535_s15 = smov [#allocation30]  ;;  %s619_s14 = smov %s534_s14 }
 0x110   : >>> { %s621_s15 = smov %s535_s15 }
 0x114   : >>> { %v537_v23 = vld [vmem:[%s536_s21] sm:$0xff]  ;;  %s638_s21 = smov [#allocation30] }
 0x115   : >>> { %v1872_v16 = vld [vmem:[%s538_s16] sm:$0xff]  ;;  %v591_v47 = vand.u32 2147483647, %v537_v23  ;;  %s623_s16 = smov [#allocation29] }
 0x116   : >>> { %v543_v17 = vmul.f32 2.0, %v1872_v16  ;;  %v541_v24 = vld [vmem:[%s540_s30] sm:$0xff]  ;;  %v592_v55 = vand.u32 2147483647, %v1872_v16  ;;  %s636_s30 = smov [#allocation31] }
 0x117   : >>> { %v542_v27 = vsub.f32 %v541_v24, %v537_v23  ;;  %v593_v48 = vand.u32 2147483647, %v541_v24 }
 0x118   : >>> { %1663 = vrcp.f32 %v543_v17  ;;  %v555_v20 = vand.u32 2147483648, %v543_v17  ;;  %vm549_vm8 = vweird.f32 %v543_v17  ;;  %v553_v22 = vand.u32 2147483647, %v543_v17 }
 0x119   : >>> { %v594_v50 = vmin.f32 %v591_v47, %v593_v48 }
 0x11a   : >>> { %v556_v26 = vor.u32 1.1754944e-38, %v555_v20  ;;  %vm554_vm11 = vcmp.eq.f32.partialorder %v553_v22, 8.507059e+37 }
 0x11b   : >>> { %v595_v56 = vmul.f32 1.1920929e-08, %v594_v50 }
 0x11d   : >>> { %vm596_vm4 = vcmp.le.f32.partialorder %v592_v55, %v595_v56 }
 0x11e   : >>> { %v1664_v18 = vpop.eup %1663 }
 0x11f   : >>> { %v545_v19 = vmul.f32 %v1664_v18, %v543_v17  ;;  %vm550_vm9 = vweird.f32 %v1664_v18 }
 0x120   : >>> { %vm551_vm10 = vmor %vm549_vm8, %vm550_vm9  ;;  %vm632_vm8 = vcmp.eq.s32.totalorder %v630_v7, %v627_v6  ;;  %v642_v6 = vmov %v1821_v6  ;;  %v645_v7 = vmov %v1823_v7 }
 0x121   : >>> { %v546_v21 = vsub.f32 1.0, %v545_v19  ;;  %vm647_vm9 = vcmp.eq.s32.totalorder %v645_v7, %v642_v6  ;;  %v713_v6 = vmov %v1821_v6 }
 0x122   : >>> { %v754_v6 = vmov %v1821_v6 }
 0x123   : >>> { %v547_v25 = vmul.f32 %v1664_v18, %v546_v21  ;;  %v740_v6 = vmov %v1821_v6 }
 0x125   : >>> { %v548_v28 = vadd.f32 %v1664_v18, %v547_v25 }
 0x127   : >>> { %v552_v29 = vsel %vm551_vm10, %v1664_v18, %v548_v28  ;;  %v887_v28 = vld [vmem:[%s1894_s11] sm:$0x3]  ;;  %vm837_vm10 = vcmp.eq.s32.totalorder %v1823_v7, 0 }
 0x128   : >>> { %v557_v30 = vsel %vm554_vm11, %v556_v26, %v552_v29  ;;  %vm849_vm11 = vcmp.eq.s32.totalorder %v1823_v7, 1  ;;  %v716_v7 = vmov %v1823_v7 }
 0x129   : >>> { %v558_v31 = vmul.f32 %v557_v30, %v542_v27  ;;  %v757_v7 = vmov %v1823_v7 }
 0x12a   : >>> { %v743_v7 = vmov %v1823_v7 }
 0x12b   : >>> { %v560_v32 = vmul.f32 %v558_v31, %v558_v31  ;;  %vm559_vm14 = vcmp.ge.f32.partialorder %v558_v31, 0.0 }
 0x12d   : >>> { %v561_v33 = vadd.f32 1.0, %v560_v32 }
 0x12f   : >>> { %1665 = vrsqrt.f32 %v561_v33  ;;  %vm569_vm12 = vcmp.eq.f32.partialorder %v561_v33, inf  ;;  %v572_v40 = vand.u32 2147483648, %v561_v33  ;;  %vm571_vm13 = vcmp.eq.f32.partialorder %v561_v33, 0.0 }
 0x135   : >>> { %v1666_v34 = vpop.eup %1665 }
 0x136   : >>> { %v563_v35 = vmul.f32 %v1666_v34, %v561_v33 }
 0x138   : >>> { %v564_v36 = vmul.f32 %v1666_v34, %v563_v35 }
 0x13a   : >>> { %v565_v37 = vmul.f32 0.5, %v564_v36 }
 0x13c   : >>> { %v566_v38 = vsub.f32 1.5, %v565_v37 }
 0x13e   : >>> { %v567_v39 = vmul.f32 %v1666_v34, %v566_v38 }
 0x140   : >>> { %v568_v41 = vmul.f32 %v567_v39, %v561_v33 }
 0x142   : >>> { %v570_v42 = vsel %vm569_vm12, %v561_v33, %v568_v41  ;;  %v888_v33 = vld [vmem:[%s1897_s26] sm:$0x3]  ;;  %vm721_vm12 = vcmp.eq.s32.totalorder %v716_v7, %v713_v6  ;;  %v727_v6 = vmov %v1821_v6  ;;  %v730_v7 = vmov %v1823_v7 }
 0x143   : >>> { %v573_v43 = vsel %vm571_vm13, %v572_v40, %v570_v42  ;;  %vm762_vm13 = vcmp.eq.s32.totalorder %v757_v7, %v754_v6 }
 0x144   : >>> { %v574_v44 = vxor.u32 2147483648, %v573_v43 }
 0x146   : >>> { %v575_v45 = vsel %vm559_vm14, %v573_v43, %v574_v44  ;;  %vm747_vm14 = vcmp.eq.s32.totalorder %v743_v7, %v740_v6 }
 0x147   : >>> { %v576_v46 = vadd.f32 %v575_v45, %v558_v31 }
 0x149   : >>> { %1667 = vrcp.f32 %v576_v46  ;;  %v588_v52 = vand.u32 2147483648, %v576_v46  ;;  %vm582_vm15 = vweird.f32 %v576_v46  ;;  %v586_v54 = vand.u32 2147483647, %v576_v46 }
 0x14b   : >>> { %v589_v58 = vor.u32 1.1754944e-38, %v588_v52  ;;  %vm587_vm3 = vcmp.eq.f32.partialorder %v586_v54, 8.507059e+37 }
 0x14f   : >>> { %v1668_v49 = vpop.eup %1667 }
 0x150   : >>> { %v578_v51 = vmul.f32 %v1668_v49, %v576_v46  ;;  %vm583_vm0 = vweird.f32 %v1668_v49 }
 0x151   : >>> { %vm584_vm1 = vmor %vm582_vm15, %vm583_vm0  ;;  %vm734_vm15 = vcmp.eq.s32.totalorder %v730_v7, %v727_v6  ;;  %vm780_vm0 = vcmp.eq.s32.totalorder %v1821_v6, 1  ;;  %v377_v7 = vmov (%p470_p9), %v1823_v7 }
 0x152   : >>> { %v579_v53 = vsub.f32 1.0, %v578_v51 }
 0x154   : >>> { %v580_v57 = vmul.f32 %v1668_v49, %v579_v53 }
 0x156   : >>> { %v581_v59 = vadd.f32 %v1668_v49, %v580_v57 }
 0x158   : >>> { %v585_v60 = vsel %vm584_vm1, %v1668_v49, %v581_v59  ;;  %vm776_vm1 = vcmp.eq.s32.totalorder %v1821_v6, 0  ;;  %v374_v6 = vmov (%p470_p9), %v1821_v6 }
 0x159   : >>> { %v590_v61 = vsel %vm587_vm3, %v589_v58, %v585_v60  ;;  %vm389_vm3 = vcmp.eq.s32.totalorder (%p470_p9), %v377_v7, %v374_v6  ;;  %v393_v6 = vmov (%p470_p9), %v1821_v6  ;;  %v396_v7 = vmov (%p470_p9), %v1823_v7 }
 0x15a   : >>> { %v597_v62 = vsel %vm596_vm4, 0.0, %v590_v61  ;;  %v410_v6 = vmov (%p470_p9), %v1821_v6  ;;  %v413_v7 = vmov (%p470_p9), %v1823_v7 }
 0x15b   : >>> { %v598_v63 = vmul.f32 %v597_v62, %v597_v62  ;;  %v611_v0 = vmul.f32 %v597_v62, %v1872_v16  ;;  %v427_v6 = vmov (%p470_p9), %v1821_v6  ;;  %v430_v7 = vmov (%p470_p9), %v1823_v7 }
 0x15c   : >> { %vm442_vm4 = vcmp.eq.s32.totalorder (%p470_p9), %v430_v7, %v427_v6 }
 0x15d   : >>> { %v599_v1 = vadd.f32 1.0, %v598_v63  ;;  %v612_v2 = vsub.f32 %v537_v23, %v611_v0  ;;  %v614_v3 = vadd.f32 %v611_v0, %v541_v24  ;;  %v885_v23 = vld [vmem:[%s1887_s24] sm:$0x3] }
 0x15e   : >>> { %v886_v24 = vld [vmem:[%s1889_s23] sm:$0x3] }
 0x15f   : >>> { %1669 = vrsqrt.f32 %v599_v1  ;;  %616 = vst [vmem:[%s615_s22] sm:$0xff] %v612_v2  ;;  %vm606_vm5 = vweird.f32 %v599_v1  ;;  %s651_s22 = smov [#allocation32] }
 0x160   : >>> { %618 = vst [vmem:[%s617_s29] sm:$0xff] %v614_v3  ;;  %s653_s29 = smov [#allocation31] }
 0x165   : >>> { %v1670_v4 = vpop.eup %1669 }
 0x166   : >>> { %v601_v5 = vmul.f32 %v1670_v4, %v599_v1  ;;  %vm607_vm6 = vweird.f32 %v1670_v4 }
 0x167   : >>> { %vm608_vm7 = vmor %vm606_vm5, %vm607_vm6 }
 0x168   : >>> { %v602_v8 = vmul.f32 %v1670_v4, %v601_v5 }
 0x16a   : >>> { %v603_v9 = vmul.f32 0.5, %v602_v8 }
 0x16c   : >>> { %v604_v10 = vsub.f32 1.5, %v603_v9 }
 0x16e   : >>> { %v605_v11 = vmul.f32 %v1670_v4, %v604_v10 }
 0x170   : >>> { %v609_v12 = vsel %vm608_vm7, %v1670_v4, %v605_v11 }
 0x171   : >>> { %620 = vst [vmem:[%s619_s14] sm:$0xff] %v609_v12  ;;  %v610_v13 = vmul.f32 %v609_v12, %v597_v62  ;;  %s1881_s14 = smov [#allocation20] }
 0x172   : >>> { %v661_v26 = vld [vmem:[%s1881_s14] sm:$0x3] }
 0x173   : >>> { %622 = vst [vmem:[%s621_s15] sm:$0xff] %v610_v13  ;;  %s1883_s15 = smov [#allocation21] }
 0x174   : >>> { %v662_v20 = vld [vmem:[%s1883_s15] sm:$0x3] }
 0x178   : >>> { %v624_v14 = vld [vmem:[%s623_s16] ss:$0 sm:$0xff]  ;;  %s1885_s16 = smov [#allocation22] }
 0x179   : >>> { %v633_v15 = vsel %vm632_vm8, %v624_v14, 0.0  ;;  %v663_v21 = vld [vmem:[%s1885_s16] sm:$0x3] }
 0x17a   : >>> { %634 = vadd.xlane.f32.xlu0 %v633_v15  ;;  %v639_v16 = vld [vmem:[%s638_s21] ss:$0 sm:$0xff]  ;;  %s877_s21 = smov [#allocation31] }
 0x17b   : >>> { %v648_v17 = vsel %vm647_vm9, %v639_v16, 0.0 }
 0x182   : >>> { %649 = vadd.xlane.f32.xlu0 %v648_v17 }
 0x1ed   : >>> { %v635_v18 = vpop.xlane.xlu0 %634 }
 0x1ee   : >>> { %637 = vst [vmem:[%s636_s30] sm:$0xff] %v635_v18  ;;  %s1891_s30 = smov [#allocation23] }
 0x1ef   : >>> { %v664_v27 = vld [vmem:[%s1891_s30] sm:$0x3] }
 0x1f5   : >>> { %v650_v19 = vpop.xlane.xlu0 %649  ;;  %v654_v22 = vld [vmem:[%s653_s29] sm:$0xff]  ;;  %s681_s29 = smov [#allocation29] }
 0x1f6   : >>> { %652 = vst [vmem:[%s651_s22] sm:$0xff] %v650_v19  ;;  %s655_s22 = smov [#allocation32]  ;;  %v878_v25 = vld [vmem:[%s877_s21] sm:$0xff]  ;;  %v668_v29 = vmul.f32 %v662_v20, %v654_v22  ;;  %v672_v30 = vmul.f32 %v663_v21, %v654_v22  ;;  %v665_v50 = vmul.f32 %v661_v26, %v654_v22  ;;  %v675_v52 = vmul.f32 %v664_v27, %v654_v22  ;;  %s683_s21 = smov [#allocation30] }
 0x1f7   : >>> { %v889_v34 = vmul.f32 %v885_v23, %v878_v25  ;;  %v892_v35 = vmul.f32 %v886_v24, %v878_v25  ;;  %v896_v42 = vmul.f32 %v887_v28, %v878_v25  ;;  %v899_v46 = vmul.f32 %v888_v33, %v878_v25  ;;  %v682_v56 = vld [vmem:[%s681_s29] ss:$0 sm:$0xff]  ;;  %s750_s29 = smov [#allocation23] }
 0x1f8   : >>> { %v684_v57 = vld [vmem:[%s683_s21] ss:$0 sm:$0xff]  ;;  %s737_s21 = smov [#allocation22] }
 0x1fd   : >>> { %v656_v31 = vld [vmem:[%s655_s22] sm:$0xff]  ;;  %s1913_s22 = smov [#allocation22] }
 0x1fe   : >>> { %v880_v32 = vld [vmem:[%s879_s27] sm:$0xff]  ;;  %v669_v36 = vmul.f32 %v664_v27, %v656_v31  ;;  %v671_v37 = vmul.f32 %v661_v26, %v656_v31  ;;  %v666_v43 = vmul.f32 %v663_v21, %v656_v31  ;;  %v674_v47 = vmul.f32 %v662_v20, %v656_v31  ;;  %s1908_s27 = smov [#allocation12] }
 0x1ff   : >>> { %v890_v38 = vmul.f32 %v887_v28, %v880_v32  ;;  %v893_v39 = vmul.f32 %v888_v33, %v880_v32  ;;  %v895_v40 = vmul.f32 %v885_v23, %v880_v32  ;;  %v898_v41 = vmul.f32 %v886_v24, %v880_v32 }
 0x200   : >>> { %v670_v44 = vsub.f32 %v668_v29, %v669_v36  ;;  %v673_v45 = vadd.f32 %v672_v30, %v671_v37  ;;  %v667_v54 = vsub.f32 %v665_v50, %v666_v43  ;;  %v676_v55 = vadd.f32 %v675_v52, %v674_v47 }
 0x201   : >>> { %v891_v48 = vsub.f32 %v889_v34, %v890_v38  ;;  %v894_v49 = vsub.f32 %v892_v35, %v893_v39  ;;  %v897_v51 = vadd.f32 %v896_v42, %v895_v40  ;;  %v900_v53 = vadd.f32 %v899_v46, %v898_v41 }
 0x202   : >>> { %678 = vst [vmem:[%s1883_s15] sm:$0x3] %v670_v44  ;;  %s1915_s15 = smov [#allocation21] }
 0x203   : >>> { %679 = vst [vmem:[%s1885_s16] sm:$0x3] %v673_v45  ;;  %s906_s16 = smov [#allocation16] }
 0x204   : >>> { %901 = vst [vmem:[%s1887_s24] sm:$0x3] %v891_v48  ;;  %s1917_s24 = smov [#allocation14] }
 0x205   : >>> { %902 = vst [vmem:[%s1889_s23] sm:$0x3] %v894_v49  ;;  %s1922_s23 = smov [#allocation18] }
 0x206   : >>> { %903 = vst [vmem:[%s1894_s11] sm:$0x3] %v897_v51  ;;  %s688_s11 = smov [#allocation23] }
 0x207   : >>> { %904 = vst [vmem:[%s1897_s26] sm:$0x3] %v900_v53  ;;  %s1925_s26 = smov [#allocation20] }
 0x208   : >>> { %677 = vst [vmem:[%s1881_s14] sm:$0x3] %v667_v54  ;;  %s710_s14 = smov [#allocation27] }
 0x209   : >>> { %680 = vst [vmem:[%s1891_s30] sm:$0x3] %v676_v55  ;;  %v690_v59 = vld [vmem:[%s1915_s15] sm:$0x3]  ;;  %s751_s30 = smov [#allocation28] }
 0x20a   : >>> { %v691_v58 = vld [vmem:[%s1913_s22] sm:$0x3]  ;;  %v694_v10 = vmul.f32 %v690_v59, %v684_v57  ;;  %v697_v16 = vmul.f32 %v690_v59, %v682_v56 }
 0x20b   : >>> { %v907_v60 = vld [vmem:[%s1908_s27] ss:$0 sm:$0xff]  ;;  %v1591_v62 = vld [vmem:[%s1908_s27 + $0x1] ss:$0 sm:$0xff]  ;;  %v702_v13 = vmul.f32 %v691_v58, %v684_v57  ;;  %v699_v14 = vmul.f32 %v691_v58, %v682_v56 }
 0x20c   : >>> { %v1590_v61 = vld [vmem:[%s1908_s27 - $0x1] sm:$0x2]  ;;  %v1595_v2 = vld [vmem:[%s1917_s24 + $0x1] ss:$0 sm:$0xff] }
 0x20d   : >>> { %v914_v63 = vsel %vm837_vm10, %v907_v60, %v1590_v61  ;;  %v931_v0 = vld [vmem:[%s1917_s24] ss:$0 sm:$0xff]  ;;  %v1593_v4 = vld [vmem:[%s906_s16 + $0x1] sm:$0x1] }
 0x20e   : >>> { %v1594_v1 = vld [vmem:[%s1917_s24 - $0x1] sm:$0x2]  ;;  %917 = vst [vmem:[%s1908_s27] sm:$0x3] %v914_v63  ;;  %v926_v8 = vsel %vm849_vm11, %v1591_v62, %v1593_v4  ;;  %v1597_v9 = vld [vmem:[%s1922_s23 + $0x1] sm:$0x1] }
 0x20f   : >>> { %v918_v3 = vld [vmem:[%s906_s16] ss:$0 sm:$0xff]  ;;  %v938_v5 = vsel %vm837_vm10, %v931_v0, %v1594_v1  ;;  %v950_v12 = vsel %vm849_vm11, %v1595_v2, %v1597_v9 }
 0x210   : >>> { %1592 = vst [vmem:[%s1908_s27 + $0x1] sm:$0x1] %v918_v3  ;;  %v942_v11 = vld [vmem:[%s1922_s23] ss:$0 sm:$0xff]  ;;  %s709_s27 = smov [#allocation20] }
 0x211   : >>> { %928 = vst [vmem:[%s906_s16] sm:$0x3] %v926_v8  ;;  %v689_v15 = vld [vmem:[%s1925_s26] sm:$0x3]  ;;  %s1964_s16 = smov [#allocation23] }
 0x212   : >>> { %941 = vst [vmem:[%s1917_s24] sm:$0x3] %v938_v5  ;;  %v692_v17 = vld [vmem:[%s688_s11] sm:$0x3]  ;;  %v693_v18 = vmul.f32 %v689_v15, %v682_v56  ;;  %v696_v19 = vmul.f32 %v689_v15, %v684_v57 }
 0x213   : >>> { %1596 = vst [vmem:[%s1917_s24 + $0x1] sm:$0x1] %v942_v11  ;;  %v703_v20 = vmul.f32 %v692_v17, %v682_v56  ;;  %v700_v21 = vmul.f32 %v692_v17, %v684_v57  ;;  %v717_v26 = vld [vmem:[%s710_s14] ss:$0 sm:$0xff]  ;;  %s1966_s24 = smov [#allocation22]  ;;  %s1976_s14 = smov [#allocation21] }
 0x214   : >>> { %952 = vst [vmem:[%s1922_s23] sm:$0x3] %v950_v12  ;;  %v695_v22 = vsub.f32 %v693_v18, %v694_v10  ;;  %v698_v25 = vadd.f32 %v697_v16, %v696_v19  ;;  %v758_v27 = vld [vmem:[%s751_s30] ss:$0 sm:$0xff]  ;;  %s1712_s23 = smov 1   ;;  %s830_s30 = smov [#allocation22] }
 0x215   : >>> { %v704_v23 = vadd.f32 %v703_v20, %v702_v13  ;;  %v701_v24 = vsub.f32 %v699_v14, %v700_v21 }
 0x216   : >>> { %705 = vst [vmem:[%s1925_s26] sm:$0x3] %v695_v22  ;;  %s766_s26 = smov [#allocation21] }
 0x217   : >>> { %708 = vst [vmem:[%s688_s11] sm:$0x3] %v704_v23  ;;  %s1713_s11 = smov 127  }
 0x218   : >>> { %707 = vst [vmem:[%s1913_s22] sm:$0x3] %v701_v24  ;;  %s724_s22 = smov [#allocation21] }
 0x219   : >>> { %706 = vst [vmem:[%s1915_s15] sm:$0x3] %v698_v25  ;;  %s1962_s15 = smov [#allocation20] }
 0x21d   : >>> { %v718_v28 = vld [vmem:[%s709_s27] sm:$0x3] }
 0x21e   : >>> { %v759_v29 = vld [vmem:[%s750_s29] sm:$0x3]  ;;  %v722_v30 = vsel %vm721_vm12, %v717_v26, %v718_v28 }
 0x21f   : >>> { %v763_v31 = vsel %vm762_vm13, %v758_v27, %v759_v29  ;;  %v744_v32 = vld [vmem:[%s737_s21] sm:$0x3]  ;;  %723 = vst [vmem:[%s709_s27] sm:$0x3] %v722_v30  ;;  %s829_s27 = smov [#allocation20] }
 0x220   : >>> { %764 = vst [vmem:[%s750_s29] sm:$0x3] %v763_v31  ;;  %v748_v33 = vsel %vm747_vm14, 0.0, %v744_v32  ;;  %v731_v34 = vld [vmem:[%s724_s22] sm:$0x3]  ;;  %s854_s29 = smov [#allocation23] }
 0x221   : >>> { %749 = vst [vmem:[%s737_s21] sm:$0x3] %v748_v33  ;;  %v735_v35 = vsel %vm734_vm15, 0.0, %v731_v34  ;;  %s953_s21 = sadd.s32 (%p470_p9), 1, %s1705_s17  }
 0x222   : >>> { %736 = vst [vmem:[%s724_s22] sm:$0x3] %v735_v35  ;;  %s378_s22 = smov (%p470_p9), [#allocation20]  ;;  %p466_p10 = scmp.ge.s32.totalorder (%p470_p9), %s953_s21, 15 }
 0x223   : >> { %s2109_s17 = smov (%p470_p9), %s953_s21 }
 0x226   : >>> { %v771_v36 = vld [vmem:[%s1962_s15] sm:$0x3] }
 0x227   : >>> { %v799_v37 = vld [vmem:[%s1964_s16] sm:$0x3]  ;;  %772 = vrot.lane.b32.xlu1 %v771_v36, %s1712_s23 }
 0x228   : >>> { %800 = vrot.lane.b32.xlu0 %v799_v37, %s1712_s23  ;;  %v803_v38 = vld [vmem:[%s1966_s24] sm:$0x3] }
 0x229   : >>> { %804 = vrot.lane.b32.xlu2 %v803_v38, %s1712_s23  ;;  %v767_v39 = vld [vmem:[%s766_s26] sm:$0x3] }
 0x22a   : >>> { %v788_v40 = vld [vmem:[%s766_s26] sm:$0x3] }
 0x22b   : >>> { %v820_v41 = vld [vmem:[%s1964_s16] sm:$0x3] }
 0x22c   : >>> { %v770_v44 = vld [vmem:[%s1962_s15] sm:$0x3] }
 0x22d   : >>> { %v802_v55 = vld [vmem:[%s1966_s24] sm:$0x3] }
 0x22f   : >>> { %768 = vrot.lane.b32.xlu1 %v767_v39, %s1712_s23 }
 0x231   : >>> { %789 = vrot.lane.b32.xlu2 %v788_v40, %s1713_s11 }
 0x237   : >>> { %821 = vrot.lane.b32.xlu1 %v820_v41, %s1713_s11 }
 0x283   : >>> { %v805_v42 = vpop.permute.xlu2 %804 }
 0x284   : >>> { %v809_v51 = vsel %vm776_vm1, %v803_v38, %v805_v42 }
 0x28b   : >>> { %v790_v43 = vpop.permute.xlu2 %789 }
 0x28c   : >>> { %v794_v45 = vsel %vm780_vm0, %v770_v44, %v790_v43 }
 0x28d   : >>> { %796 = vst [vmem:[%s766_s26] sm:$0x3] %v794_v45 }
 0x294   : >>> { %v855_v46 = vld [vmem:[%s1976_s14] ss:$0 sm:$0xff]  ;;  %v1587_v48 = vld [vmem:[%s1976_s14 + $0x1] ss:$0 sm:$0xff] }
 0x295   : >>> { %v1586_v47 = vld [vmem:[%s1976_s14 - $0x1] sm:$0x2] }
 0x296   : >>> { %v862_v49 = vsel %vm837_vm10, %v855_v46, %v1586_v47 }
 0x297   : >>> { %865 = vst [vmem:[%s1976_s14] sm:$0x3] %v862_v49 }
 0x299   : >>> { %v773_v50 = vpop.permute.xlu1 %772 }
 0x29a   : >>> { %v801_v52 = vpop.permute.xlu0 %800  ;;  %v777_v56 = vsel %vm776_vm1, %v771_v36, %v773_v50 }
 0x29b   : >>> { %v813_v53 = vsel %vm780_vm0, %v801_v52, %v809_v51 }
 0x29c   : >>> { %v819_v54 = vsel %vm1451_vm2, %v813_v53, 0.0 }
 0x29d   : >>> { %827 = vst [vmem:[%s1966_s24] sm:$0x3] %v819_v54  ;;  %s431_s24 = smov (%p470_p9), [#allocation23] }
 0x2a1   : >>> { %v769_v57 = vpop.permute.xlu1 %768 }
 0x2a2   : >>> { %v781_v58 = vsel %vm780_vm0, %v769_v57, %v777_v56 }
 0x2a3   : >>> { %v787_v59 = vsel %vm1451_vm2, %v781_v58, 0.0 }
 0x2a4   : >>> { %795 = vst [vmem:[%s1962_s15] sm:$0x3] %v787_v59  ;;  %v1585_v61 = vld [vmem:[%s830_s30 + $0x1] sm:$0x1]  ;;  %v842_v4 = vld [vmem:[%s830_s30] ss:$0 sm:$0xff]  ;;  %s397_s15 = smov (%p470_p9), [#allocation21] }
 0x2a9   : >>> { %v822_v60 = vpop.permute.xlu1 %821 }
 0x2aa   : >>> { %v826_v62 = vsel %vm780_vm0, %v802_v55, %v822_v60 }
 0x2ab   : >>> { %v831_v63 = vld [vmem:[%s829_s27] ss:$0 sm:$0xff]  ;;  %v1583_v1 = vld [vmem:[%s829_s27 + $0x1] ss:$0 sm:$0xff]  ;;  %828 = vst [vmem:[%s1964_s16] sm:$0x3] %v826_v62  ;;  %s414_s16 = smov (%p470_p9), [#allocation22] }
 0x2ac   : >>> { %v1582_v0 = vld [vmem:[%s829_s27 - $0x1] sm:$0x2]  ;;  %v850_v3 = vsel %vm849_vm11, %v1583_v1, %v1585_v61 }
 0x2ad   : >>> { %v838_v2 = vsel %vm837_vm10, %v831_v63, %v1582_v0  ;;  %852 = vst [vmem:[%s830_s30] sm:$0x3] %v850_v3 }
 0x2ae   : >>> { %841 = vst [vmem:[%s829_s27] sm:$0x3] %v838_v2 }
 0x2af   : >>> { %1584 = vst [vmem:[%s829_s27 + $0x1] sm:$0x1] %v842_v4 }
 0x2b2   : >>> { %v866_v5 = vld [vmem:[%s854_s29] ss:$0 sm:$0xff]  ;;  %v1589_v8 = vld [vmem:[%s854_s29 + $0x1] sm:$0x1] }
 0x2b3   : >>> { %1588 = vst [vmem:[%s1976_s14 + $0x1] sm:$0x1] %v866_v5  ;;  %v874_v9 = vsel %vm849_vm11, %v1587_v48, %v1589_v8  ;;  %472 = sbr.rel (!%p470_p9) target bundleno = 254 (0xfe), region = 462 }
 0x2b4   : >>> { %876 = vst [vmem:[%s854_s29] sm:$0x3] %v874_v9  ;;  %v420_v14 = vld [vmem:[%s414_s16] sm:$0x3] (%p470_p9) }
 0x2b5   : >> { %v421_v18 = vsel (%p470_p9), %vm1451_vm2, %v420_v14, 0.0 }
 0x2b6   : >> { %v384_v10 = vld [vmem:[%s378_s22] sm:$0x3] (%p470_p9)  ;;  %v422_v20 = vmul.f32 (%p470_p9), %v421_v18, %v421_v18 }
 0x2b7   : >> { %v385_v12 = vsel (%p470_p9), %vm1451_vm2, %v384_v10, 0.0 }
 0x2b8   : >> { %v386_v16 = vmul.f32 %v385_v12, %v385_v12 }
 0x2ba   : >> { %v403_v11 = vld [vmem:[%s397_s15] sm:$0x3]  ;;  %v390_v23 = vsel %vm389_vm3, 0.0, %v386_v16 }
 0x2bb   : >> { %v404_v13 = vsel %vm1451_vm2, %v403_v11, 0.0  ;;  %v437_v15 = vld [vmem:[%s431_s24] sm:$0x3] }
 0x2bc   : >> { %v405_v17 = vmul.f32 %v404_v13, %v404_v13  ;;  %v438_v19 = vsel %vm1451_vm2, %v437_v15, 0.0 }
 0x2bd   : >> { %v439_v22 = vmul.f32 %v438_v19, %v438_v19 }
 0x2be   : >> { %v407_v21 = vadd.f32 %v405_v17, %v386_v16  ;;  %v406_v25 = vadd.f32 %v405_v17, %v390_v23 }
 0x2bf   : >> { %v443_v28 = vsel %vm442_vm4, 0.0, %v439_v22 }
 0x2c0   : >> { %v424_v24 = vadd.f32 %v422_v20, %v407_v21  ;;  %v423_v27 = vadd.f32 %v422_v20, %v406_v25 }
 0x2c2   : >> { %v445_v26 = vadd.f32 %v439_v22, %v424_v24  ;;  %v444_v29 = vadd.f32 %v443_v28, %v423_v27 }
 0x2c4   : >> { %446 = vadd.xlane.f32.xlu0 %v445_v26 }
 0x2cc   : >> { %454 = vadd.xlane.f32.xlu0 %v444_v29 }
 0x337   : >> { %v447_v30 = vpop.xlane.xlu0 %446 }
 0x338   : >> { %v448_v31 = vrot.slane %v447_v30, 4 }
 0x33a   : >> { %v449_v32 = vadd.f32 %v448_v31, %v447_v30 }
 0x33c   : >> { %v450_v33 = vrot.slane %v449_v32, 2 }
 0x33e   : >> { %v451_v37 = vadd.f32 %v450_v33, %v449_v32 }
 0x33f   : >> { %v455_v34 = vpop.xlane.xlu0 %454 }
 0x340   : >> { %v456_v35 = vrot.slane %v455_v34, 4  ;;  %v452_v40 = vrot.slane %v451_v37, 1 }
 0x342   : >> { %v457_v36 = vadd.f32 %v456_v35, %v455_v34  ;;  %v453_v43 = vadd.f32 %v452_v40, %v451_v37 }
 0x344   : >> { %v458_v38 = vrot.slane %v457_v36, 2 }
 0x346   : >> { %v459_v39 = vadd.f32 %v458_v38, %v457_v36 }
 0x348   : >> { %v460_v41 = vrot.slane %v459_v39, 1 }
 0x34a   : >> { %v461_v42 = vadd.f32 %v460_v41, %v459_v39 }
 0x34c   : >> { %1616 = vpush %v461_v42 }
 0x34d   : >> { %1618 = vpush %v453_v43 }
 0x37d   : >> { %s1617_s20 = spop %1616 }
 0x37e   : >> { %s1619_s23 = spop %1618 }
 0x37f   : >> { %s464_s26 = smul.f32 1e-10, %s1619_s23 }
 0x381   : >> { %p465_p11 = scmp.le.f32.partialorder %s1617_s20, %s464_s26 }
 0x383   : >> { %p467_p12 = por %p466_p10, %p465_p11 }
 0x385   : > { %955 = sbr.rel (!%p467_p12) target bundleno = 253 (0xfd), region = 473 }
 0x38a PF: > { %s960_s11 = smov [#allocation20]  ;;  %v964_v6 = vmov %v1821_v6  ;;  %v967_v7 = vmov %v1823_v7  ;;  %v1014_v44 = vld [vmem:[#allocation12] sm:$0x3]  ;;  %v1020_v45 = vld [vmem:[#allocation14] sm:$0x3]  ;;  %s980_s17 = smov [#allocation23] }
 0x38b   : > { %v984_v6 = vmov %v1821_v6  ;;  %v987_v7 = vmov %v1823_v7  ;;  %v968_v46 = vld [vmem:[%s960_s11] sm:$0x3]  ;;  %vm971_vm5 = vcmp.eq.s32.totalorder %v967_v7, %v964_v6  ;;  %1017 = vst [vmem:[%s297_s25] sm:$0x3] %v1014_v44  ;;  %s2110_s14 = scalar_lea.vmem [#allocation15], %s1817_s28  ;;  %s2111_s30 = scalar_lea.vmem [#allocation17], %s1817_s28 }
 0x38c   : > { %vm991_vm6 = vcmp.eq.s32.totalorder %v987_v7, %v984_v6  ;;  %v972_v47 = vsel %vm971_vm5, %v968_v46, 0.0  ;;  %1023 = vst [vmem:[%s2110_s14] sm:$0x3] %v1020_v45  ;;  %v1026_v48 = vld [vmem:[#allocation16] sm:$0x3]  ;;  %v1032_v51 = vld [vmem:[#allocation18] sm:$0x3] }
 0x38d   : > { %v973_v49 = vrot.slane %v972_v47, 4  ;;  %v988_v50 = vld [vmem:[%s980_s17] sm:$0x3]  ;;  %1029 = vst [vmem:[%s2111_s30] sm:$0x3] %v1026_v48  ;;  %s2112_s27 = scalar_lea.vmem [#allocation19], %s1817_s28  ;;  %s956_s29 = sand.u32 7, %s1780_s12  }
 0x38e   : > { %v992_v52 = vsel %vm991_vm6, %v988_v50, 0.0  ;;  %1035 = vst [vmem:[%s2112_s27] sm:$0x3] %v1032_v51  ;;  %s957_s21 = scalar_lea.vmem [#allocation8], %s956_s29  ;;  %s959_s22 = scalar_lea.vmem [#allocation10], %s956_s29 }
 0x38f   : > { %v974_v53 = vadd.f32 %v973_v49, %v972_v47  ;;  %v993_v54 = vrot.slane %v992_v52, 4  ;;  %s961_s21 = smov %s957_s21  ;;  %s981_s22 = smov %s959_s22 }
 0x390   : > { %s2113_s15 = scalar_lea.vmem [#allocation9], %s1819_s18  ;;  %s2114_s16 = scalar_lea.vmem [#allocation11], %s1819_s18 }
 0x391   : > { %v975_v55 = vrot.slane %v974_v53, 2  ;;  %v994_v6 = vadd.f32 %v993_v54, %v992_v52  ;;  %s1063_s24 = sshrl.u32 (%p1794_p3), %s1780_s12, 3  ;;  %s2115_s20 = scalar_lea.vmem (%p1794_p3), [#allocation9], %s1819_s18 }
 0x392   : > { %s1604_s23 = sshll.u32 (%p1794_p3), %s1063_s24, 1 }
 0x393   : > { %v976_v7 = vadd.f32 %v975_v55, %v974_v53  ;;  %v995_v56 = vrot.slane %v994_v6, 2  ;;  %s1065_s17 = scalar_lea.vmem (%p1794_p3), %s2101_s4, %s1604_s23 }
 0x395   : > { %v977_v57 = vrot.slane %v976_v7, 1  ;;  %v996_v58 = vadd.f32 %v995_v56, %v994_v6 }
 0x397   : > { %v978_v59 = vadd.f32 %v977_v57, %v976_v7  ;;  %v997_v60 = vrot.slane %v996_v58, 1 }
 0x399   : > { %979 = vst [vmem:[%s961_s21] sm:$0x1] %v978_v59  ;;  %v998_v61 = vadd.f32 %v997_v60, %v996_v58 }
 0x39b   : > { %999 = vst [vmem:[%s981_s22] sm:$0x1] %v998_v61 }
 0x39f   : > { %1062 = sbr.rel (!%p1794_p3) target bundleno = 938 (0x3aa), region = 158 }
 0x3a0   : > { %v1002_v62 = vld [vmem:[#allocation8] sm:$0x3] }
 0x3a1   : > { %1005 = vst [vmem:[%s2113_s15] sm:$0x3] %v1002_v62 }
 0x3a2   : > { %v1008_v63 = vld [vmem:[#allocation10] sm:$0x3] }
 0x3a3   : > { %1011 = vst [vmem:[%s2114_s16] sm:$0x3] %v1008_v63 }
 0x3a8   : > { %v1082_v0 = vld [vmem:[%s2115_s20] sm:$0x3] }
 0x3a9   : > { %1083 = vst [vmem:[%s1065_s17] sm:$0x3] %v1082_v0 }
 0x3aa PF: > { %1101 = sbr.rel (!%p1794_p3) target bundleno = 946 (0x3b2), region = 192  ;;  %s1102_s14 = sshrl.u32 (%p1794_p3), %s1780_s12, 3 }
 0x3ab   : > { %s2116_s30 = scalar_lea.vmem (%p1794_p3), [#allocation11], %s1819_s18  ;;  %s1605_s27 = sshll.u32 (%p1794_p3), %s1102_s14, 1 }
 0x3ac   : > { %s1104_s22 = scalar_lea.vmem (%p1794_p3), %s2102_s5, %s1605_s27 }
 0x3b0   : > { %v1121_v1 = vld [vmem:[%s2116_s30] sm:$0x3] }
 0x3b1   : > { %1122 = vst [vmem:[%s1104_s22] sm:$0x3] %v1121_v1 }
 0x3b2 PF: > { %s1606_s15 = sshll.u32 %s1780_s12, 1  ;;  %v1156_v2 = vld [vmem:[%s297_s25] sm:$0x3]  ;;  %s2117_s19 = scalar_lea.vmem [#allocation15], %s1817_s28 }
 0x3b3   : > { %v1191_v3 = vld [vmem:[%s2117_s19] sm:$0x3]  ;;  %s1139_s24 = scalar_lea.vmem %s2103_s6, %s1606_s15  ;;  %s1174_s26 = scalar_lea.vmem %s2104_s7, %s1606_s15 }
 0x3b4   : > { %s2118_s11 = scalar_lea.vmem [#allocation17], %s1817_s28  ;;  %1157 = vst [vmem:[%s1139_s24] sm:$0x3] %v1156_v2  ;;  %s1209_s30 = scalar_lea.vmem %s2105_s8, %s1606_s15 }
 0x3b5   : > { %v1226_v4 = vld [vmem:[%s2118_s11] sm:$0x3]  ;;  %s1244_s25 = scalar_lea.vmem %s2106_s9, %s1606_s15  ;;  %s2119_s29 = scalar_lea.vmem [#allocation19], %s1817_s28  ;;  %1192 = vst [vmem:[%s1174_s26] sm:$0x3] %v1191_v3 }
 0x3b6   : > { %v1261_v5 = vld [vmem:[%s2119_s29] sm:$0x3]  ;;  %1227 = vst [vmem:[%s1209_s30] sm:$0x3] %v1226_v4 }
 0x3b7   : > { %1262 = vst [vmem:[%s1244_s25] sm:$0x3] %v1261_v5 }
 0x3b8 PF: > { %s2120_s21 = sld [smem:[#allocation33_spill]]  ;;  %p13_p13 = scmp.ge.s32.totalorder %s1783_s13, 4  }
 0x3b9   : > { %s2121_s30 = smov %s1697_s10  ;;  %s2123_s11 = smov %s1783_s13 }
 0x3ba   :  { %15 = sbr.rel (!%p13_p13) target bundleno = 2 (0x2), region = 484 }
 0x3be   : > { %s2122_s10 = smov %s2120_s21 }

// kernel: reverse
= control target key start
LH: loop header
LB: loop body
LE: loop exit
PB: predicated region body
PF: predicated region fallthrough
CT: control target
= control target key end

     0   :  { %v2_v0 = vlaneseq  ;;  %s109_s0 = inlined_call_operand.vmem [shape: f32[2,3], index: 0, kind: input, shape index: {}]   ;;  %s110_s1 = inlined_call_operand.vmem [shape: f32[2,3], index: 1, kind: output, shape index: {}]  }
   0x2   :  { %v3_v1 = vsub.s32 2, %v2_v0 }
   0x4   :  { %4 = vset.pattern.permute.xlu0 %v3_v1 }
   0x5   :  { %v21_v2 = vld [vmem:[%s109_s0] sm:$0x3] }
   0x6   :  { %22 = vst [vmem:[#allocation1] sm:$0x3] %v21_v2 }
   0xd   :  { %v40_v3 = vld [vmem:[#allocation1] sm:$0x3] }
   0xe   :  { %41 = vst [vmem:[#allocation0] sm:$0x3] %v40_v3 }
  0x15   :  { %v42_v4 = vld [vmem:[#allocation0] sm:$0xff] }
  0x16   :  { %43 = vperm.xlu0 %4, %v42_v4  }
  0x88   :  { %v44_v5 = vpop.permute.xlu0 %43 }
  0x89   :  { %45 = vst [vmem:[#allocation2] sm:$0xff] %v44_v5 }
  0x90   :  { %v48_v6 = vld [vmem:[#allocation2] sm:$0x3] }
  0x91   :  { %51 = vst [vmem:[#allocation3] sm:$0x3] %v48_v6 }
  0x98   :  { %v68_v7 = vld [vmem:[#allocation3] sm:$0x3] }
  0x99   :  { %69 = vst [vmem:[%s110_s1] sm:$0x3] %v68_v7 }

// kernel: custom-call.16
= control target key start
LH: loop header
LB: loop body
LE: loop exit
PB: predicated region body
PF: predicated region fallthrough
CT: control target
= control target key end

     0   :  { %s734_s9 = smov 0   ;;  %s736_s10 = smov 0   ;;  %s909_s0 = inlined_call_operand.vmem [shape: f32[2,3,3], index: 0, kind: input, shape index: {}]   ;;  %s910_s1 = inlined_call_operand.vmem [shape: f32[2,3,3], index: 1, kind: output, shape index: {0}]   ;;  %s911_s2 = inlined_call_operand.vmem [shape: f32[2,3], index: 2, kind: output, shape index: {1}]  }
   0x1   :  { %s738_s11 = smov 0   ;;  %s740_s12 = smov 0  }
   0x2   :  { %s742_s13 = smov 0  }
   0x3 LB: > { %s28_s14 = sadd.s32 1, %s707_s12  ;;  %s589_s15 = sadd.s32 4294967295, %s711_s13   ;;  %s711_s13 = sphi %s742_s13, %s9_s13   ;;  %s707_s12 = sphi %s740_s12, %s920_s12   ;;  %s703_s11 = sphi %s738_s11, %s919_s11   ;;  %s699_s10 = sphi %s736_s10, %s918_s10   ;;  %s695_s9 = sphi %s734_s9, %s917_s9  }
   0x4   : > { %p30_p0 = scmp.ge.s32.totalorder %s28_s14, 2  ;;  %s33_s16 = ssub.s32 0, %s707_s12 }
   0x5   : > { %s591_s17 = smin.u32 %s707_s12, %s33_s16  ;;  %p57_p1 = scmp.ne.s32.totalorder %s699_s10, %s695_s9 }
   0x6   : > { %s922_s14 = smov (%p30_p0, %s28_s14), 0  ;;  %s35_s18 = sshrl.u32 %s591_s17, 3 }
   0x7   : > { %s39_s19 = ssub.s32 0, %s922_s14  ;;  %p58_p2 = scmp.eq.s32.totalorder %s589_s15, 1 }
   0x8   : > { %s592_s20 = smin.u32 %s39_s19, %s922_s14  ;;  %s47_s24 = sadd.s32 1, %s699_s10 }
   0x9   : > { %s41_s21 = sshrl.u32 %s592_s20, 3  ;;  %p769_p3 = por %p58_p2, %p57_p1 }
   0xa   : > { %s44_s23 = ssub.s32 %s35_s18, %s41_s21  ;;  %p594_p5 = scmp.ge.s32.totalorder %s711_s13, 2 }
   0xb   : > { %p45_p4 = scmp.eq.s32.totalorder %s44_s23, 0  ;;  %s82_s26 = sand.u32 (!%p594_p5), 1, %s711_s13  }
   0xc   : > { %80 = sbr.rel (%p594_p5) target bundleno = 19 (0x13), region = 16  ;;  %s596_s27 = sshll.u32 (!%p594_p5), %s707_s12, 2 }
   0xd   : > { %s775_s25 = scalar_select %p45_p4, %s699_s10, %s47_s24  }
   0xe   : > { %s595_s28 = sshll.u32 (!%p594_p5), %s82_s26, 2  ;;  %s88_s3 = scalar_lea.vmem (!%p594_p5), %s909_s0, %s596_s27 }
   0xf   : > { %s84_s4 = scalar_lea.vmem (!%p594_p5), [#allocation1], %s595_s28 }
  0x11   : > { %v105_v0 = vld [vmem:[%s88_s3] sm:$0xf] }
  0x12   : > { %106 = vst [vmem:[%s84_s4] sm:$0xf] %v105_v0 }
  0x13 PF: > { %p597_p6 = scmp.ge.s32.totalorder %s711_s13, 1  ;;  %p123_p7 = scmp.lt.s32.totalorder %s711_s13, 3 }
  0x15   : > { %p124_p8 = pnand %p597_p6, %p123_p7 }
  0x17   : > { %127 = sbr.rel (%p124_p8) target bundleno = 342 (0x156), region = 50 }
  0x1c   : > { %s134_s5 = sand.u32 1, %s589_s15   ;;  %s144_s6 = sand.u32 1, %s695_s9   ;;  %v717_v2 = vmov 0.0  }
  0x1d   : > { %s598_s7 = sshll.u32 %s134_s5, 2  ;;  %s786_s8 = sshll.u32 %s144_s6, 1 }
  0x1e   : > { %s136_s16 = scalar_lea.vmem [#allocation1], %s598_s7  ;;  %s157_s17 = sand.u32 7, %s703_s11  }
  0x1f   : > { %v149_v1 = vld [vmem:[%s136_s16] sm:$0xf]  ;;  %s789_s18 = scalar_lea.vmem [#allocation4], %s157_s17  ;;  %s792_s19 = scalar_lea.vmem [#allocation3], %s598_s7 }
  0x20   : > { %150 = vst [vmem:[#allocation0] sm:$0xf] %v149_v1  ;;  %s146_s15 = scalar_lea.vmem [#allocation5], %s786_s8  ;;  %s795_s20 = smov 0  }
  0x21   : > { %161 = vst [vmem:[%s789_s18] sm:$0x1] %v717_v2 }
  0x27   : > { %v159_v3 = vld [vmem:[#allocation0] sm:$0xff] }
  0x28   : > { %160 = vst [vmem:[#allocation2] sm:$0xff] %v159_v3 }
  0x29 LB: >> { %v169_v4 = vlaneseq  ;;  %v804_v6 = vstv %s715_s20  ;;  %s201_s9 = scalar_lea.vmem [#allocation2], %s715_s20  ;;  %s294_s21 = smov [#allocation2]  ;;  %s715_s20 = sphi %s795_s20, %s167_s20  }
  0x2a   : >> { %s329_s23 = scalar_lea.vmem [#allocation6], %s715_s20  ;;  %s345_s24 = smov [#allocation2] }
  0x2b   : >> { %v801_v5 = vshrl.u32 %v169_v4, 7  ;;  %s346_s26 = smov [#allocation6] }
  0x2d   : >> { %vm173_vm0 = vcmp.gt.s32.totalorder %v801_v5, %v804_v6  ;;  %vm174_vm1 = vcmp.lt.s32.totalorder %v801_v5, 3  ;;  %v297_v5 = vmov %v801_v5 }
  0x2e   : >> { %vm175_vm2 = vmand %vm173_vm0, %vm174_vm1  ;;  %vm301_vm13 = vcmp.gt.s32.totalorder %v297_v5, %v804_v6  ;;  %vm302_vm14 = vcmp.lt.s32.totalorder %v297_v5, 3  ;;  %v349_v5 = vmov %v801_v5 }
  0x2f   : >> { %v168_v7 = vld [vmem:[#allocation2] sm:$0xff]  ;;  %v814_v20 = vld [vmem:[%s201_s9] ss:$0 sm:$0xff] }
  0x30   : >> { %v176_v8 = vsel %vm175_vm2, %v168_v7, 0.0  ;;  %v203_v23 = vand.u32 2147483647, %v814_v20  ;;  %vm272_vm12 = vcmp.lt.f32.partialorder %v814_v20, 0.0 }
  0x31   : >> { %v177_v9 = vmul.f32 %v176_v8, %v176_v8 }
  0x32   : >> { %v204_v27 = vmax.f32 %v203_v23, 0.0 }
  0x33   : >> { %v178_v10 = vrot.slane %v177_v9, 4 }
  0x35   : >> { %v179_v11 = vadd.f32 %v178_v10, %v177_v9 }
  0x37   : >> { %v180_v12 = vrot.slane %v179_v11, 2 }
  0x39   : >> { %v181_v13 = vadd.f32 %v180_v12, %v179_v11 }
  0x3b   : >> { %v182_v14 = vrot.slane %v181_v13, 1 }
  0x3d   : >> { %v809_v15 = vadd.f32 %v182_v14, %v181_v13 }
  0x3f   : >> { %659 = vrsqrt.f32 %v809_v15  ;;  %vm191_vm3 = vcmp.eq.f32.partialorder %v809_v15, inf  ;;  %v194_v24 = vand.u32 2147483648, %v809_v15  ;;  %vm193_vm4 = vcmp.eq.f32.partialorder %v809_v15, 0.0 }
  0x45   : >> { %v660_v16 = vpop.eup %659 }
  0x46   : >> { %v185_v17 = vmul.f32 %v660_v16, %v809_v15 }
  0x48   : >> { %v186_v18 = vmul.f32 %v660_v16, %v185_v17 }
  0x4a   : >> { %v187_v19 = vmul.f32 0.5, %v186_v18  ;;  %v298_v18 = vld [vmem:[%s294_s21] sm:$0xff] }
  0x4c   : >> { %v188_v21 = vsub.f32 1.5, %v187_v19 }
  0x4e   : >> { %v189_v22 = vmul.f32 %v660_v16, %v188_v21 }
  0x50   : >> { %v190_v25 = vmul.f32 %v189_v22, %v809_v15  ;;  %v323_v22 = vand.u32 127, %v169_v4 }
  0x52   : >> { %v192_v26 = vsel %vm191_vm3, %v809_v15, %v190_v25 }
  0x53   : >> { %v195_v28 = vsel %vm193_vm4, %v194_v24, %v192_v26 }
  0x54   : >> { %v205_v29 = vand.u32 2147483647, %v195_v28 }
  0x56   : >> { %v206_v30 = vmax.f32 %v204_v27, %v205_v29 }
  0x58   : >> { %661 = vrcp.f32 %v206_v30  ;;  %v218_v33 = vand.u32 2147483648, %v206_v30  ;;  %vm212_vm5 = vweird.f32 %v206_v30  ;;  %v216_v35 = vand.u32 2147483647, %v206_v30 }
  0x59   : >> { %vm257_vm11 = vcmp.eq.f32.partialorder %v206_v30, 0.0 }
  0x5a   : >> { %v219_v37 = vor.u32 1.1754944e-38, %v218_v33  ;;  %vm217_vm8 = vcmp.eq.f32.partialorder %v216_v35, 8.507059e+37 }
  0x5e   : >> { %v662_v31 = vpop.eup %661 }
  0x5f   : >> { %v208_v32 = vmul.f32 %v662_v31, %v206_v30  ;;  %vm213_vm6 = vweird.f32 %v662_v31 }
  0x60   : >> { %vm214_vm7 = vmor %vm212_vm5, %vm213_vm6 }
  0x61   : >> { %v209_v34 = vsub.f32 1.0, %v208_v32  ;;  %vm303_vm5 = vmand %vm301_vm13, %vm302_vm14 }
  0x62   : >> { %v304_v26 = vsel %vm303_vm5, %v298_v18, 0.0 }
  0x63   : >> { %v210_v36 = vmul.f32 %v662_v31, %v209_v34 }
  0x65   : >> { %v211_v38 = vadd.f32 %v662_v31, %v210_v36 }
  0x67   : >> { %v215_v39 = vsel %vm214_vm7, %v662_v31, %v211_v38  ;;  %v342_v38 = vld [vmem:[%s789_s18] ss:$0 sm:$0xff] }
  0x68   : >> { %v220_v40 = vsel %vm217_vm8, %v219_v37, %v215_v39  ;;  %v718_v37 = vmov 1.0   ;;  %v352_v39 = vld [vmem:[%s345_s24] sm:$0xff]  ;;  %s362_s24 = smov %s345_s24 }
  0x69   : >> { %v221_v41 = vmul.f32 %v220_v40, %v203_v23  ;;  %v237_v42 = vmul.f32 0.0, %v220_v40  ;;  %v254_v43 = vmul.f32 %v220_v40, %v205_v29  ;;  %s387_s27 = scalar_lea.vmem %s362_s24, %s715_s20  ;;  %s167_s20 = sadd.s32 1, %s715_s20  }
  0x6a   : >> { %p164_p9 = scmp.ge.s32.totalorder %s167_s20, 3  }
  0x6b   : >> { %v222_v44 = vmul.f32 %v221_v41, %v221_v41  ;;  %v238_v45 = vmul.f32 %v237_v42, %v237_v42  ;;  %v255_v46 = vmul.f32 %v254_v43, %v254_v43  ;;  %s604_s28 = sshll.u32 (%p164_p9), %s703_s11, 2 }
  0x6c   : > { %s418_s3 = scalar_lea.vmem (%p164_p9), %s910_s1, %s604_s28 }
  0x6d   : >> { %v239_v47 = vadd.f32 %v238_v45, %v222_v44 }
  0x6f   : >> { %v256_v48 = vadd.f32 %v255_v46, %v239_v47 }
  0x71   : >> { %663 = vrsqrt.f32 %v256_v48  ;;  %vm265_vm9 = vcmp.eq.f32.partialorder %v256_v48, inf  ;;  %v268_v55 = vand.u32 2147483648, %v256_v48  ;;  %vm267_vm10 = vcmp.eq.f32.partialorder %v256_v48, 0.0 }
  0x77   : >> { %v664_v49 = vpop.eup %663 }
  0x78   : >> { %v259_v50 = vmul.f32 %v664_v49, %v256_v48 }
  0x7a   : >> { %v260_v51 = vmul.f32 %v664_v49, %v259_v50 }
  0x7c   : >> { %v261_v52 = vmul.f32 0.5, %v260_v51 }
  0x7e   : >> { %v262_v53 = vsub.f32 1.5, %v261_v52  ;;  %v373_v52 = vld [vmem:[%s362_s24] sm:$0xff] }
  0x80   : >> { %v263_v54 = vmul.f32 %v664_v49, %v262_v53 }
  0x82   : >> { %v264_v56 = vmul.f32 %v263_v54, %v256_v48 }
  0x84   : >> { %v266_v57 = vsel %vm265_vm9, %v256_v48, %v264_v56  ;;  %vm846_vm9 = vcmp.eq.s32.totalorder %v323_v22, %v804_v6 }
  0x85   : >> { %v269_v58 = vsel %vm267_vm10, %v268_v55, %v266_v57  ;;  %vm354_vm10 = vcmp.lt.s32.totalorder %v349_v5, 3  ;;  %v366_v5 = vmov %v801_v5 }
  0x86   : >> { %v270_v59 = vmul.f32 %v269_v58, %v206_v30 }
  0x88   : >> { %v271_v60 = vsel %vm257_vm11, 0.0, %v270_v59  ;;  %vm375_vm11 = vcmp.gt.s32.totalorder %v323_v22, %v804_v6 }
  0x89   : >> { %v273_v61 = vxor.u32 2147483648, %v271_v60 }
  0x8b   : >> { %v274_v62 = vsel %vm272_vm12, %v271_v60, %v273_v61 }
  0x8c   : >> { %v828_v63 = vsel %vm193_vm4, %v814_v20, %v274_v62  ;;  %665 = vrcp.f32 %v274_v62  ;;  %vm281_vm15 = vweird.f32 %v274_v62  ;;  %v285_v11 = vand.u32 2147483647, %v274_v62 }
  0x8d   : >> { %v293_v0 = vsub.f32 %v814_v20, %v828_v63  ;;  %v287_v12 = vand.u32 2147483648, %v274_v62  ;;  %v275_v28 = vsub.f32 %v274_v62, %v814_v20 }
  0x8e   : >> { %vm286_vm8 = vcmp.eq.f32.partialorder %v285_v11, 8.507059e+37 }
  0x8f   : >> { %667 = vrcp.f32 %v293_v0  ;;  %v316_v9 = vand.u32 2147483648, %v293_v0  ;;  %vm310_vm1 = vweird.f32 %v293_v0  ;;  %v314_v14 = vand.u32 2147483647, %v293_v0 }
  0x90   : >> { %v288_v23 = vor.u32 1.1754944e-38, %v287_v12 }
  0x91   : >> { %v317_v21 = vor.u32 1.1754944e-38, %v316_v9  ;;  %vm315_vm7 = vcmp.eq.f32.partialorder %v314_v14, 8.507059e+37 }
  0x92   : >> { %v666_v1 = vpop.eup %665 }
  0x93   : >> { %v277_v2 = vmul.f32 %v666_v1, %v274_v62  ;;  %vm282_vm0 = vweird.f32 %v666_v1 }
  0x94   : >> { %vm834_vm3 = vmor %vm281_vm15, %vm282_vm0 }
  0x95   : >> { %v668_v3 = vpop.eup %667  ;;  %v278_v7 = vsub.f32 1.0, %v277_v2 }
  0x96   : >> { %v306_v8 = vmul.f32 %v668_v3, %v293_v0  ;;  %vm311_vm2 = vweird.f32 %v668_v3 }
  0x97   : >> { %v279_v10 = vmul.f32 %v666_v1, %v278_v7  ;;  %vm312_vm6 = vmor %vm310_vm1, %vm311_vm2 }
  0x98   : >> { %v307_v13 = vsub.f32 1.0, %v306_v8 }
  0x99   : >> { %v280_v16 = vadd.f32 %v666_v1, %v279_v10 }
  0x9a   : >> { %v308_v19 = vmul.f32 %v668_v3, %v307_v13 }
  0x9b   : >> { %v284_v25 = vsel %vm834_vm3, %v666_v1, %v280_v16 }
  0x9c   : >> { %v309_v24 = vadd.f32 %v668_v3, %v308_v19  ;;  %v289_v30 = vsel %vm286_vm8, %v288_v23, %v284_v25 }
  0x9d   : >> { %v290_v33 = vmul.f32 %v289_v30, %v275_v28 }
  0x9e   : >> { %v313_v27 = vsel %vm312_vm6, %v668_v3, %v309_v24 }
  0x9f   : >> { %v318_v29 = vsel %vm315_vm7, %v317_v21, %v313_v27  ;;  %v292_v20 = vsel %vm193_vm4, 0.0, %v290_v33 }
  0xa0   : >> { %v319_v31 = vmul.f32 %v318_v29, %v304_v26  ;;  %v335_v35 = vsel %vm846_vm9, %v292_v20, 0.0 }
  0xa2   : >> { %v320_v4 = vsel %vm193_vm4, 0.0, %v319_v31  ;;  %vm383_vm4 = vcmp.ge.s32.totalorder %v366_v5, %v804_v6 }
  0xa3   : >> { %v325_v34 = vsel %vm846_vm9, %v320_v4, 0.0  ;;  %vm384_vm12 = vmand %vm846_vm9, %vm383_vm4 }
  0xa4   : >> { %326 = vadd.xlane.f32.xlu0 %v325_v34 }
  0xac   : >> { %336 = vadd.xlane.f32.xlu0 %v335_v35 }
 0x117   : >> { %v327_v36 = vpop.xlane.xlu0 %326 }
 0x118   : >> { %328 = vst [vmem:[#allocation6] sm:$0xff] %v327_v36 }
 0x119   : >> { %330 = vst [vmem:[%s329_s23] sm:$0x1] %v718_v37 }
 0x11f   : >> { %v337_v40 = vpop.xlane.xlu0 %336 }
 0x120   : >> { %v351_v41 = vld [vmem:[%s346_s26] sm:$0xff]  ;;  %v343_v15 = vsel %vm846_vm9, %v337_v40, %v342_v38  ;;  %s363_s26 = smov %s346_s26 }
 0x121   : >> { %v353_v42 = vmul.f32 %v352_v39, %v351_v41  ;;  %344 = vst [vmem:[%s789_s18] sm:$0x1] %v343_v15  ;;  %v371_v51 = vld [vmem:[%s363_s26] sm:$0xff] }
 0x123   : >> { %v355_v43 = vsel %vm354_vm10, %v353_v42, 0.0 }
 0x124   : >> { %v356_v44 = vrot.slane %v355_v43, 4 }
 0x126   : >> { %v357_v45 = vadd.f32 %v356_v44, %v355_v43 }
 0x128   : >> { %v358_v46 = vrot.slane %v357_v45, 2  ;;  %v403_v6 = vld [vmem:[#allocation4] sm:$0x3] (%p164_p9) }
 0x129   : > { %406 = vst [vmem:[%s146_s15] sm:$0x3] (%p164_p9), %v403_v6 }
 0x12a   : >> { %v359_v47 = vadd.f32 %v358_v46, %v357_v45 }
 0x12c   : >> { %v360_v48 = vrot.slane %v359_v47, 1 }
 0x12e   : >> { %v361_v49 = vadd.f32 %v360_v48, %v359_v47 }
 0x130   : >> { %v367_v50 = vmul.f32 %v361_v49, %v337_v40 }
 0x132   : >> { %v372_v53 = vmul.f32 %v371_v51, %v367_v50 }
 0x134   : >> { %v376_v54 = vsub.f32 %v373_v52, %v372_v53 }
 0x136   : >> { %v377_v55 = vsel %vm375_vm11, %v376_v54, %v373_v52 }
 0x137   : >> { %v385_v56 = vsel %vm384_vm12, %v371_v51, %v377_v55 }
 0x138   : >> { %386 = vst [vmem:[%s362_s24] sm:$0xff] %v385_v56 }
 0x13d   : > { %166 = sbr.rel (!%p164_p9) target bundleno = 41 (0x29), region = 167 }
 0x13f   : >> { %v388_v57 = vld [vmem:[%s387_s27] ss:$0 sm:$0xff] }
 0x140   : >> { %v393_v58 = vsel %vm846_vm9, %v828_v63, %v388_v57 }
 0x141   : >> { %394 = vst [vmem:[%s387_s27] sm:$0x1] %v393_v58 }
 0x142   : > { %p455_p10 = scmp.lt.s32.totalorder (%p769_p3), %s703_s11, 0  ;;  %s456_s4 = ssub.s32 (%p769_p3), 0, %s703_s11  ;;  %v479_v60 = vld [vmem:[%s146_s15] sm:$0x3] (%p769_p3) }
 0x143   : > { %s605_s5 = smin.u32 (%p769_p3), %s703_s11, %s456_s4 }
 0x144   : > { %s458_s6 = sshrl.u32 (%p769_p3), %s605_s5, 3 }
 0x145   : > { %s459_s7 = ssub.s32 (%p769_p3), 0, %s458_s6 }
 0x148   : > { %v397_v5 = vld [vmem:[#allocation2] sm:$0xf] }
 0x149   : > { %400 = vst [vmem:[%s792_s19] sm:$0xf] %v397_v5 }
 0x14d   : > { %454 = sbr.rel (!%p769_p3) target bundleno = 342 (0x156), region = 91 }
 0x150   : > { %v435_v59 = vld [vmem:[%s792_s19] sm:$0xf] }
 0x151   : > { %436 = vst [vmem:[%s418_s3] sm:$0xf] %v435_v59 }
 0x152   : > { %s924_s7 = smov (!%p455_p10, %s459_s7), %s458_s6 }
 0x153   : > { %s606_s16 = sshll.u32 %s924_s7, 1 }
 0x154   : > { %s462_s19 = scalar_lea.vmem %s911_s2, %s606_s16 }
 0x155   : > { %480 = vst [vmem:[%s462_s19] sm:$0x3] %v479_v60 }
 0x156 PF: > { %s9_s13 = sadd.s32 1, %s711_s13   ;;  %s917_s9 = smov %s699_s10 }
 0x157   : > { %p6_p11 = scmp.ge.s32.totalorder %s9_s13, 4   ;;  %s918_s10 = smov %s775_s25 }
 0x158   : > { %s919_s11 = smov %s707_s12  ;;  %s920_s12 = smov %s922_s14 }
 0x159   :  { %8 = sbr.rel (!%p6_p11) target bundleno = 3 (0x3), region = 178 }

</bundles_post_ra>
